<compile_context>
chip_gen: v7x
topology: tpu7x:2x2x1
jax: 0.10.0
libtpu: 0.0.40
codegen_flags: <defaults>
</compile_context>

<pallas_src>
import math
import numpy as np
import jax
import jax.numpy as jnp
from jax.experimental import pallas as pl
from jax.experimental.pallas import tpu as pltpu

H_BERT = 768
H_MID = 128
H_OUT = 176
LN_EPS = 1e-5
_NEG_BIG = 1e30          # additive-mask magnitude (finite -> no NaN for fully masked rows)
_SUM_CHUNK = 64          # S-chunk size for the VPU weighted-sum accumulation


def _gelu_tanh(x):
    # tanh-approximate GELU (VPU + EUP; no erf primitive needed)
    return 0.5 * x * (1.0 + jnp.tanh(0.7978845608028654 * (x + 0.044715 * x * x * x)))


def get_real_state_kernel(x_ref, mask_ref,
                          w1_ref, b1_ref, g_ref, be_ref,
                          w2_ref, w3_ref, b3_ref,
                          out_ref):
    # x_ref:    (Bt, S, 768)  bf16 (or f32)
    # mask_ref: (Bt, S, 1)    f32, 1.0 = keep / 0.0 = masked
    Bt, S, H = x_ref.shape

    # ---- token head: Linear(768,128) -> LayerNorm(128) -> GELU, f32 arithmetic ----
    # Flatten batch*seq (layout-preserving: S is sublane-aligned by the wrapper) so the
    # MXU sees one big M = Bt*S matmul.
    xf = x_ref[...].reshape(Bt * S, H)
    h = jnp.dot(xf, w1_ref[...], preferred_element_type=jnp.float32)
    h = h + b1_ref[...]                                            # (Bt*S, 128) f32
    mu = jnp.mean(h, axis=-1, keepdims=True)
    var = jnp.mean((h - mu) * (h - mu), axis=-1, keepdims=True)
    h = (h - mu) * jax.lax.rsqrt(var + LN_EPS)
    h = h * g_ref[...] + be_ref[...]
    h = _gelu_tanh(h)

    # ---- token scores: Linear(128,1) on the MXU (weights loaded once, M = Bt*S).
    #      Output is naturally sublane-major (Bt*S,1), which is exactly the layout the
    #      weighted sum needs; b2 is dropped (softmax is shift-invariant). ----
    sv = jnp.dot(h, w2_ref[...], preferred_element_type=jnp.float32)   # (Bt*S, 1)
    sv = sv.reshape(Bt, S, 1)                                          # leading-dim split
    sv = sv + (mask_ref[...] - 1.0) * _NEG_BIG                         # additive finite mask

    # ---- masked softmax over the sequence (sublane) axis ----
    m = jnp.max(sv, axis=1, keepdims=True)                             # (Bt, 1, 1)
    e = jnp.exp(sv - m)                                                # (Bt, S, 1)
    denom = jnp.sum(e, axis=1, keepdims=True)                          # (Bt, 1, 1)
    wv = e * pl.reciprocal(denom, approx=True)                         # (Bt, S, 1)

    # ---- attention-weighted sum over S: chunked VPU multiply-accumulate.
    #      (An MXU (1,S)x(S,768) per batch row would reload the activation slab as MXU
    #      weights for a single output row -> ~Bt*6 wasted weight loads per step.) ----
    emb = jnp.zeros((Bt, H), jnp.float32)
    for c0 in range(0, S, _SUM_CHUNK):
        c1 = min(c0 + _SUM_CHUNK, S)
        xs = x_ref[:, c0:c1, :].astype(jnp.float32)                    # (Bt, C, 768)
        emb = emb + jnp.sum(xs * wv[:, c0:c1, :], axis=1)

    # ---- final Linear(768,176): one (Bt,768)x(768,176) matmul; dropout = identity ----
    out = jnp.dot(emb.astype(w3_ref.dtype), w3_ref[...],
                  preferred_element_type=jnp.float32) + b3_ref[...]    # (Bt, 176)
    out_ref[...] = out


def _vmem_capacity_bytes():
    """Per-TensorCore VMEM capacity; conservative (v7x-sized) fallback on failure."""
    try:
        info = pltpu.get_tpu_info()
        for name in ("vmem_capacity_bytes", "vmem_size_bytes", "vmem_bytes"):
            v = getattr(info, name, None)
            if v:
                return int(v)
    except Exception:
        pass
    return 64 * 1024 * 1024


def get_real_state(last_hidden_state, attention_mask, params, *,
                   block_b=16, matmul_dtype=jnp.bfloat16):
    """last_hidden_state: [B, S, 768] f32, attention_mask: [B, S] (0/1)."""
    B, S, H = last_hidden_state.shape
    assert H == H_BERT
    w1, b1, g, be, w2, _b2, w3, b3 = params   # b2 unused: softmax is shift-invariant

    itemsz = jnp.dtype(matmul_dtype).itemsize
    sub = 8 * (4 // itemsz)                    # sublane packing: 8 (f32) / 16 (bf16)
    S_pad = ((S + sub - 1) // sub) * sub       # keeps (Bt,S,768)->(Bt*S,768) a pure view

    # ---- generation-aware VMEM / tile policy ----
    vmem_cap = _vmem_capacity_bytes()
    small_vmem = vmem_cap <= 80 * 1024 * 1024          # v7x-class: 64 MiB per TensorCore
    act_budget = (36 if small_vmem else 48) * 1024 * 1024
    vmem_limit = (48 if small_vmem else 80) * 1024 * 1024
    hard_cap = vmem_limit - 8 * 1024 * 1024            # leave room for weights + scratch

    per_row = (2 * S_pad * H_BERT * itemsz             # double-buffered x block
               + 2 * S_pad * H_MID * 4                 # f32 h + one elementwise temp
               + 2 * _SUM_CHUNK * H_BERT * 4           # weighted-sum chunk temporaries
               + 6 * S_pad * 512)                      # lane-padded (Bt,S,1) mask/softmax temps
    if 8 * per_row > hard_cap:
        # TODO(synk): add an S-tiling (two-level pipeline) fallback for very long sequences.
        raise ValueError(f"seq_len={S} too long for the VMEM budget at the minimum Bt=8")

    Bt = max(8, (int(block_b) // 8) * 8)
    B_r8 = ((B + 7) // 8) * 8
    # keep >= ~4 grid steps when the batch allows it (v7x: 2 TCs x >= 2 steps each)
    Bt = min(Bt, max(8, (B_r8 // (8 * 4)) * 8))
    # VMEM cap (floors at 8; the hard_cap check above guarantees 8 fits)
    Bt = min(Bt, max(8, (act_budget // per_row) // 8 * 8))
    B_pad = ((B + Bt - 1) // Bt) * Bt

    x = last_hidden_state.astype(matmul_dtype)
    mask = attention_mask.astype(jnp.float32)
    if (B_pad, S_pad) != (B, S):
        # padded rows/tokens are fully masked -> finite uniform softmax, sliced off below
        x = jnp.pad(x, ((0, B_pad - B), (0, S_pad - S), (0, 0)))
        mask = jnp.pad(mask, ((0, B_pad - B), (0, S_pad - S)))
    mask3 = mask[:, :, None]                                      # (B_pad, S_pad, 1)

    w1c = w1.astype(matmul_dtype)
    w3c = w3.astype(matmul_dtype)
    w2_col = w2.reshape(H_MID, 1).astype(jnp.float32)             # (128, 1) MXU weight

    flops = int(B_pad * S_pad * (2 * H_BERT * H_MID + 2 * H_MID + 2 * H_BERT)
                + B_pad * 2 * H_BERT * H_OUT)
    transcendentals = int(B_pad * S_pad * (H_MID + 2))
    bytes_accessed = int(x.size * itemsz + mask3.size * 4 + B_pad * H_OUT * 4
                         + (w1c.size + w3c.size) * itemsz
                         + (b1.size + g.size + be.size + w2_col.size + b3.size) * 4)

    grid = (B_pad // Bt,)
    out = pl.pallas_call(
        get_real_state_kernel,
        out_shape=jax.ShapeDtypeStruct((B_pad, H_OUT), jnp.float32),
        grid=grid,
        in_specs=[
            pl.BlockSpec((Bt, S_pad, H), lambda b: (b, 0, 0)),    # hidden states (bf16)
            pl.BlockSpec((Bt, S_pad, 1), lambda b: (b, 0, 0)),    # mask (f32, sublane-major)
            # NOTE: constant-index weight blocks are DMA'd once; pl.Buffered(1) would
            # reclaim ~1 MB of duplicate buffering but is skipped for compile breadth.
            pl.BlockSpec((H, H_MID), lambda b: (0, 0)),           # W1 (bf16)
            pl.BlockSpec((1, H_MID), lambda b: (0, 0)),           # b1
            pl.BlockSpec((1, H_MID), lambda b: (0, 0)),           # LN gamma
            pl.BlockSpec((1, H_MID), lambda b: (0, 0)),           # LN beta
            pl.BlockSpec((H_MID, 1), lambda b: (0, 0)),           # W2 column (f32)
            pl.BlockSpec((H, H_OUT), lambda b: (0, 0)),           # W3 (bf16)
            pl.BlockSpec((1, H_OUT), lambda b: (0, 0)),           # b3
        ],
        out_specs=pl.BlockSpec((Bt, H_OUT), lambda b: (b, 0)),
        compiler_params=pltpu.CompilerParams(
            dimension_semantics=("parallel",),                    # megacore-splittable (v7x)
            vmem_limit_bytes=vmem_limit),
        cost_estimate=pl.CostEstimate(flops=flops,
                                      transcendentals=transcendentals,
                                      bytes_accessed=bytes_accessed),
    )(x, mask3, w1c, b1, g, be, w2_col, w3c, b3)
    return out[:B]


def init_params(key):
    """Deterministic synthetic parameters, PyTorch-default-style uniform init."""
    ks = jax.random.split(key, 6)

    def linear(kw, kb, fan_in, fan_out):
        bound = 1.0 / math.sqrt(fan_in)
        W = jax.random.uniform(kw, (fan_in, fan_out), jnp.float32, -bound, bound)
        b = jax.random.uniform(kb, (1, fan_out), jnp.float32, -bound, bound)
        return W, b

    w1, b1 = linear(ks[0], ks[1], H_BERT, H_MID)     # pooledout[0]
    g = jnp.ones((1, H_MID), jnp.float32)            # LayerNorm weight
    be = jnp.zeros((1, H_MID), jnp.float32)          # LayerNorm bias
    w2, b2 = linear(ks[2], ks[3], H_MID, 1)          # pooledout[3]
    w3, b3 = linear(ks[4], ks[5], H_BERT, H_OUT)     # self.linear
    return (w1, b1, g, be, w2, b2, w3, b3)


def reference(last_hidden_state, attention_mask, params, matmul_dtype=jnp.float32):
    """Pure-JAX reference of the same math. With matmul_dtype=bf16 it mirrors the
    kernel's casts; with f32 it is the original module's f32 forward pass."""
    w1, b1, g, be, w2, b2, w3, b3 = params
    x = last_hidden_state.astype(matmul_dtype)
    h = jnp.dot(x, w1.astype(matmul_dtype), preferred_element_type=jnp.float32) + b1
    mu = h.mean(-1, keepdims=True)
    var = ((h - mu) ** 2).mean(-1, keepdims=True)
    h = (h - mu) / jnp.sqrt(var + LN_EPS) * g + be
    h = _gelu_tanh(h)
    s = jnp.sum(h * w2.reshape(1, 1, H_MID), axis=-1) + b2.reshape(())       # [B,S]
    s = jnp.where(attention_mask == 0, -jnp.inf, s)
    w = jax.nn.softmax(s, axis=-1)
    emb = jnp.einsum('bs,bsh->bh', w, x.astype(jnp.float32))                 # [B,768]
    out = jnp.dot(emb.astype(matmul_dtype), w3.astype(matmul_dtype),
                  preferred_element_type=jnp.float32) + b3                   # [B,176]
    return out


if __name__ == "__main__":
    key = jax.random.PRNGKey(0)
    k_param, k_x, k_x2 = jax.random.split(key, 3)

    params = init_params(k_param)

    # --- small shape: B=2, S=8 (S padded to 16, B padded to 8 inside the wrapper) ---
    B, S = 2, 8
    last_hidden_state = jax.random.normal(k_x, (B, S, H_BERT), jnp.float32)
    # batch 0: all tokens valid; batch 1: only first 5 tokens valid
    attention_mask = jnp.array([[1] * S, [1] * 5 + [0] * (S - 5)], dtype=jnp.int32)

    out = jax.block_until_ready(
        get_real_state(last_hidden_state, attention_mask, params))

    # Tight check against a reference that mirrors the kernel's bf16 matmul casts.
    ref_bf16 = reference(last_hidden_state, attention_mask, params,
                         matmul_dtype=jnp.bfloat16)
    np.testing.assert_allclose(np.asarray(out), np.asarray(ref_bf16),
                               rtol=1e-2, atol=1e-2)
    # Loose check against the original full-f32 module math (bf16 matmul noise).
    ref_f32 = reference(last_hidden_state, attention_mask, params,
                        matmul_dtype=jnp.float32)
    np.testing.assert_allclose(np.asarray(out), np.asarray(ref_f32),
                               rtol=5e-2, atol=5e-2)

    # --- multi-step grid + batch/seq padding path: B=24, S=40 (Bt=8, grid=(3,)) ---
    B2, S2 = 24, 40
    x2 = jax.random.normal(k_x2, (B2, S2, H_BERT), jnp.float32)
    lens = (jnp.arange(B2) % S2) + 1
    mask2 = (jnp.arange(S2)[None, :] < lens[:, None]).astype(jnp.int32)
    out2 = jax.block_until_ready(get_real_state(x2, mask2, params))
    ref2 = reference(x2, mask2, params, matmul_dtype=jnp.bfloat16)
    np.testing.assert_allclose(np.asarray(out2), np.asarray(ref2),
                               rtol=1e-2, atol=1e-2)

    print("KERNEL_OK")
</pallas_src>

<mosaic_0001>
module attributes {stable_mosaic.version = 11 : i64} {
  func.func @get_real_state_kernel(%arg0: i32, %arg1: memref<8x16x768xbf16, #tpu.memory_space<vmem>>, %arg2: memref<8x16x1xf32, #tpu.memory_space<vmem>>, %arg3: memref<768x128xbf16, #tpu.memory_space<vmem>>, %arg4: memref<1x128xf32, #tpu.memory_space<vmem>>, %arg5: memref<1x128xf32, #tpu.memory_space<vmem>>, %arg6: memref<1x128xf32, #tpu.memory_space<vmem>>, %arg7: memref<128x1xf32, #tpu.memory_space<vmem>>, %arg8: memref<768x176xbf16, #tpu.memory_space<vmem>>, %arg9: memref<1x176xf32, #tpu.memory_space<vmem>>, %arg10: memref<8x176xf32, #tpu.memory_space<vmem>>) attributes {dimension_semantics = [#tpu.dimension_semantics<parallel>], iteration_bounds = array<i64: 1>, scalar_prefetch = 0 : i64, scratch_operands = 0 : i64, tpu.core_type = #tpu.core_type<tc>, window_params = [{transform_indices = @transform_0, window_bounds = array<i64: 8, 16, 768>}, {transform_indices = @transform_1, window_bounds = array<i64: 8, 16, 1>}, {pipeline_mode = #tpu.pipeline_mode<synchronous>, transform_indices = @transform_2, window_bounds = array<i64: 768, 128>}, {pipeline_mode = #tpu.pipeline_mode<synchronous>, transform_indices = @transform_3, window_bounds = array<i64: 1, 128>}, {pipeline_mode = #tpu.pipeline_mode<synchronous>, transform_indices = @transform_4, window_bounds = array<i64: 1, 128>}, {pipeline_mode = #tpu.pipeline_mode<synchronous>, transform_indices = @transform_5, window_bounds = array<i64: 1, 128>}, {pipeline_mode = #tpu.pipeline_mode<synchronous>, transform_indices = @transform_6, window_bounds = array<i64: 128, 1>}, {pipeline_mode = #tpu.pipeline_mode<synchronous>, transform_indices = @transform_7, window_bounds = array<i64: 768, 176>}, {pipeline_mode = #tpu.pipeline_mode<synchronous>, transform_indices = @transform_8, window_bounds = array<i64: 1, 176>}, {transform_indices = @transform_9, window_bounds = array<i64: 8, 176>}]} {
    %c0 = arith.constant 0 : index
    %c0_0 = arith.constant 0 : index
    %c0_1 = arith.constant 0 : index
    %0 = vector.load %arg1[%c0, %c0_0, %c0_1] : memref<8x16x768xbf16, #tpu.memory_space<vmem>>, vector<8x16x768xbf16>
    %1 = vector.shape_cast %0 : vector<8x16x768xbf16> to vector<128x768xbf16>
    %c0_2 = arith.constant 0 : index
    %c0_3 = arith.constant 0 : index
    %2 = vector.load %arg3[%c0_2, %c0_3] : memref<768x128xbf16, #tpu.memory_space<vmem>>, vector<768x128xbf16>
    %cst = arith.constant dense<0.000000e+00> : vector<128x128xf32>
    %3 = tpu.matmul %1, %2, %cst {dimension_numbers = #tpu.dot_dimension_numbers<[1], [0], [0], [1], [0, 0, 1, 1], [], []>} : vector<128x768xbf16>, vector<768x128xbf16>, vector<128x128xf32> -> vector<128x128xf32>
    %c0_4 = arith.constant 0 : index
    %c0_5 = arith.constant 0 : index
    %4 = vector.load %arg4[%c0_4, %c0_5] : memref<1x128xf32, #tpu.memory_space<vmem>>, vector<1x128xf32>
    %5 = vector.broadcast %4 : vector<1x128xf32> to vector<128x128xf32>
    %6 = arith.addf %3, %5 : vector<128x128xf32>
    %cst_6 = arith.constant dense<0.000000e+00> : vector<128xf32>
    %7 = vector.multi_reduction <add>, %6, %cst_6 [1] : vector<128x128xf32> to vector<128xf32>
    %8 = vector.shape_cast %7 : vector<128xf32> to vector<128x1xf32>
    %cst_7 = arith.constant 1.280000e+02 : f32
    %9 = vector.broadcast %cst_7 : f32 to vector<128x1xf32>
    %10 = arith.divf %8, %9 : vector<128x1xf32>
    %11 = vector.broadcast %10 : vector<128x1xf32> to vector<128x128xf32>
    %12 = arith.subf %6, %11 : vector<128x128xf32>
    %13 = vector.broadcast %10 : vector<128x1xf32> to vector<128x128xf32>
    %14 = arith.subf %6, %13 : vector<128x128xf32>
    %15 = arith.mulf %12, %14 : vector<128x128xf32>
    %cst_8 = arith.constant dense<0.000000e+00> : vector<128xf32>
    %16 = vector.multi_reduction <add>, %15, %cst_8 [1] : vector<128x128xf32> to vector<128xf32>
    %17 = vector.shape_cast %16 : vector<128xf32> to vector<128x1xf32>
    %cst_9 = arith.constant 1.280000e+02 : f32
    %18 = vector.broadcast %cst_9 : f32 to vector<128x1xf32>
    %19 = arith.divf %17, %18 : vector<128x1xf32>
    %20 = vector.broadcast %10 : vector<128x1xf32> to vector<128x128xf32>
    %21 = arith.subf %6, %20 : vector<128x128xf32>
    %cst_10 = arith.constant 9.99999974E-6 : f32
    %22 = vector.broadcast %cst_10 : f32 to vector<128x1xf32>
    %23 = arith.addf %19, %22 : vector<128x1xf32>
    %24 = math.rsqrt %23 : vector<128x1xf32>
    %25 = vector.broadcast %24 : vector<128x1xf32> to vector<128x128xf32>
    %26 = arith.mulf %21, %25 : vector<128x128xf32>
    %c0_11 = arith.constant 0 : index
    %c0_12 = arith.constant 0 : index
    %27 = vector.load %arg5[%c0_11, %c0_12] : memref<1x128xf32, #tpu.memory_space<vmem>>, vector<1x128xf32>
    %28 = vector.broadcast %27 : vector<1x128xf32> to vector<128x128xf32>
    %29 = arith.mulf %26, %28 : vector<128x128xf32>
    %c0_13 = arith.constant 0 : index
    %c0_14 = arith.constant 0 : index
    %30 = vector.load %arg6[%c0_13, %c0_14] : memref<1x128xf32, #tpu.memory_space<vmem>>, vector<1x128xf32>
    %31 = vector.broadcast %30 : vector<1x128xf32> to vector<128x128xf32>
    %32 = arith.addf %29, %31 : vector<128x128xf32>
    %cst_15 = arith.constant 5.000000e-01 : f32
    %33 = vector.broadcast %cst_15 : f32 to vector<128x128xf32>
    %34 = arith.mulf %33, %32 : vector<128x128xf32>
    %cst_16 = arith.constant 4.471500e-02 : f32
    %35 = vector.broadcast %cst_16 : f32 to vector<128x128xf32>
    %36 = arith.mulf %35, %32 : vector<128x128xf32>
    %37 = arith.mulf %36, %32 : vector<128x128xf32>
    %38 = arith.mulf %37, %32 : vector<128x128xf32>
    %39 = arith.addf %32, %38 : vector<128x128xf32>
    %cst_17 = arith.constant 0.797884583 : f32
    %40 = vector.broadcast %cst_17 : f32 to vector<128x128xf32>
    %41 = arith.mulf %40, %39 : vector<128x128xf32>
    %42 = math.tanh %41 : vector<128x128xf32>
    %cst_18 = arith.constant 1.000000e+00 : f32
    %43 = vector.broadcast %cst_18 : f32 to vector<128x128xf32>
    %44 = arith.addf %43, %42 : vector<128x128xf32>
    %45 = arith.mulf %34, %44 : vector<128x128xf32>
    %c0_19 = arith.constant 0 : index
    %c0_20 = arith.constant 0 : index
    %46 = vector.load %arg7[%c0_19, %c0_20] : memref<128x1xf32, #tpu.memory_space<vmem>>, vector<128x1xf32>
    %cst_21 = arith.constant dense<0.000000e+00> : vector<128x1xf32>
    %47 = tpu.matmul %45, %46, %cst_21 {dimension_numbers = #tpu.dot_dimension_numbers<[1], [0], [0], [1], [0, 0, 1, 1], [], []>} : vector<128x128xf32>, vector<128x1xf32>, vector<128x1xf32> -> vector<128x1xf32>
    %48 = vector.shape_cast %47 : vector<128x1xf32> to vector<8x16x1xf32>
    %c0_22 = arith.constant 0 : index
    %c0_23 = arith.constant 0 : index
    %c0_24 = arith.constant 0 : index
    %49 = vector.load %arg2[%c0_22, %c0_23, %c0_24] : memref<8x16x1xf32, #tpu.memory_space<vmem>>, vector<8x16x1xf32>
    %cst_25 = arith.constant 1.000000e+00 : f32
    %50 = vector.broadcast %cst_25 : f32 to vector<8x16x1xf32>
    %51 = arith.subf %49, %50 : vector<8x16x1xf32>
    %cst_26 = arith.constant 1.000000e+30 : f32
    %52 = vector.broadcast %cst_26 : f32 to vector<8x16x1xf32>
    %53 = arith.mulf %51, %52 : vector<8x16x1xf32>
    %54 = arith.addf %48, %53 : vector<8x16x1xf32>
    %cst_27 = arith.constant dense<0xFF800000> : vector<8x1xf32>
    %55 = vector.multi_reduction <maximumf>, %54, %cst_27 [1] : vector<8x16x1xf32> to vector<8x1xf32>
    %56 = vector.shape_cast %55 : vector<8x1xf32> to vector<8x1x1xf32>
    %57 = vector.broadcast %56 : vector<8x1x1xf32> to vector<8x16x1xf32>
    %58 = arith.subf %54, %57 : vector<8x16x1xf32>
    %59 = math.exp %58 : vector<8x16x1xf32>
    %cst_28 = arith.constant dense<0.000000e+00> : vector<8x1xf32>
    %60 = vector.multi_reduction <add>, %59, %cst_28 [1] : vector<8x16x1xf32> to vector<8x1xf32>
    %61 = vector.shape_cast %60 : vector<8x1xf32> to vector<8x1x1xf32>
    %62 = tpu.reciprocal %61 {approx = true} : vector<8x1x1xf32> -> vector<8x1x1xf32>
    %63 = vector.broadcast %62 : vector<8x1x1xf32> to vector<8x16x1xf32>
    %64 = arith.mulf %59, %63 : vector<8x16x1xf32>
    %cst_29 = arith.constant 0.000000e+00 : f32
    %65 = vector.broadcast %cst_29 : f32 to vector<8x768xf32>
    %c0_30 = arith.constant 0 : index
    %c0_31 = arith.constant 0 : index
    %c0_32 = arith.constant 0 : index
    %66 = vector.load %arg1[%c0_30, %c0_31, %c0_32] : memref<8x16x768xbf16, #tpu.memory_space<vmem>>, vector<8x16x768xbf16>
    %67 = arith.extf %66 : vector<8x16x768xbf16> to vector<8x16x768xf32>
    %68 = vector.broadcast %64 : vector<8x16x1xf32> to vector<8x16x768xf32>
    %69 = arith.mulf %67, %68 : vector<8x16x768xf32>
    %cst_33 = arith.constant dense<0.000000e+00> : vector<8x768xf32>
    %70 = vector.multi_reduction <add>, %69, %cst_33 [1] : vector<8x16x768xf32> to vector<8x768xf32>
    %71 = arith.addf %65, %70 : vector<8x768xf32>
    %72 = arith.truncf %71 : vector<8x768xf32> to vector<8x768xbf16>
    %c0_34 = arith.constant 0 : index
    %c0_35 = arith.constant 0 : index
    %73 = vector.load %arg8[%c0_34, %c0_35] : memref<768x176xbf16, #tpu.memory_space<vmem>>, vector<768x176xbf16>
    %cst_36 = arith.constant dense<0.000000e+00> : vector<8x176xf32>
    %74 = tpu.matmul %72, %73, %cst_36 {dimension_numbers = #tpu.dot_dimension_numbers<[1], [0], [0], [1], [0, 0, 1, 1], [], []>} : vector<8x768xbf16>, vector<768x176xbf16>, vector<8x176xf32> -> vector<8x176xf32>
    %c0_37 = arith.constant 0 : index
    %c0_38 = arith.constant 0 : index
    %75 = vector.load %arg9[%c0_37, %c0_38] : memref<1x176xf32, #tpu.memory_space<vmem>>, vector<1x176xf32>
    %76 = vector.broadcast %75 : vector<1x176xf32> to vector<8x176xf32>
    %77 = arith.addf %74, %76 : vector<8x176xf32>
    %c0_39 = arith.constant 0 : index
    %c0_40 = arith.constant 0 : index
    %78 = vector.load %arg10[%c0_39, %c0_40] : memref<8x176xf32, #tpu.memory_space<vmem>>, vector<8x176xf32>
    tpu.vector_store %arg10[%c0_39, %c0_40], %77 {strides = array<i32>} : memref<8x176xf32, #tpu.memory_space<vmem>>, vector<8x176xf32>,
    return
  }
  func.func @transform_0(%arg0: i32) -> (i32, i32, i32) {
    %c0_i32 = arith.constant 0 : i32
    %c0_i32_0 = arith.constant 0 : i32
    %c0_i32_1 = arith.constant 0 : i32
    return %arg0, %c0_i32, %c0_i32_0 : i32, i32, i32
  }
  func.func @transform_1(%arg0: i32) -> (i32, i32, i32) {
    %c0_i32 = arith.constant 0 : i32
    %c0_i32_0 = arith.constant 0 : i32
    %c0_i32_1 = arith.constant 0 : i32
    return %arg0, %c0_i32, %c0_i32_0 : i32, i32, i32
  }
  func.func @transform_2(%arg0: i32) -> (i32, i32) {
    %c0_i32 = arith.constant 0 : i32
    %c0_i32_0 = arith.constant 0 : i32
    %c0_i32_1 = arith.constant 0 : i32
    return %c0_i32, %c0_i32_0 : i32, i32
  }
  func.func @transform_3(%arg0: i32) -> (i32, i32) {
    %c0_i32 = arith.constant 0 : i32
    %c0_i32_0 = arith.constant 0 : i32
    %c0_i32_1 = arith.constant 0 : i32
    return %c0_i32, %c0_i32_0 : i32, i32
  }
  func.func @transform_4(%arg0: i32) -> (i32, i32) {
    %c0_i32 = arith.constant 0 : i32
    %c0_i32_0 = arith.constant 0 : i32
    %c0_i32_1 = arith.constant 0 : i32
    return %c0_i32, %c0_i32_0 : i32, i32
  }
  func.func @transform_5(%arg0: i32) -> (i32, i32) {
    %c0_i32 = arith.constant 0 : i32
    %c0_i32_0 = arith.constant 0 : i32
    %c0_i32_1 = arith.constant 0 : i32
    return %c0_i32, %c0_i32_0 : i32, i32
  }
  func.func @transform_6(%arg0: i32) -> (i32, i32) {
    %c0_i32 = arith.constant 0 : i32
    %c0_i32_0 = arith.constant 0 : i32
    %c0_i32_1 = arith.constant 0 : i32
    return %c0_i32, %c0_i32_0 : i32, i32
  }
  func.func @transform_7(%arg0: i32) -> (i32, i32) {
    %c0_i32 = arith.constant 0 : i32
    %c0_i32_0 = arith.constant 0 : i32
    %c0_i32_1 = arith.constant 0 : i32
    return %c0_i32, %c0_i32_0 : i32, i32
  }
  func.func @transform_8(%arg0: i32) -> (i32, i32) {
    %c0_i32 = arith.constant 0 : i32
    %c0_i32_0 = arith.constant 0 : i32
    %c0_i32_1 = arith.constant 0 : i32
    return %c0_i32, %c0_i32_0 : i32, i32
  }
  func.func @transform_9(%arg0: i32) -> (i32, i32) {
    %c0_i32 = arith.constant 0 : i32
    %c0_i32_0 = arith.constant 0 : i32
    return %arg0, %c0_i32 : i32, i32
  }
}

</mosaic_0001>

<bundles_post_ra>
// kernel: tpu_custom_call.1
= control target key start
LH: loop header
LB: loop body
LE: loop exit
PB: predicated region body
PF: predicated region fallthrough
CT: control target
= control target key end

     0   :  { %s6400_s0 = inlined_call_operand.vmem [shape: bf16[8,16,768], index: 0, kind: input, shape index: {}]   ;;  %s6401_s1 = inlined_call_operand.vmem [shape: f32[8,16,1], index: 1, kind: input, shape index: {}]   ;;  %s6402_s2 = inlined_call_operand.vmem [shape: bf16[768,128], index: 2, kind: input, shape index: {}]   ;;  %s6403_s3 = inlined_call_operand.vmem [shape: f32[1,128], index: 3, kind: input, shape index: {}]   ;;  %s6404_s4 = inlined_call_operand.vmem [shape: f32[1,128], index: 4, kind: input, shape index: {}]   ;;  %s6405_s5 = inlined_call_operand.vmem [shape: f32[1,128], index: 5, kind: input, shape index: {}]   ;;  %s6406_s6 = inlined_call_operand.vmem [shape: f32[128,1], index: 6, kind: input, shape index: {}]   ;;  %s6407_s7 = inlined_call_operand.vmem [shape: bf16[768,176], index: 7, kind: input, shape index: {}]   ;;  %s6408_s8 = inlined_call_operand.vmem [shape: f32[1,176], index: 8, kind: input, shape index: {}]   ;;  %s6409_s9 = inlined_call_operand.hbm [shape: f32[8,176], index: 9, kind: output, shape index: {}]  }
   0x1   :  { %v3939_v0 = vld [vmem:[%s6402_s2 + $0x40] sm:$0xff]   ;;  %v3941_v2 = vld [vmem:[%s6402_s2 + $0x48] sm:$0xff]   ;;  %v3943_v4 = vld [vmem:[%s6402_s2 + $0x50] sm:$0xff]  }
   0x2   :  { %v3940_v1 = vld [vmem:[%s6402_s2] sm:$0xff]   ;;  %3613 = vmatprep.subr.bf16.mxu1 %v3939_v0  ;;  %v3942_v3 = vld [vmem:[%s6402_s2 + $0x8] sm:$0xff]   ;;  %v3944_v5 = vld [vmem:[%s6402_s2 + $0x10] sm:$0xff]  }
   0x3   :  { %3614 = vmatpush3.bf16.msra.mxu1 %v3940_v1  ;;  %v3945_v6 = vld [vmem:[%s6402_s2 + $0x58] sm:$0xff]   ;;  %v3947_v8 = vld [vmem:[%s6402_s2 + $0x60] sm:$0xff]   ;;  %v3949_v10 = vld [vmem:[%s6402_s2 + $0x68] sm:$0xff]  }
   0x4   :  { %3615 = vmatprep.subr.bf16.mxu1 %v3941_v2  ;;  %v3946_v7 = vld [vmem:[%s6402_s2 + $0x18] sm:$0xff]   ;;  %v3948_v9 = vld [vmem:[%s6402_s2 + $0x20] sm:$0xff]   ;;  %v3950_v14 = vld [vmem:[%s6402_s2 + $0x28] sm:$0xff]  }
   0x5   :  { %v34_v11 = vld [vmem:[%s6400_s0] sm:$0xff]  ;;  %v37_v12 = vld [vmem:[%s6400_s0 + $0x18] sm:$0xff]  ;;  %v3951_v15 = vld [vmem:[%s6402_s2 + $0x70] sm:$0xff]  }
   0x6   :  { %v3404_v13 = vcombine.high %v34_v11, %v37_v12  ;;  %v3952_v16 = vld [vmem:[%s6402_s2 + $0x30] sm:$0xff]   ;;  %v3953_v17 = vld [vmem:[%s6402_s2 + $0x78] sm:$0xff]   ;;  %v3957_v19 = vld [vmem:[%s6402_s2 + $0xc0] sm:$0xff]   ;;  %v3403_v24 = vcombine.low %v34_v11, %v37_v12 }
   0x7   :  { %3616 = vmatpush3.bf16.msra.mxu1 %v3942_v3  ;;  %v3954_v18 = vld [vmem:[%s6402_s2 + $0x38] sm:$0xff]   ;;  %v40_v20 = vld [vmem:[%s6400_s0 + $0x30] sm:$0xff]  ;;  %v43_v21 = vld [vmem:[%s6400_s0 + $0x48] sm:$0xff] }
   0x8   :  { %3617 = vmatprep.subr.bf16.mxu1 %v3943_v4  ;;  %745 = vmatprep.mubr.bf16.mxu1 %v3404_v13  ;;  %v3958_v22 = vld [vmem:[%s6402_s2 + $0x80] sm:$0xff]   ;;  %v3961_v25 = vld [vmem:[%s6402_s2 + $0xc8] sm:$0xff]   ;;  %v3410_v26 = vcombine.high %v40_v20, %v43_v21  ;;  %v49_v32 = vld [vmem:[%s6400_s0 + $0x78] sm:$0xff]  ;;  %v3409_v36 = vcombine.low %v40_v20, %v43_v21 }
   0x9   :  { %v3974_v23 = vld [vmem:[%s6402_s2 + $0x140] sm:$0xff]   ;;  %v3977_v28 = vld [vmem:[%s6402_s2 + $0x148] sm:$0xff]   ;;  %v3982_v33 = vld [vmem:[%s6402_s2 + $0x150] sm:$0xff]  }
   0xa   :  { %3741 = vmatprep.subr.bf16.mxu0 %v3974_v23  ;;  %v3976_v27 = vld [vmem:[%s6402_s2 + $0x100] sm:$0xff]   ;;  %v3962_v29 = vld [vmem:[%s6402_s2 + $0x88] sm:$0xff]   ;;  %v3965_v34 = vld [vmem:[%s6402_s2 + $0xd0] sm:$0xff]  }
   0xb   :  { %3618 = vmatpush3.bf16.msra.mxu1 %v3944_v5  ;;  %3742 = vmatpush3.bf16.msra.mxu0 %v3976_v27  ;;  %v3978_v30 = vld [vmem:[%s6402_s2 + $0x108] sm:$0xff]   ;;  %v46_v31 = vld [vmem:[%s6400_s0 + $0x60] sm:$0xff]  ;;  %v3984_v35 = vld [vmem:[%s6402_s2 + $0x110] sm:$0xff]  }
   0xc   :  { %3619 = vmatprep.subr.bf16.mxu1 %v3945_v6  ;;  %3743 = vmatprep.subr.bf16.mxu0 %v3977_v28  ;;  %v3985_v37 = vld [vmem:[%s6402_s2 + $0x158] sm:$0xff]   ;;  %v3416_v38 = vcombine.high %v46_v31, %v49_v32  ;;  %v3966_v39 = vld [vmem:[%s6402_s2 + $0x90] sm:$0xff]   ;;  %v55_v43 = vld [vmem:[%s6400_s0 + $0xa8] sm:$0xff]  ;;  %v3415_v48 = vcombine.low %v46_v31, %v49_v32 }
   0xd   :  { %v3969_v40 = vld [vmem:[%s6402_s2 + $0xd8] sm:$0xff]   ;;  %v52_v42 = vld [vmem:[%s6400_s0 + $0x90] sm:$0xff]  ;;  %v3990_v44 = vld [vmem:[%s6402_s2 + $0x160] sm:$0xff]  }
   0xe   :  { %v3986_v41 = vld [vmem:[%s6402_s2 + $0x118] sm:$0xff]   ;;  %v3973_v46 = vld [vmem:[%s6402_s2 + $0xe0] sm:$0xff]   ;;  %v3993_v49 = vld [vmem:[%s6402_s2 + $0x168] sm:$0xff]   ;;  %v3422_v50 = vcombine.high %v52_v42, %v55_v43  ;;  %v3421_v60 = vcombine.low %v52_v42, %v55_v43 }
   0xf   :  { %3620 = vmatpush3.bf16.msra.mxu1 %v3946_v7  ;;  %3744 = vmatpush3.bf16.msra.mxu0 %v3978_v30  ;;  %v3970_v45 = vld [vmem:[%s6402_s2 + $0x98] sm:$0xff]   ;;  %v3992_v47 = vld [vmem:[%s6402_s2 + $0x120] sm:$0xff]   ;;  %v3981_v52 = vld [vmem:[%s6402_s2 + $0xe8] sm:$0xff]  }
  0x10   :  { %3621 = vmatprep.subr.bf16.mxu1 %v3947_v8  ;;  %3745 = vmatprep.subr.bf16.mxu0 %v3982_v33  ;;  %v3975_v51 = vld [vmem:[%s6402_s2 + $0xa0] sm:$0xff]   ;;  %v3994_v53 = vld [vmem:[%s6402_s2 + $0x128] sm:$0xff]   ;;  %v61_v55 = vld [vmem:[%s6400_s0 + $0xd8] sm:$0xff] }
  0x11   :  { %v58_v54 = vld [vmem:[%s6400_s0 + $0xc0] sm:$0xff]  ;;  %v3998_v56 = vld [vmem:[%s6402_s2 + $0x170] sm:$0xff]   ;;  %v3983_v57 = vld [vmem:[%s6402_s2 + $0xa8] sm:$0xff]  }
  0x12   :  { %v3989_v58 = vld [vmem:[%s6402_s2 + $0xf0] sm:$0xff]   ;;  %v4001_v61 = vld [vmem:[%s6402_s2 + $0x178] sm:$0xff]   ;;  %v39_v63 = vld [vmem:[%s6400_s0 + $0x28] sm:$0xff]  ;;  %v3428_v0 = vcombine.high %v58_v54, %v61_v55  ;;  %v3427_v12 = vcombine.low %v58_v54, %v61_v55 }
  0x13   :  { %3622 = vmatpush3.bf16.msra.mxu1 %v3948_v9  ;;  %3746 = vmatpush3.bf16.msra.mxu0 %v3984_v35  ;;  %v4000_v59 = vld [vmem:[%s6402_s2 + $0x130] sm:$0xff]   ;;  %v3997_v3 = vld [vmem:[%s6402_s2 + $0xf8] sm:$0xff]   ;;  %v42_v5 = vld [vmem:[%s6400_s0 + $0x40] sm:$0xff] }
  0x14   :  { %3623 = vmatprep.subr.bf16.mxu1 %v3949_v10  ;;  %3747 = vmatprep.subr.bf16.mxu0 %v3985_v37  ;;  %v36_v62 = vld [vmem:[%s6400_s0 + $0x10] sm:$0xff]  ;;  %v4002_v4 = vld [vmem:[%s6402_s2 + $0x138] sm:$0xff]   ;;  %v67_v9 = vld [vmem:[%s6400_s0 + $0x108] sm:$0xff] }
  0x15   :  { %v3991_v1 = vld [vmem:[%s6402_s2 + $0xb0] sm:$0xff]   ;;  %v3408_v2 = vcombine.high %v36_v62, %v39_v63  ;;  %v45_v6 = vld [vmem:[%s6400_s0 + $0x58] sm:$0xff]  ;;  %v3407_v10 = vcombine.low %v36_v62, %v39_v63  ;;  %v63_v31 = vld [vmem:[%s6400_s0 + $0xe8] sm:$0xff] }
  0x16   :  { %v3999_v7 = vld [vmem:[%s6402_s2 + $0xb8] sm:$0xff]   ;;  %v64_v8 = vld [vmem:[%s6400_s0 + $0xf0] sm:$0xff]  ;;  %v3414_v11 = vcombine.high %v42_v5, %v45_v6  ;;  %v35_v32 = vld [vmem:[%s6400_s0 + $0x8] sm:$0xff] }
  0x17   :  { %3624 = vmatpush3.bf16.msra.mxu1 %v3950_v14  ;;  %3748 = vmatpush3.bf16.msra.mxu0 %v3986_v41  ;;  %v3434_v13 = vcombine.high %v64_v8, %v67_v9  ;;  %v48_v14 = vld [vmem:[%s6400_s0 + $0x70] sm:$0xff]  ;;  %v3433_v20 = vcombine.low %v64_v8, %v67_v9  ;;  %v57_v23 = vld [vmem:[%s6400_s0 + $0xb8] sm:$0xff]  ;;  %v38_v33 = vld [vmem:[%s6400_s0 + $0x20] sm:$0xff] }
  0x18   :  { %3625 = vmatprep.subr.bf16.mxu1 %v3951_v15  ;;  %3749 = vmatprep.subr.bf16.mxu0 %v3990_v44  ;;  %v51_v15 = vld [vmem:[%s6400_s0 + $0x88] sm:$0xff]  ;;  %v60_v30 = vld [vmem:[%s6400_s0 + $0xd0] sm:$0xff]  ;;  %v3406_v37 = vcombine.high %v35_v32, %v38_v33  ;;  %v3405_v44 = vcombine.low %v35_v32, %v38_v33 }
  0x19   :  { %939 = vmatprep.mubr.bf16.mxu0 %v3408_v2  ;;  %v3432_v35 = vcombine.high %v60_v30, %v63_v31  ;;  %v44_v41 = vld [vmem:[%s6400_s0 + $0x50] sm:$0xff]  ;;  %v3431_v42 = vcombine.low %v60_v30, %v63_v31 }
  0x1b   :  { %3626 = vmatpush3.bf16.msra.mxu1 %v3952_v16  ;;  %3750 = vmatpush3.bf16.msra.mxu0 %v3992_v47  ;;  %v70_v16 = vld [vmem:[%s6400_s0 + $0x120] sm:$0xff] }
  0x1c   :  { %3627 = vmatprep.subr.bf16.mxu1 %v3953_v17  ;;  %3751 = vmatprep.subr.bf16.mxu0 %v3993_v49  ;;  %v73_v17 = vld [vmem:[%s6400_s0 + $0x138] sm:$0xff] }
  0x1d   :  { %v3440_v21 = vcombine.high %v70_v16, %v73_v17  ;;  %v3439_v28 = vcombine.low %v70_v16, %v73_v17 }
  0x1f   :  { %3628 = vmatpush3.bf16.msra.mxu1 %v3954_v18  ;;  %3752 = vmatpush3.bf16.msra.mxu0 %v3994_v53  ;;  %v3413_v18 = vcombine.low %v42_v5, %v45_v6 }
  0x20   :  { %3677 = vmatprep.subr.bf16.mxu1 %v3957_v19  ;;  %3753 = vmatprep.subr.bf16.mxu0 %v3998_v56  ;;  %v3420_v19 = vcombine.high %v48_v14, %v51_v15 }
  0x22   :  { %746 = vmatmul.mubr.bf16.vlgmr.msra.gmra.mrb[0].mxu1 %v3403_v24  ;;  %v76_v24 = vld [vmem:[%s6400_s0 + $0x150] sm:$0xff] }
  0x23   :  { %3678 = vmatpush3.bf16.msra.mxu1 %v3958_v22  ;;  %753 = vmatprep.mubr.bf16.mxu1 %v3410_v26  ;;  %v54_v22 = vld [vmem:[%s6400_s0 + $0xa0] sm:$0xff]  ;;  %v3419_v26 = vcombine.low %v48_v14, %v51_v15 }
  0x24   :  { %3679 = vmatprep.subr.bf16.mxu1 %v3961_v25  ;;  %3754 = vmatpush3.bf16.msra.mxu0 %v4000_v59  ;;  %v79_v25 = vld [vmem:[%s6400_s0 + $0x168] sm:$0xff]  ;;  %v3426_v27 = vcombine.high %v54_v22, %v57_v23 }
  0x25   :  { %3755 = vmatprep.subr.bf16.mxu0 %v4001_v61 }
  0x27   :  { %3680 = vmatpush3.bf16.msra.mxu1 %v3962_v29  ;;  %v3446_v29 = vcombine.high %v76_v24, %v79_v25 }
  0x28   :  { %3681 = vmatprep.subr.bf16.mxu1 %v3965_v34  ;;  %3756 = vmatpush3.bf16.msra.mxu0 %v4002_v4  ;;  %v3425_v34 = vcombine.low %v54_v22, %v57_v23 }
  0x2a   :  { %754 = vmatmul.mubr.bf16.gmra.mrb[4].mxu1 %v3409_v36  ;;  %v3445_v36 = vcombine.low %v76_v24, %v79_v25 }
  0x2b   :  { %761 = vmatprep.mubr.bf16.mxu1 %v3416_v38  ;;  %3682 = vmatpush3.bf16.msra.mxu1 %v3966_v39  ;;  %v66_v38 = vld [vmem:[%s6400_s0 + $0x100] sm:$0xff]  ;;  %v69_v39 = vld [vmem:[%s6400_s0 + $0x118] sm:$0xff] }
  0x2c   :  { %3683 = vmatprep.subr.bf16.mxu1 %v3969_v40  ;;  %940 = vmatmul.mubr.bf16.vlgmr.msra.gmra.mrb[0].mxu0 %v3407_v10  ;;  %v41_v40 = vld [vmem:[%s6400_s0 + $0x38] sm:$0xff]  ;;  %v3438_v43 = vcombine.high %v66_v38, %v69_v39 }
  0x2d   :  { %947 = vmatprep.mubr.bf16.mxu0 %v3414_v11 }
  0x2f   :  { %3684 = vmatpush3.bf16.msra.mxu1 %v3970_v45  ;;  %v3412_v45 = vcombine.high %v41_v40, %v44_v41 }
  0x30   :  { %3685 = vmatprep.subr.bf16.mxu1 %v3973_v46 }
  0x32   :  { %762 = vmatmul.mubr.bf16.gmra.mrb[8].mxu1 %v3415_v48 }
  0x33   :  { %769 = vmatprep.mubr.bf16.mxu1 %v3422_v50  ;;  %3686 = vmatpush3.bf16.msra.mxu1 %v3975_v51 }
  0x34   :  { %3687 = vmatprep.subr.bf16.mxu1 %v3981_v52  ;;  %948 = vmatmul.mubr.bf16.gmra.mrb[4].mxu0 %v3413_v18 }
  0x35   :  { %955 = vmatprep.mubr.bf16.mxu0 %v3420_v19 }
  0x37   :  { %3688 = vmatpush3.bf16.msra.mxu1 %v3983_v57 }
  0x38   :  { %3689 = vmatprep.subr.bf16.mxu1 %v3989_v58 }
  0x3a   :  { %770 = vmatmul.mubr.bf16.gmra.mrb[12].mxu1 %v3421_v60 }
  0x3b   :  { %777 = vmatprep.mubr.bf16.mxu1 %v3428_v0  ;;  %3690 = vmatpush3.bf16.msra.mxu1 %v3991_v1 }
  0x3c   :  { %3691 = vmatprep.subr.bf16.mxu1 %v3997_v3  ;;  %956 = vmatmul.mubr.bf16.gmra.mrb[8].mxu0 %v3419_v26 }
  0x3d   :  { %963 = vmatprep.mubr.bf16.mxu0 %v3426_v27 }
  0x3f   :  { %3692 = vmatpush3.bf16.msra.mxu1 %v3999_v7 }
  0x42   :  { %778 = vmatmul.mubr.bf16.gmra.mrb[16].mxu1 %v3427_v12 }
  0x43   :  { %785 = vmatprep.mubr.bf16.mxu1 %v3434_v13 }
  0x44   :  { %964 = vmatmul.mubr.bf16.gmra.mrb[12].mxu0 %v3425_v34 }
  0x45   :  { %971 = vmatprep.mubr.bf16.mxu0 %v3432_v35 }
  0x4a   :  { %786 = vmatmul.mubr.bf16.gmra.mrb[20].mxu1 %v3433_v20 }
  0x4b   :  { %793 = vmatprep.mubr.bf16.mxu1 %v3440_v21 }
  0x4c   :  { %972 = vmatmul.mubr.bf16.gmra.mrb[16].mxu0 %v3431_v42 }
  0x52   :  { %794 = vmatmul.mubr.bf16.gmra.mrb[24].mxu1 %v3439_v28 }
  0x53   :  { %801 = vmatprep.mubr.bf16.mxu1 %v3446_v29 }
  0x5a   :  { %802 = vmatmul.mubr.bf16.gmra.mrb[28].mxu1 %v3445_v36 }
  0x5b   :  { %842 = vmatprep.mubr.bf16.mxu1 %v3406_v37 }
  0x5c   :  { %14 = vsyncpa [#allocation3], 0  ;;  %979 = vmatprep.mubr.bf16.mxu0 %v3438_v43  ;;  %v72_v46 = vld [vmem:[%s6400_s0 + $0x130] sm:$0xff]  ;;  %v75_v47 = vld [vmem:[%s6400_s0 + $0x148] sm:$0xff]  ;;  %v3437_v50 = vcombine.low %v66_v38, %v69_v39  ;;  %v3411_v52 = vcombine.low %v41_v40, %v44_v41  ;;  %vm1596_vm0 = vcmask 7168   ;;  %vm2721_vm1 = vcmask 1041409  }
  0x5d   :  { %v47_v48 = vld [vmem:[%s6400_s0 + $0x68] sm:$0xff]  ;;  %v50_v49 = vld [vmem:[%s6400_s0 + $0x80] sm:$0xff]  ;;  %v3444_v51 = vcombine.high %v72_v46, %v75_v47  ;;  %v81_v55 = vld [vmem:[%s6400_s0 + $0x178] sm:$0xff]  ;;  %v3443_v58 = vcombine.low %v72_v46, %v75_v47  ;;  %vm2723_vm2 = vcmask 1042434   ;;  %vm2725_vm3 = vcmask 1043459   ;;  %s4364_s16 = smov [#allocation2]  }
  0x5e   :  { %v3418_v53 = vcombine.high %v47_v48, %v50_v49  ;;  %980 = vmatmul.mubr.bf16.gmra.mrb[20].mxu0 %v3437_v50  ;;  %v78_v54 = vld [vmem:[%s6400_s0 + $0x160] sm:$0xff]  ;;  %v53_v56 = vld [vmem:[%s6400_s0 + $0x98] sm:$0xff]  ;;  %v56_v57 = vld [vmem:[%s6400_s0 + $0xb0] sm:$0xff]  ;;  %v3417_v60 = vcombine.low %v47_v48, %v50_v49  ;;  %vm2727_vm4 = vcmask 1044484   ;;  %vm2729_vm5 = vcmask 1045509   ;;  %s3394_s17 = sshll.u32 %s4364_s16, 4  ;;  %s3395_s17 = int_to_ptr.vmem [resolvable:$true] %s3394_s17 }
  0x5f   :  { %987 = vmatprep.mubr.bf16.mxu0 %v3444_v51  ;;  %v3450_v59 = vcombine.high %v78_v54, %v81_v55  ;;  %v3424_v61 = vcombine.high %v53_v56, %v56_v57  ;;  %v59_v62 = vld [vmem:[%s6400_s0 + $0xc8] sm:$0xff]  ;;  %v62_v63 = vld [vmem:[%s6400_s0 + $0xe0] sm:$0xff]  ;;  %v3449_v0 = vcombine.low %v78_v54, %v81_v55  ;;  %v3423_v1 = vcombine.low %v53_v56, %v56_v57  ;;  %v65_v3 = vld [vmem:[%s6400_s0 + $0xf8] sm:$0xff]  ;;  %p4344_p1 = scmp.lt.s32.totalorder %s3395_s17, %s3395_s17 }
  0x60   :  { %v3430_v2 = vcombine.high %v59_v62, %v62_v63  ;;  %v68_v4 = vld [vmem:[%s6400_s0 + $0x110] sm:$0xff]  ;;  %v3429_v5 = vcombine.low %v59_v62, %v62_v63  ;;  %v71_v7 = vld [vmem:[%s6400_s0 + $0x128] sm:$0xff]  ;;  %v74_v8 = vld [vmem:[%s6400_s0 + $0x140] sm:$0xff]  ;;  %vm2731_vm6 = vcmask 1046534   ;;  %vm2733_vm7 = vcmask 1047559  }
  0x61   :  { %v3436_v6 = vcombine.high %v65_v3, %v68_v4  ;;  %v3435_v9 = vcombine.low %v65_v3, %v68_v4  ;;  %v3442_v10 = vcombine.high %v71_v7, %v74_v8  ;;  %v77_v11 = vld [vmem:[%s6400_s0 + $0x158] sm:$0xff]  ;;  %v80_v12 = vld [vmem:[%s6400_s0 + $0x170] sm:$0xff]  ;;  %v3441_v13 = vcombine.low %v71_v7, %v74_v8 }
  0x62   :  { %843 = vmatmul.mubr.bf16.vlgmr.msra.gmra.mrb[32].mxu1 %v3405_v44  ;;  %v3448_v14 = vcombine.high %v77_v11, %v80_v12  ;;  %v3447_v15 = vcombine.low %v77_v11, %v80_v12  ;;  %vm3386_vm8 = vcmask 392192  }
  0x63   :  { %850 = vmatprep.mubr.bf16.mxu1 %v3412_v45 }
  0x66   :  { %988 = vmatmul.mubr.bf16.gmra.mrb[24].mxu0 %v3443_v58 }
  0x67   :  { %995 = vmatprep.mubr.bf16.mxu0 %v3450_v59 }
  0x6a   :  { %851 = vmatmul.mubr.bf16.gmra.mrb[36].mxu1 %v3411_v52 }
  0x6b   :  { %858 = vmatprep.mubr.bf16.mxu1 %v3418_v53 }
  0x6e   :  { %996 = vmatmul.mubr.bf16.gmra.mrb[28].mxu0 %v3449_v0 }
  0x72   :  { %859 = vmatmul.mubr.bf16.gmra.mrb[40].mxu1 %v3417_v60 }
  0x73   :  { %866 = vmatprep.mubr.bf16.mxu1 %v3424_v61 }
  0x7a   :  { %867 = vmatmul.mubr.bf16.gmra.mrb[44].mxu1 %v3423_v1 }
  0x7b   :  { %874 = vmatprep.mubr.bf16.mxu1 %v3430_v2 }
  0x82   :  { %875 = vmatmul.mubr.bf16.gmra.mrb[48].mxu1 %v3429_v5 }
  0x83   :  { %882 = vmatprep.mubr.bf16.mxu1 %v3436_v6 }
  0x8a   :  { %883 = vmatmul.mubr.bf16.gmra.mrb[52].mxu1 %v3435_v9 }
  0x8b   :  { %890 = vmatprep.mubr.bf16.mxu1 %v3442_v10 }
  0x92   :  { %891 = vmatmul.mubr.bf16.gmra.mrb[56].mxu1 %v3441_v13 }
  0x93   :  { %898 = vmatprep.mubr.bf16.mxu1 %v3448_v14 }
  0x9a   :  { %899 = vmatmul.mubr.bf16.gmra.mrb[60].mxu1 %v3447_v15 }
  0xf5   :  { %v3629_v16 = vpop.f32.mrb[0].mxu1 }
  0xf6   :  { %v3630_v17 = vpop.f32.mrb[1].mxu1 }
  0xf7   :  { %v4703_v18 = vadd.f32 %v3630_v17, %v3629_v16  ;;  %v3632_v19 = vpop.f32.mrb[2].mxu1 }
  0xf8   :  { %v3633_v20 = vpop.f32.mrb[3].mxu1 }
  0xf9   :  { %v4705_v21 = vadd.f32 %v3633_v20, %v3632_v19 }
  0xfd   :  { %v3635_v22 = vpop.f32.mrb[4].mxu1 }
  0xfe   :  { %v3636_v23 = vpop.f32.mrb[5].mxu1 }
  0xff   :  { %v4707_v24 = vadd.f32 %v3636_v23, %v3635_v22  ;;  %v3638_v25 = vpop.f32.mrb[6].mxu1  ;;  %v3757_v40 = vpop.f32.mrb[0].mxu0 }
 0x100   :  { %v3639_v26 = vpop.f32.mrb[7].mxu1  ;;  %v3758_v41 = vpop.f32.mrb[1].mxu0 }
 0x101   :  { %v4709_v27 = vadd.f32 %v3639_v26, %v3638_v25  ;;  %v3759_v43 = vadd.f32 %v3758_v41, %v3757_v40  ;;  %v3760_v44 = vpop.f32.mrb[2].mxu0 }
 0x102   :  { %v3761_v46 = vpop.f32.mrb[3].mxu0 }
 0x103   :  { %v3762_v49 = vadd.f32 %v3761_v46, %v3760_v44 }
 0x105   :  { %v3641_v28 = vpop.f32.mrb[8].mxu1 }
 0x106   :  { %v3642_v29 = vpop.f32.mrb[9].mxu1 }
 0x107   :  { %v4711_v30 = vadd.f32 %v3642_v29, %v3641_v28  ;;  %v3644_v31 = vpop.f32.mrb[10].mxu1  ;;  %v3763_v52 = vpop.f32.mrb[4].mxu0  ;;  %v4750_v29 = vld [vmem:[%s6403_s3] ss:$0 sm:$0xff] }
 0x108   :  { %v3645_v32 = vpop.f32.mrb[11].mxu1  ;;  %v3764_v53 = vpop.f32.mrb[5].mxu0  ;;  %v748_v40 = vadd.f32 %v4703_v18, %v4750_v29  ;;  %v751_v46 = vadd.f32 %v4705_v21, %v4750_v29  ;;  %v756_v21 = vadd.f32 %v4707_v24, %v4750_v29 }
 0x109   :  { %v4713_v33 = vadd.f32 %v3645_v32, %v3644_v31  ;;  %v4723_v55 = vadd.f32 %v3764_v53, %v3763_v52  ;;  %v3766_v56 = vpop.f32.mrb[6].mxu0 }
 0x10a   :  { %v3767_v58 = vpop.f32.mrb[7].mxu0 }
 0x10b   :  { %v4727_v61 = vadd.f32 %v3767_v58, %v3766_v56 }
 0x10d   :  { %v3647_v34 = vpop.f32.mrb[12].mxu1 }
 0x10e   :  { %v3648_v35 = vpop.f32.mrb[13].mxu1 }
 0x10f   :  { %v4715_v36 = vadd.f32 %v3648_v35, %v3647_v34  ;;  %v3650_v37 = vpop.f32.mrb[14].mxu1  ;;  %v3769_v0 = vpop.f32.mrb[8].mxu0 }
 0x110   :  { %v3651_v38 = vpop.f32.mrb[15].mxu1  ;;  %v3770_v1 = vpop.f32.mrb[9].mxu0 }
 0x111   :  { %v4717_v39 = vadd.f32 %v3651_v38, %v3650_v37  ;;  %v4731_v3 = vadd.f32 %v3770_v1, %v3769_v0  ;;  %v3772_v4 = vpop.f32.mrb[10].mxu0 }
 0x112   :  { %v3773_v6 = vpop.f32.mrb[11].mxu0 }
 0x113   :  { %v4735_v9 = vadd.f32 %v3773_v6, %v3772_v4 }
 0x115   :  { %v3653_v42 = vpop.f32.mrb[16].mxu1 }
 0x116   :  { %v3654_v45 = vpop.f32.mrb[17].mxu1 }
 0x117   :  { %v4719_v47 = vadd.f32 %v3654_v45, %v3653_v42  ;;  %v3656_v48 = vpop.f32.mrb[18].mxu1  ;;  %v3775_v12 = vpop.f32.mrb[12].mxu0 }
 0x118   :  { %v3657_v50 = vpop.f32.mrb[19].mxu1  ;;  %v3776_v13 = vpop.f32.mrb[13].mxu0 }
 0x119   :  { %v4721_v51 = vadd.f32 %v3657_v50, %v3656_v48  ;;  %v4739_v15 = vadd.f32 %v3776_v13, %v3775_v12  ;;  %v3778_v16 = vpop.f32.mrb[14].mxu0 }
 0x11a   :  { %v3779_v19 = vpop.f32.mrb[15].mxu0 }
 0x11b   :  { %v4743_v23 = vadd.f32 %v3779_v19, %v3778_v16 }
 0x11d   :  { %v3659_v54 = vpop.f32.mrb[20].mxu1 }
 0x11e   :  { %v3660_v57 = vpop.f32.mrb[21].mxu1 }
 0x11f   :  { %v4725_v59 = vadd.f32 %v3660_v57, %v3659_v54  ;;  %v3662_v60 = vpop.f32.mrb[22].mxu1  ;;  %v3781_v28 = vpop.f32.mrb[16].mxu0 }
 0x120   :  { %v3663_v62 = vpop.f32.mrb[23].mxu1  ;;  %v3782_v31 = vpop.f32.mrb[17].mxu0 }
 0x121   :  { %v4729_v63 = vadd.f32 %v3663_v62, %v3662_v60  ;;  %v4752_v34 = vadd.f32 %v3782_v31, %v3781_v28  ;;  %v3784_v35 = vpop.f32.mrb[18].mxu0 }
 0x122   :  { %v3785_v38 = vpop.f32.mrb[19].mxu0 }
 0x123   :  { %v4756_v44 = vadd.f32 %v3785_v38, %v3784_v35 }
 0x125   :  { %v3665_v2 = vpop.f32.mrb[24].mxu1 }
 0x126   :  { %v3666_v5 = vpop.f32.mrb[25].mxu1 }
 0x127   :  { %v4733_v7 = vadd.f32 %v3666_v5, %v3665_v2  ;;  %v3668_v8 = vpop.f32.mrb[26].mxu1  ;;  %v759_v5 = vadd.f32 %v4709_v27, %v4750_v29 }
 0x128   :  { %v3669_v10 = vpop.f32.mrb[27].mxu1 }
 0x129   :  { %v4737_v11 = vadd.f32 %v3669_v10, %v3668_v8 }
 0x12d   :  { %v3671_v14 = vpop.f32.mrb[28].mxu1 }
 0x12e   :  { %v3672_v17 = vpop.f32.mrb[29].mxu1 }
 0x12f   :  { %v4741_v20 = vadd.f32 %v3672_v17, %v3671_v14  ;;  %v3674_v22 = vpop.f32.mrb[30].mxu1 }
 0x130   :  { %v3675_v25 = vpop.f32.mrb[31].mxu1 }
 0x131   :  { %v4745_v26 = vadd.f32 %v3675_v25, %v3674_v22  ;;  %v3787_v54 = vpop.f32.mrb[20].mxu0  ;;  %v764_v22 = vadd.f32 %v4711_v30, %v4750_v29 }
 0x132   :  { %v3788_v56 = vpop.f32.mrb[21].mxu0 }
 0x133   :  { %v4765_v18 = vadd.f32 %v3788_v56, %v3787_v54  ;;  %v3790_v60 = vpop.f32.mrb[22].mxu0 }
 0x134   :  { %v3791_v0 = vpop.f32.mrb[23].mxu0 }
 0x135   :  { %v3693_v32 = vpop.f32.mrb[32].mxu1  ;;  %v4769_v4 = vadd.f32 %v3791_v0, %v3790_v60 }
 0x136   :  { %v3694_v37 = vpop.f32.mrb[33].mxu1 }
 0x137   :  { %v3695_v41 = vadd.f32 %v3694_v37, %v3693_v32  ;;  %v3696_v42 = vpop.f32.mrb[34].mxu1  ;;  %v767_v32 = vadd.f32 %v4713_v33, %v4750_v29 }
 0x138   :  { %v3697_v45 = vpop.f32.mrb[35].mxu1 }
 0x139   :  { %v845_v48 = vadd.f32 %v3695_v41, %v748_v40  ;;  %v3698_v50 = vadd.f32 %v3697_v45, %v3696_v42  ;;  %v3793_v12 = vpop.f32.mrb[24].mxu0 }
 0x13a   :  { %v3794_v13 = vpop.f32.mrb[25].mxu0 }
 0x13b   :  { %v848_v52 = vadd.f32 %v3698_v50, %v751_v46  ;;  %v4760_v53 = vadd.f32 %v3759_v43, %v845_v48  ;;  %v4781_v16 = vadd.f32 %v3794_v13, %v3793_v12  ;;  %v3796_v17 = vpop.f32.mrb[26].mxu0  ;;  %v772_v50 = vadd.f32 %v4715_v36, %v4750_v29 }
 0x13c   :  { %v3797_v19 = vpop.f32.mrb[27].mxu0 }
 0x13d   :  { %v3699_v57 = vpop.f32.mrb[36].mxu1  ;;  %1004 = vadd.xlane.f32.xlu0 %v4760_v53  ;;  %v4763_v58 = vadd.f32 %v3762_v49, %v848_v52 }
 0x13e   :  { %v3700_v62 = vpop.f32.mrb[37].mxu1 }
 0x13f   :  { %v3701_v1 = vadd.f32 %v3700_v62, %v3699_v57  ;;  %v3702_v2 = vpop.f32.mrb[38].mxu1  ;;  %v775_v57 = vadd.f32 %v4717_v39, %v4750_v29 }
 0x140   :  { %v3703_v43 = vpop.f32.mrb[39].mxu1 }
 0x141   :  { %v853_v6 = vadd.f32 %v3701_v1, %v756_v21  ;;  %v3704_v8 = vadd.f32 %v3703_v43, %v3702_v2  ;;  %1006 = vadd.xlane.f32.xlu0 %v4763_v58  ;;  %v3799_v40 = vpop.f32.mrb[28].mxu0  ;;  %v780_v2 = vadd.f32 %v4719_v47, %v4750_v29 }
 0x142   :  { %v3800_v41 = vpop.f32.mrb[29].mxu0 }
 0x143   :  { %v856_v49 = vadd.f32 %v3704_v8, %v759_v5  ;;  %v4775_v10 = vadd.f32 %v4723_v55, %v853_v6  ;;  %v4785_v55 = vadd.f32 %v3797_v19, %v3796_v17  ;;  %v4797_v45 = vadd.f32 %v3800_v41, %v3799_v40  ;;  %v3802_v46 = vpop.f32.mrb[30].mxu0 }
 0x144   :  { %v3803_v48 = vpop.f32.mrb[31].mxu0  ;;  %v783_v6 = vadd.f32 %v4721_v51, %v4750_v29  ;;  %v791_v19 = vadd.f32 %v4729_v63, %v4750_v29 }
 0x145   :  { %v3705_v14 = vpop.f32.mrb[40].mxu1  ;;  %1008 = vadd.xlane.f32.xlu1 %v4775_v10  ;;  %v4779_v24 = vadd.f32 %v4727_v61, %v856_v49 }
 0x146   :  { %v3706_v27 = vpop.f32.mrb[41].mxu1 }
 0x147   :  { %v3707_v25 = vadd.f32 %v3706_v27, %v3705_v14  ;;  %v3708_v28 = vpop.f32.mrb[42].mxu1  ;;  %v788_v14 = vadd.f32 %v4725_v59, %v4750_v29 }
 0x148   :  { %v3709_v31 = vpop.f32.mrb[43].mxu1 }
 0x149   :  { %v861_v35 = vadd.f32 %v3707_v25, %v764_v22  ;;  %v3710_v37 = vadd.f32 %v3709_v31, %v3708_v28  ;;  %1010 = vadd.xlane.f32.xlu1 %v4779_v24 }
 0x14b   :  { %v864_v61 = vadd.f32 %v3710_v37, %v767_v32  ;;  %v4791_v38 = vadd.f32 %v4731_v3, %v861_v35  ;;  %v4802_v3 = vadd.f32 %v3803_v48, %v3802_v46  ;;  %v796_v32 = vadd.f32 %v4733_v7, %v4750_v29 }
 0x14d   :  { %v3711_v42 = vpop.f32.mrb[44].mxu1  ;;  %1012 = vadd.xlane.f32.xlu0 %v4791_v38  ;;  %v4795_v30 = vadd.f32 %v4735_v9, %v864_v61  ;;  %v799_v61 = vadd.f32 %v4737_v11, %v4750_v29 }
 0x14e   :  { %v3712_v33 = vpop.f32.mrb[45].mxu1 }
 0x14f   :  { %v3713_v52 = vadd.f32 %v3712_v33, %v3711_v42  ;;  %v3714_v54 = vpop.f32.mrb[46].mxu1  ;;  %1014 = vadd.xlane.f32.xlu1 %v4795_v30  ;;  %v804_v33 = vadd.f32 %v4741_v20, %v4750_v29 }
 0x150   :  { %v3715_v56 = vpop.f32.mrb[47].mxu1 }
 0x151   :  { %v869_v9 = vadd.f32 %v3713_v52, %v772_v50  ;;  %v3716_v60 = vadd.f32 %v3715_v56, %v3714_v54  ;;  %v807_v52 = vadd.f32 %v4745_v26, %v4750_v29 }
 0x153   :  { %v872_v62 = vadd.f32 %v3716_v60, %v775_v57  ;;  %v4807_v0 = vadd.f32 %v4739_v15, %v869_v9 }
 0x155   :  { %v3717_v21 = vpop.f32.mrb[48].mxu1  ;;  %1016 = vadd.xlane.f32.xlu0 %v4807_v0  ;;  %v4811_v36 = vadd.f32 %v4743_v23, %v872_v62 }
 0x156   :  { %v3718_v1 = vpop.f32.mrb[49].mxu1 }
 0x157   :  { %v3719_v43 = vadd.f32 %v3718_v1, %v3717_v21  ;;  %v3720_v5 = vpop.f32.mrb[50].mxu1  ;;  %1018 = vadd.xlane.f32.xlu1 %v4811_v36 }
 0x158   :  { %v3721_v39 = vpop.f32.mrb[51].mxu1 }
 0x159   :  { %v877_v15 = vadd.f32 %v3719_v43, %v780_v2  ;;  %v3722_v8 = vadd.f32 %v3721_v39, %v3720_v5 }
 0x15b   :  { %v880_v49 = vadd.f32 %v3722_v8, %v783_v6  ;;  %v4819_v12 = vadd.f32 %v4752_v34, %v877_v15 }
 0x15d   :  { %v3723_v23 = vpop.f32.mrb[52].mxu1  ;;  %1020 = vadd.xlane.f32.xlu0 %v4819_v12  ;;  %v4823_v13 = vadd.f32 %v4756_v44, %v880_v49 }
 0x15e   :  { %v3724_v47 = vpop.f32.mrb[53].mxu1 }
 0x15f   :  { %v3725_v17 = vadd.f32 %v3724_v47, %v3723_v23  ;;  %v3726_v27 = vpop.f32.mrb[54].mxu1  ;;  %1022 = vadd.xlane.f32.xlu1 %v4823_v13 }
 0x160   :  { %v3727_v51 = vpop.f32.mrb[55].mxu1 }
 0x161   :  { %v885_v34 = vadd.f32 %v3725_v17, %v788_v14  ;;  %v3728_v22 = vadd.f32 %v3727_v51, %v3726_v27 }
 0x163   :  { %v888_v25 = vadd.f32 %v3728_v22, %v791_v19  ;;  %v4831_v28 = vadd.f32 %v4765_v18, %v885_v34 }
 0x165   :  { %v3729_v44 = vpop.f32.mrb[56].mxu1  ;;  %1024 = vadd.xlane.f32.xlu0 %v4831_v28  ;;  %v4835_v31 = vadd.f32 %v4769_v4, %v888_v25 }
 0x166   :  { %v3730_v59 = vpop.f32.mrb[57].mxu1 }
 0x167   :  { %v3731_v35 = vadd.f32 %v3730_v59, %v3729_v44  ;;  %v3732_v37 = vpop.f32.mrb[58].mxu1  ;;  %1026 = vadd.xlane.f32.xlu1 %v4835_v31 }
 0x168   :  { %v3733_v63 = vpop.f32.mrb[59].mxu1 }
 0x169   :  { %v893_v18 = vadd.f32 %v3731_v35, %v796_v32  ;;  %v3734_v40 = vadd.f32 %v3733_v63, %v3732_v37  ;;  %v1372_v32 = vld [vmem:[%s6406_s6 + $0x8] sm:$0xff] }
 0x16b   :  { %v896_v41 = vadd.f32 %v3734_v40, %v799_v61  ;;  %v4843_v42 = vadd.f32 %v4781_v16, %v893_v18  ;;  %v1373_v18 = vld [vmem:[%s6406_s6 + $0x10] sm:$0xff] }
 0x16d   :  { %v3735_v4 = vpop.f32.mrb[60].mxu1  ;;  %1028 = vadd.xlane.f32.xlu0 %v4843_v42  ;;  %v4847_v46 = vadd.f32 %v4785_v55, %v896_v41 }
 0x16e   :  { %v3736_v7 = vpop.f32.mrb[61].mxu1 }
 0x16f   :  { %v3737_v48 = vadd.f32 %v3736_v7, %v3735_v4  ;;  %v3738_v50 = vpop.f32.mrb[62].mxu1  ;;  %1030 = vadd.xlane.f32.xlu1 %v4847_v46 }
 0x170   :  { %v3739_v11 = vpop.f32.mrb[63].mxu1 }
 0x171   :  { %v901_v16 = vadd.f32 %v3737_v48, %v804_v33  ;;  %v3740_v54 = vadd.f32 %v3739_v11, %v3738_v50  ;;  %v1375_v48 = vld [vmem:[%s6406_s6 + $0x20] sm:$0xff]  ;;  %v1376_v50 = vld [vmem:[%s6406_s6 + $0x28] sm:$0xff] }
 0x173   :  { %v904_v56 = vadd.f32 %v3740_v54, %v807_v52  ;;  %v4855_v57 = vadd.f32 %v4797_v45, %v901_v16  ;;  %v3901_v16 = vpack.c.bf16 %v1376_v50, %v1375_v48  ;;  %v4999_v48 = vld [vmem:[%s6405_s5] ss:$0 sm:$0xff] }
 0x175   :  { %1032 = vadd.xlane.f32.xlu0 %v4855_v57  ;;  %v4859_v55 = vadd.f32 %v4802_v3, %v904_v56  ;;  %v1377_v56 = vld [vmem:[%s6406_s6 + $0x30] sm:$0xff] }
 0x177   :  { %1034 = vadd.xlane.f32.xlu1 %v4859_v55 }
 0x1ca   :  { %v1005_v20 = vpop.xlane.xlu0 %1004 }
 0x1cb   :  { %v1037_v9 = vmul.f32 0.0078125, %v1005_v20 }
 0x1cd   :  { %v4863_v60 = vsub.f32 %v4760_v53, %v1037_v9 }
 0x1ce   :  { %v1007_v62 = vpop.xlane.xlu0 %1006 }
 0x1cf   :  { %v1038_v26 = vmul.f32 0.0078125, %v1007_v62  ;;  %v1069_v29 = vmul.f32 %v4863_v60, %v4863_v60 }
 0x1d1   :  { %v4868_v45 = vsub.f32 %v4763_v58, %v1038_v26  ;;  %1085 = vadd.xlane.f32.xlu0 %v1069_v29 }
 0x1d2   :  { %v1009_v21 = vpop.xlane.xlu1 %1008 }
 0x1d3   :  { %v1039_v1 = vmul.f32 0.0078125, %v1009_v21  ;;  %v1070_v3 = vmul.f32 %v4868_v45, %v4868_v45  ;;  %v1379_v21 = vld [vmem:[%s6406_s6 + $0x40] sm:$0xff] }
 0x1d5   :  { %v4873_v2 = vsub.f32 %v4775_v10, %v1039_v1  ;;  %1087 = vadd.xlane.f32.xlu1 %v1070_v3  ;;  %v1380_v1 = vld [vmem:[%s6406_s6 + $0x48] sm:$0xff] }
 0x1d6   :  { %v1011_v53 = vpop.xlane.xlu1 %1010 }
 0x1d7   :  { %v1040_v43 = vmul.f32 0.0078125, %v1011_v53  ;;  %v1071_v5 = vmul.f32 %v4873_v2, %v4873_v2 }
 0x1d9   :  { %v4878_v39 = vsub.f32 %v4779_v24, %v1040_v43  ;;  %1089 = vadd.xlane.f32.xlu0 %v1071_v5  ;;  %v3909_v43 = vpack.c.bf16 %v1380_v1, %v1379_v21 }
 0x1da   :  { %v1013_v58 = vpop.xlane.xlu0 %1012 }
 0x1db   :  { %v1041_v6 = vmul.f32 0.0078125, %v1013_v58  ;;  %v1072_v15 = vmul.f32 %v4878_v39, %v4878_v39  ;;  %v1381_v58 = vld [vmem:[%s6406_s6 + $0x50] sm:$0xff] }
 0x1dc   :  { %v1015_v8 = vpop.xlane.xlu1 %1014 }
 0x1dd   :  { %v4883_v49 = vsub.f32 %v4791_v38, %v1041_v6  ;;  %v1042_v10 = vmul.f32 0.0078125, %v1015_v8  ;;  %1091 = vadd.xlane.f32.xlu1 %v1072_v15 }
 0x1df   :  { %v4886_v23 = vsub.f32 %v4795_v30, %v1042_v10  ;;  %v1073_v47 = vmul.f32 %v4883_v49, %v4883_v49 }
 0x1e1   :  { %1093 = vadd.xlane.f32.xlu0 %v1073_v47  ;;  %v1074_v24 = vmul.f32 %v4886_v23, %v4886_v23 }
 0x1e2   :  { %v1017_v14 = vpop.xlane.xlu0 %1016 }
 0x1e3   :  { %v1043_v17 = vmul.f32 0.0078125, %v1017_v14  ;;  %1095 = vadd.xlane.f32.xlu1 %v1074_v24  ;;  %v1383_v24 = vld [vmem:[%s6406_s6 + $0x60] sm:$0xff]  ;;  %v1384_v14 = vld [vmem:[%s6406_s6 + $0x68] sm:$0xff] }
 0x1e4   :  { %v1019_v27 = vpop.xlane.xlu1 %1018 }
 0x1e5   :  { %v4893_v51 = vsub.f32 %v4807_v0, %v1043_v17  ;;  %v1044_v38 = vmul.f32 0.0078125, %v1019_v27 }
 0x1e7   :  { %v4896_v19 = vsub.f32 %v4811_v36, %v1044_v38  ;;  %v1075_v30 = vmul.f32 %v4893_v51, %v4893_v51  ;;  %v1371_v36 = vld [vmem:[%s6406_s6] sm:$0xff]  ;;  %v3917_v38 = vpack.c.bf16 %v1384_v14, %v1383_v24 }
 0x1e8   :  { %v3893_v63 = vpack.c.bf16 %v1372_v32, %v1371_v36 }
 0x1e9   :  { %1097 = vadd.xlane.f32.xlu0 %v1075_v30  ;;  %v1076_v34 = vmul.f32 %v4896_v19, %v4896_v19  ;;  %v1385_v30 = vld [vmem:[%s6406_s6 + $0x70] sm:$0xff] }
 0x1ea   :  { %v1021_v22 = vpop.xlane.xlu0 %1020  ;;  %3894 = vmatprep.subr.bf16.mxu1 %v3893_v63 }
 0x1eb   :  { %v1045_v25 = vmul.f32 0.0078125, %v1021_v22  ;;  %1099 = vadd.xlane.f32.xlu1 %v1076_v34  ;;  %3896 = vmatpush3.bf16.msra.mxu1 %v3893_v63  ;;  %v1386_v34 = vld [vmem:[%s6406_s6 + $0x78] sm:$0xff] }
 0x1ec   :  { %v1023_v44 = vpop.xlane.xlu1 %1022 }
 0x1ed   :  { %v4903_v59 = vsub.f32 %v4819_v12, %v1045_v25  ;;  %v1046_v0 = vmul.f32 0.0078125, %v1023_v44 }
 0x1ef   :  { %v4912_v35 = vsub.f32 %v4823_v13, %v1046_v0  ;;  %v1077_v37 = vmul.f32 %v4903_v59, %v4903_v59  ;;  %v1374_v13 = vld [vmem:[%s6406_s6 + $0x18] sm:$0xff] }
 0x1f0   :  { %v3897_v41 = vpack.c.bf16 %v1374_v13, %v1373_v18 }
 0x1f1   :  { %1101 = vadd.xlane.f32.xlu0 %v1077_v37  ;;  %v1078_v12 = vmul.f32 %v4912_v35, %v4912_v35 }
 0x1f2   :  { %v1025_v61 = vpop.xlane.xlu0 %1024  ;;  %3898 = vmatprep.subr.bf16.mxu1 %v3897_v41 }
 0x1f3   :  { %v1047_v40 = vmul.f32 0.0078125, %v1025_v61  ;;  %1103 = vadd.xlane.f32.xlu1 %v1078_v12  ;;  %3900 = vmatpush3.bf16.msra.mxu1 %v3897_v41 }
 0x1f4   :  { %v1027_v4 = vpop.xlane.xlu1 %1026  ;;  %3902 = vmatprep.subr.bf16.mxu1 %v3901_v16 }
 0x1f5   :  { %v4925_v7 = vsub.f32 %v4831_v28, %v1047_v40  ;;  %v1048_v33 = vmul.f32 0.0078125, %v1027_v4  ;;  %v4993_v40 = vld [vmem:[%s6404_s4] ss:$0 sm:$0xff] }
 0x1f7   :  { %v4934_v11 = vsub.f32 %v4835_v31, %v1048_v33  ;;  %v1079_v52 = vmul.f32 %v4925_v7, %v4925_v7  ;;  %3904 = vmatpush3.bf16.msra.mxu1 %v3901_v16  ;;  %v1378_v31 = vld [vmem:[%s6406_s6 + $0x38] sm:$0xff] }
 0x1f8   :  { %v3905_v9 = vpack.c.bf16 %v1378_v31, %v1377_v56 }
 0x1f9   :  { %1105 = vadd.xlane.f32.xlu0 %v1079_v52  ;;  %v1080_v28 = vmul.f32 %v4934_v11, %v4934_v11 }
 0x1fa   :  { %v1029_v54 = vpop.xlane.xlu0 %1028  ;;  %3906 = vmatprep.subr.bf16.mxu1 %v3905_v9 }
 0x1fb   :  { %v1049_v20 = vmul.f32 0.0078125, %v1029_v54  ;;  %1107 = vadd.xlane.f32.xlu1 %v1080_v28  ;;  %3908 = vmatpush3.bf16.msra.mxu1 %v3905_v9 }
 0x1fc   :  { %v1031_v62 = vpop.xlane.xlu1 %1030  ;;  %3910 = vmatprep.subr.bf16.mxu1 %v3909_v43 }
 0x1fd   :  { %v4947_v26 = vsub.f32 %v4843_v42, %v1049_v20  ;;  %v1050_v29 = vmul.f32 0.0078125, %v1031_v62 }
 0x1ff   :  { %v4956_v3 = vsub.f32 %v4847_v46, %v1050_v29  ;;  %v1081_v53 = vmul.f32 %v4947_v26, %v4947_v26  ;;  %3912 = vmatpush3.bf16.msra.mxu1 %v3909_v43  ;;  %v1382_v46 = vld [vmem:[%s6406_s6 + $0x58] sm:$0xff] }
 0x200   :  { %v3913_v15 = vpack.c.bf16 %v1382_v46, %v1381_v58 }
 0x201   :  { %1109 = vadd.xlane.f32.xlu0 %v1081_v53  ;;  %v1082_v42 = vmul.f32 %v4956_v3, %v4956_v3 }
 0x202   :  { %v1033_v5 = vpop.xlane.xlu0 %1032  ;;  %3914 = vmatprep.subr.bf16.mxu1 %v3913_v15 }
 0x203   :  { %v1051_v6 = vmul.f32 0.0078125, %v1033_v5  ;;  %1111 = vadd.xlane.f32.xlu1 %v1082_v42  ;;  %3916 = vmatpush3.bf16.msra.mxu1 %v3913_v15 }
 0x204   :  { %v1035_v8 = vpop.xlane.xlu1 %1034  ;;  %3918 = vmatprep.subr.bf16.mxu1 %v3917_v38 }
 0x205   :  { %v4969_v10 = vsub.f32 %v4855_v57, %v1051_v6  ;;  %v1052_v47 = vmul.f32 0.0078125, %v1035_v8 }
 0x207   :  { %v4978_v17 = vsub.f32 %v4859_v55, %v1052_v47  ;;  %v1083_v27 = vmul.f32 %v4969_v10, %v4969_v10  ;;  %3920 = vmatpush3.bf16.msra.mxu1 %v3917_v38  ;;  %v3921_v55 = vpack.c.bf16 %v1386_v34, %v1385_v30 }
 0x209   :  { %1113 = vadd.xlane.f32.xlu0 %v1083_v27  ;;  %v1084_v57 = vmul.f32 %v4978_v17, %v4978_v17  ;;  %3922 = vmatprep.subr.bf16.mxu1 %v3921_v55 }
 0x20b   :  { %1115 = vadd.xlane.f32.xlu1 %v1084_v57  ;;  %3924 = vmatpush3.bf16.msra.mxu1 %v3921_v55 }
 0x25e   :  { %v1086_v22 = vpop.xlane.xlu0 %1085 }
 0x25f   :  { %v1117_v25 = vmul.f32 0.0078125, %v1086_v22 }
 0x261   :  { %v1133_v44 = vadd.f32 1e-05, %v1117_v25 }
 0x262   :  { %v1088_v0 = vpop.xlane.xlu1 %1087 }
 0x263   :  { %4179 = vrsqrt.f32 %v1133_v44  ;;  %v1118_v36 = vmul.f32 0.0078125, %v1088_v0 }
 0x265   :  { %v1134_v32 = vadd.f32 1e-05, %v1118_v36 }
 0x266   :  { %v1090_v37 = vpop.xlane.xlu0 %1089 }
 0x267   :  { %4181 = vrsqrt.f32 %v1134_v32  ;;  %v1119_v63 = vmul.f32 0.0078125, %v1090_v37 }
 0x269   :  { %v1135_v12 = vadd.f32 1e-05, %v1119_v63 }
 0x26a   :  { %v1092_v61 = vpop.xlane.xlu1 %1091 }
 0x26b   :  { %4183 = vrsqrt.f32 %v1135_v12  ;;  %v1120_v18 = vmul.f32 0.0078125, %v1092_v61 }
 0x26d   :  { %v4180_v13 = vpop.eup %4179  ;;  %v1136_v41 = vadd.f32 1e-05, %v1120_v18 }
 0x26e   :  { %v1165_v4 = vmul.f32 %v4180_v13, %v4863_v60  ;;  %v1094_v33 = vpop.xlane.xlu0 %1093 }
 0x26f   :  { %4185 = vrsqrt.f32 %v1136_v41  ;;  %v1121_v50 = vmul.f32 0.0078125, %v1094_v33 }
 0x270   :  { %v1188_v52 = vmul.f32 %v4993_v40, %v1165_v4  ;;  %v1096_v16 = vpop.xlane.xlu1 %1095 }
 0x271   :  { %v4182_v28 = vpop.eup %4181  ;;  %v1137_v54 = vadd.f32 1e-05, %v1121_v50  ;;  %v1122_v56 = vmul.f32 0.0078125, %v1096_v16 }
 0x272   :  { %v5003_v31 = vadd.f32 %v4999_v48, %v1188_v52  ;;  %v1166_v20 = vmul.f32 %v4182_v28, %v4868_v45 }
 0x273   :  { %4187 = vrsqrt.f32 %v1137_v54  ;;  %v1138_v60 = vadd.f32 1e-05, %v1122_v56 }
 0x274   :  { %v1189_v9 = vmul.f32 %v4993_v40, %v1166_v20  ;;  %v1243_v62 = vmul.f32 0.044715, %v5003_v31 }
 0x275   :  { %v4184_v29 = vpop.eup %4183  ;;  %4189 = vrsqrt.f32 %v1138_v60 }
 0x276   :  { %v5009_v21 = vadd.f32 %v4999_v48, %v1189_v9  ;;  %v1167_v1 = vmul.f32 %v4184_v29, %v4873_v2  ;;  %v1098_v53 = vpop.xlane.xlu0 %1097  ;;  %v1259_v43 = vmul.f32 %v1243_v62, %v5003_v31 }
 0x277   :  { %v1123_v42 = vmul.f32 0.0078125, %v1098_v53 }
 0x278   :  { %v1190_v5 = vmul.f32 %v4993_v40, %v1167_v1  ;;  %v1100_v45 = vpop.xlane.xlu1 %1099  ;;  %v1275_v58 = vmul.f32 %v1259_v43, %v5003_v31  ;;  %v1244_v46 = vmul.f32 0.044715, %v5009_v21  ;;  %v1227_v43 = vmul.f32 0.5, %v5003_v31 }
 0x279   :  { %v4186_v6 = vpop.eup %4185  ;;  %v1139_v15 = vadd.f32 1e-05, %v1123_v42  ;;  %v1124_v8 = vmul.f32 0.0078125, %v1100_v45 }
 0x27a   :  { %v5017_v47 = vadd.f32 %v4999_v48, %v1190_v5  ;;  %v1168_v24 = vmul.f32 %v4186_v6, %v4878_v39  ;;  %v1291_v2 = vadd.f32 %v1275_v58, %v5003_v31  ;;  %v1260_v14 = vmul.f32 %v1244_v46, %v5009_v21 }
 0x27b   :  { %4191 = vrsqrt.f32 %v1139_v15  ;;  %v1140_v27 = vadd.f32 1e-05, %v1124_v8 }
 0x27c   :  { %v1191_v38 = vmul.f32 %v4993_v40, %v1168_v24  ;;  %v1307_v57 = vmul.f32 0.7978846, %v1291_v2  ;;  %v1276_v30 = vmul.f32 %v1260_v14, %v5009_v21  ;;  %v1245_v55 = vmul.f32 0.044715, %v5017_v47 }
 0x27d   :  { %v4188_v34 = vpop.eup %4187  ;;  %4193 = vrsqrt.f32 %v1140_v27 }
 0x27e   :  { %v5026_v22 = vadd.f32 %v4999_v48, %v1191_v38  ;;  %v1169_v39 = vmul.f32 %v4188_v34, %v4883_v49  ;;  %v1102_v25 = vpop.xlane.xlu0 %1101  ;;  %4195 = vtanh.f32 %v1307_v57  ;;  %v1292_v44 = vadd.f32 %v1276_v30, %v5009_v21 }
 0x27f   :  { %v4190_v0 = vpop.eup %4189  ;;  %v1125_v36 = vmul.f32 0.0078125, %v1102_v25  ;;  %v1261_v32 = vmul.f32 %v1245_v55, %v5017_v47 }
 0x280   :  { %v1192_v37 = vmul.f32 %v4993_v40, %v1169_v39  ;;  %v1170_v63 = vmul.f32 %v4190_v0, %v4886_v23  ;;  %v1104_v12 = vpop.xlane.xlu1 %1103  ;;  %v1308_v61 = vmul.f32 0.7978846, %v1292_v44  ;;  %v1246_v49 = vmul.f32 0.044715, %v5026_v22 }
 0x281   :  { %v1141_v18 = vadd.f32 1e-05, %v1125_v36  ;;  %v1126_v13 = vmul.f32 0.0078125, %v1104_v12  ;;  %v1277_v41 = vmul.f32 %v1261_v32, %v5017_v47  ;;  %v1228_v44 = vmul.f32 0.5, %v5009_v21 }
 0x282   :  { %v5036_v4 = vadd.f32 %v4999_v48, %v1192_v37  ;;  %v1193_v33 = vmul.f32 %v4993_v40, %v1170_v63  ;;  %4197 = vtanh.f32 %v1308_v61  ;;  %v1262_v23 = vmul.f32 %v1246_v49, %v5026_v22 }
 0x283   :  { %4199 = vrsqrt.f32 %v1141_v18  ;;  %v1142_v50 = vadd.f32 1e-05, %v1126_v13  ;;  %v1293_v52 = vadd.f32 %v1277_v41, %v5017_v47 }
 0x284   :  { %v5042_v16 = vadd.f32 %v4999_v48, %v1193_v33  ;;  %v1247_v28 = vmul.f32 0.044715, %v5036_v4  ;;  %v1278_v20 = vmul.f32 %v1262_v23, %v5026_v22 }
 0x285   :  { %v4192_v54 = vpop.eup %4191  ;;  %4201 = vrsqrt.f32 %v1142_v50  ;;  %v1309_v56 = vmul.f32 0.7978846, %v1293_v52 }
 0x286   :  { %v1171_v60 = vmul.f32 %v4192_v54, %v4893_v51  ;;  %v1106_v9 = vpop.xlane.xlu0 %1105  ;;  %v1263_v62 = vmul.f32 %v1247_v28, %v5036_v4  ;;  %v1248_v29 = vmul.f32 0.044715, %v5042_v16  ;;  %v1294_v42 = vadd.f32 %v1278_v20, %v5026_v22 }
 0x287   :  { %v4194_v1 = vpop.eup %4193  ;;  %v1127_v53 = vmul.f32 0.0078125, %v1106_v9  ;;  %4203 = vtanh.f32 %v1309_v56  ;;  %v1229_v20 = vmul.f32 0.5, %v5017_v47 }
 0x288   :  { %v4196_v5 = vpop.eup %4195  ;;  %v1194_v45 = vmul.f32 %v4993_v40, %v1171_v60  ;;  %v1172_v58 = vmul.f32 %v4194_v1, %v4896_v19  ;;  %v1108_v46 = vpop.xlane.xlu1 %1107  ;;  %v1279_v51 = vmul.f32 %v1263_v62, %v5036_v4  ;;  %v1264_v6 = vmul.f32 %v1248_v29, %v5042_v16 }
 0x289   :  { %v1143_v15 = vadd.f32 1e-05, %v1127_v53  ;;  %v1128_v8 = vmul.f32 0.0078125, %v1108_v46  ;;  %v1339_v24 = vadd.f32 1.0, %v4196_v5  ;;  %v1310_v2 = vmul.f32 0.7978846, %v1294_v42 }
 0x28a   :  { %v5056_v14 = vadd.f32 %v4999_v48, %v1194_v45  ;;  %v1195_v31 = vmul.f32 %v4993_v40, %v1172_v58  ;;  %v1295_v27 = vadd.f32 %v1279_v51, %v5036_v4  ;;  %v1280_v38 = vmul.f32 %v1264_v6, %v5042_v16 }
 0x28b   :  { %4205 = vrsqrt.f32 %v1143_v15  ;;  %v1144_v19 = vadd.f32 1e-05, %v1128_v8  ;;  %v1355_v57 = vmul.f32 %v1339_v24, %v1227_v43  ;;  %v1230_v53 = vmul.f32 0.5, %v5026_v22 }
 0x28c   :  { %v4198_v30 = vpop.eup %4197  ;;  %v5062_v34 = vadd.f32 %v4999_v48, %v1195_v31  ;;  %4207 = vtanh.f32 %v1310_v2  ;;  %v1311_v55 = vmul.f32 0.7978846, %v1295_v27  ;;  %v1296_v39 = vadd.f32 %v1280_v38, %v5042_v16 }
 0x28d   :  { %v4200_v25 = vpop.eup %4199  ;;  %4209 = vrsqrt.f32 %v1144_v19  ;;  %3869 = vmatprep.mubr.f32.mxu1 %v1355_v57  ;;  %v1340_v0 = vadd.f32 1.0, %v4198_v30  ;;  %v1249_v36 = vmul.f32 0.044715, %v5056_v14  ;;  %v1231_v5 = vmul.f32 0.5, %v5036_v4 }
 0x28e   :  { %v1173_v32 = vmul.f32 %v4200_v25, %v4903_v59  ;;  %v1110_v37 = vpop.xlane.xlu0 %1109  ;;  %4211 = vtanh.f32 %v1311_v55  ;;  %v1312_v63 = vmul.f32 0.7978846, %v1296_v39  ;;  %v1250_v41 = vmul.f32 0.044715, %v5062_v34 }
 0x28f   :  { %v4202_v12 = vpop.eup %4201  ;;  %v1129_v61 = vmul.f32 0.0078125, %v1110_v37  ;;  %v1356_v18 = vmul.f32 %v1340_v0, %v1228_v44  ;;  %v1265_v13 = vmul.f32 %v1249_v36, %v5056_v14  ;;  %v1232_v6 = vmul.f32 0.5, %v5042_v16 }
 0x290   :  { %v1196_v49 = vmul.f32 %v4993_v40, %v1173_v32  ;;  %v1174_v33 = vmul.f32 %v4202_v12, %v4912_v35  ;;  %v1112_v21 = vpop.xlane.xlu1 %1111  ;;  %4213 = vtanh.f32 %v1312_v63  ;;  %v1266_v28 = vmul.f32 %v1250_v41, %v5062_v34 }
 0x291   :  { %v4204_v50 = vpop.eup %4203  ;;  %v1145_v52 = vadd.f32 1e-05, %v1129_v61  ;;  %v1130_v23 = vmul.f32 0.0078125, %v1112_v21  ;;  %3870 = vmatmul.mubr.f32.vlgmr.msra.gmra.mrb[64].mxu1 %v1356_v18  ;;  %v1281_v59 = vmul.f32 %v1265_v13, %v5056_v14 }
 0x292   :  { %v5075_v54 = vadd.f32 %v4999_v48, %v1196_v49  ;;  %v1197_v56 = vmul.f32 %v4993_v40, %v1174_v33  ;;  %v1341_v60 = vadd.f32 1.0, %v4204_v50  ;;  %v1282_v62 = vmul.f32 %v1266_v28, %v5062_v34 }
 0x293   :  { %4215 = vrsqrt.f32 %v1145_v52  ;;  %v1146_v35 = vadd.f32 1e-05, %v1130_v23  ;;  %v1297_v9 = vadd.f32 %v1281_v59, %v5056_v14 }
 0x294   :  { %v5082_v29 = vadd.f32 %v4999_v48, %v1197_v56  ;;  %v1357_v1 = vmul.f32 %v1341_v60, %v1229_v20  ;;  %v1251_v43 = vmul.f32 0.044715, %v5075_v54  ;;  %v1298_v45 = vadd.f32 %v1282_v62, %v5062_v34 }
 0x295   :  { %v4206_v42 = vpop.eup %4205  ;;  %4217 = vrsqrt.f32 %v1146_v35  ;;  %v1313_v47 = vmul.f32 0.7978846, %v1297_v9  ;;  %v1233_v20 = vmul.f32 0.5, %v5056_v14 }
 0x296   :  { %v4208_v58 = vpop.eup %4207  ;;  %v1175_v46 = vmul.f32 %v4206_v42, %v4925_v7  ;;  %3872 = vmatprep.mubr.f32.mxu1 %v1357_v1  ;;  %v1114_v51 = vpop.xlane.xlu0 %1113  ;;  %v1267_v15 = vmul.f32 %v1251_v43, %v5075_v54  ;;  %v1252_v22 = vmul.f32 0.044715, %v5082_v29  ;;  %v1314_v31 = vmul.f32 0.7978846, %v1298_v45 }
 0x297   :  { %v4210_v8 = vpop.eup %4209  ;;  %v1131_v24 = vmul.f32 0.0078125, %v1114_v51  ;;  %v1342_v2 = vadd.f32 1.0, %v4208_v58  ;;  %4219 = vtanh.f32 %v1313_v47  ;;  %v1234_v47 = vmul.f32 0.5, %v5062_v34 }
 0x298   :  { %v4212_v4 = vpop.eup %4211  ;;  %v1198_v27 = vmul.f32 %v4993_v40, %v1175_v46  ;;  %v1176_v38 = vmul.f32 %v4210_v8, %v4934_v11  ;;  %v1116_v19 = vpop.xlane.xlu1 %1115  ;;  %v1283_v7 = vmul.f32 %v1267_v15, %v5075_v54  ;;  %v1268_v57 = vmul.f32 %v1252_v22, %v5082_v29 }
 0x299   :  { %v1147_v16 = vadd.f32 1e-05, %v1131_v24  ;;  %v1132_v30 = vmul.f32 0.0078125, %v1116_v19  ;;  %v1358_v55 = vmul.f32 %v1342_v2, %v1230_v53  ;;  %v1343_v39 = vadd.f32 1.0, %v4212_v4 }
 0x29a   :  { %v4214_v25 = vpop.eup %4213  ;;  %v5097_v44 = vadd.f32 %v4999_v48, %v1198_v27  ;;  %v1199_v0 = vmul.f32 %v4993_v40, %v1176_v38  ;;  %4221 = vtanh.f32 %v1314_v31  ;;  %v1299_v36 = vadd.f32 %v1283_v7, %v5075_v54 }
 0x29b   :  { %4223 = vrsqrt.f32 %v1147_v16  ;;  %v1148_v11 = vadd.f32 1e-05, %v1132_v30  ;;  %3873 = vmatmul.mubr.f32.gmra.mrb[66].mxu1 %v1358_v55  ;;  %v1359_v32 = vmul.f32 %v1343_v39, %v1231_v5  ;;  %v1344_v37 = vadd.f32 1.0, %v4214_v25 }
 0x29c   :  { %v5102_v63 = vadd.f32 %v4999_v48, %v1199_v0  ;;  %v1315_v12 = vmul.f32 0.7978846, %v1299_v36  ;;  %v1284_v61 = vmul.f32 %v1268_v57, %v5082_v29  ;;  %v1253_v41 = vmul.f32 0.044715, %v5097_v44 }
 0x29d   :  { %v4216_v18 = vpop.eup %4215  ;;  %4225 = vrsqrt.f32 %v1148_v11  ;;  %3875 = vmatprep.mubr.f32.mxu1 %v1359_v32  ;;  %v1360_v13 = vmul.f32 %v1344_v37, %v1232_v6 }
 0x29e   :  { %v1177_v49 = vmul.f32 %v4216_v18, %v4947_v26  ;;  %4227 = vtanh.f32 %v1315_v12  ;;  %v1300_v33 = vadd.f32 %v1284_v61, %v5082_v29  ;;  %v1269_v50 = vmul.f32 %v1253_v41, %v5097_v44 }
 0x29f   :  { %v4218_v21 = vpop.eup %4217  ;;  %3876 = vmatmul.mubr.f32.gmra.mrb[68].mxu1 %v1360_v13  ;;  %v1254_v52 = vmul.f32 0.044715, %v5102_v63 }
 0x2a0   :  { %v1200_v23 = vmul.f32 %v4993_v40, %v1177_v49  ;;  %v1178_v59 = vmul.f32 %v4218_v21, %v4956_v3  ;;  %v1316_v28 = vmul.f32 0.7978846, %v1300_v33  ;;  %v1285_v60 = vmul.f32 %v1269_v50, %v5097_v44 }
 0x2a1   :  { %v4220_v56 = vpop.eup %4219  ;;  %v1270_v26 = vmul.f32 %v1254_v52, %v5102_v63 }
 0x2a2   :  { %v5116_v35 = vadd.f32 %v4999_v48, %v1200_v23  ;;  %v1201_v9 = vmul.f32 %v4993_v40, %v1178_v59  ;;  %v1345_v62 = vadd.f32 1.0, %v4220_v56  ;;  %4229 = vtanh.f32 %v1316_v28 }
 0x2a3   :  { %v1301_v1 = vadd.f32 %v1285_v60, %v5097_v44  ;;  %v1286_v53 = vmul.f32 %v1270_v26, %v5102_v63 }
 0x2a4   :  { %v4222_v3 = vpop.eup %4221  ;;  %v5122_v43 = vadd.f32 %v4999_v48, %v1201_v9  ;;  %v1361_v14 = vmul.f32 %v1345_v62, %v1233_v20  ;;  %v1255_v42 = vmul.f32 0.044715, %v5116_v35  ;;  %v1239_v20 = vmul.f32 0.5, %v5116_v35 }
 0x2a5   :  { %v4224_v5 = vpop.eup %4223  ;;  %v1346_v45 = vadd.f32 1.0, %v4222_v3  ;;  %v1317_v58 = vmul.f32 0.7978846, %v1301_v1  ;;  %v1302_v46 = vadd.f32 %v1286_v53, %v5102_v63 }
 0x2a6   :  { %v1179_v51 = vmul.f32 %v4224_v5, %v4969_v10  ;;  %3878 = vmatprep.mubr.f32.mxu1 %v1361_v14  ;;  %v1271_v6 = vmul.f32 %v1255_v42, %v5116_v35  ;;  %v1256_v15 = vmul.f32 0.044715, %v5122_v43  ;;  %v1235_v10 = vmul.f32 0.5, %v5075_v54 }
 0x2a7   :  { %v4226_v22 = vpop.eup %4225  ;;  %v1362_v8 = vmul.f32 %v1346_v45, %v1234_v47  ;;  %4231 = vtanh.f32 %v1317_v58  ;;  %v1318_v24 = vmul.f32 0.7978846, %v1302_v46  ;;  %v1236_v54 = vmul.f32 0.5, %v5082_v29  ;;  %v1532_v58 = vld [vmem:[%s6401_s1] sm:$0xff] }
 0x2a8   :  { %v4228_v2 = vpop.eup %4227  ;;  %v1202_v31 = vmul.f32 %v4993_v40, %v1179_v51  ;;  %v1180_v34 = vmul.f32 %v4226_v22, %v4978_v17  ;;  %v1287_v4 = vmul.f32 %v1271_v6, %v5116_v35  ;;  %v1272_v27 = vmul.f32 %v1256_v15, %v5122_v43 }
 0x2a9   :  { %3879 = vmatmul.mubr.f32.gmra.mrb[70].mxu1 %v1362_v8  ;;  %v1347_v38 = vadd.f32 1.0, %v4228_v2  ;;  %4233 = vtanh.f32 %v1318_v24  ;;  %v1238_v29 = vmul.f32 0.5, %v5102_v63  ;;  %v1240_v9 = vmul.f32 0.5, %v5122_v43  ;;  %v1535_v8 = vld [vmem:[%s6401_s1 + $0x18] sm:$0xff] }
 0x2aa   :  { %v1225_v19 = vadd.f32 %v4999_v48, %v1202_v31  ;;  %v1203_v7 = vmul.f32 %v4993_v40, %v1180_v34  ;;  %v1303_v57 = vadd.f32 %v1287_v4, %v5116_v35  ;;  %v1288_v16 = vmul.f32 %v1272_v27, %v5122_v43  ;;  %v1534_v31 = vld [vmem:[%s6401_s1 + $0x10] sm:$0xff] }
 0x2ab   :  { %v1363_v30 = vmul.f32 %v1347_v38, %v1235_v10  ;;  %v4363_v35 = vmov 0   ;;  %v3501_v51 = vadd.f32 -1.0, %v1532_v58  ;;  %v3504_v27 = vadd.f32 -1.0, %v1535_v8 }
 0x2ac   :  { %v4230_v55 = vpop.eup %4229  ;;  %v1226_v17 = vadd.f32 %v4999_v48, %v1203_v7  ;;  %v1319_v39 = vmul.f32 0.7978846, %v1303_v57  ;;  %v1304_v25 = vadd.f32 %v1288_v16, %v5122_v43  ;;  %v1257_v36 = vmul.f32 0.044715, %v1225_v19  ;;  %3938 = vset.pattern.permute.xlu1 %v4363_v35  ;;  %3937 = vset.pattern.permute.xlu0 %v4363_v35  ;;  %v1533_v43 = vld [vmem:[%s6401_s1 + $0x8] sm:$0xff]  ;;  %v1536_v57 = vld [vmem:[%s6401_s1 + $0x20] sm:$0xff] }
 0x2ad   :  { %3881 = vmatprep.mubr.f32.mxu1 %v1363_v30  ;;  %v1348_v0 = vadd.f32 1.0, %v4230_v55  ;;  %v1237_v48 = vmul.f32 0.5, %v5097_v44  ;;  %v1241_v3 = vmul.f32 0.5, %v1225_v19  ;;  %v3502_v46 = vadd.f32 -1.0, %v1533_v43 }
 0x2ae   :  { %4235 = vtanh.f32 %v1319_v39  ;;  %v1320_v11 = vmul.f32 0.7978846, %v1304_v25  ;;  %v1258_v32 = vmul.f32 0.044715, %v1226_v17  ;;  %v1273_v37 = vmul.f32 %v1257_v36, %v1225_v19 }
 0x2af   :  { %v1364_v40 = vmul.f32 %v1348_v0, %v1236_v54  ;;  %v1242_v42 = vmul.f32 0.5, %v1226_v17  ;;  %v1565_v6 = vmul.f32 1e+30, %v3502_v46  ;;  %v1564_v15 = vmul.f32 1e+30, %v3501_v51 }
 0x2b0   :  { %4237 = vtanh.f32 %v1320_v11  ;;  %v1274_v12 = vmul.f32 %v1258_v32, %v1226_v17  ;;  %v1289_v18 = vmul.f32 %v1273_v37, %v1225_v19  ;;  %v3503_v38 = vadd.f32 -1.0, %v1534_v31 }
 0x2b1   :  { %v4232_v61 = vpop.eup %4231  ;;  %3882 = vmatmul.mubr.f32.gmra.mrb[72].mxu1 %v1364_v40  ;;  %v1567_v30 = vmul.f32 1e+30, %v3504_v27  ;;  %v3505_v39 = vadd.f32 -1.0, %v1536_v57 }
 0x2b2   :  { %v1349_v13 = vadd.f32 1.0, %v4232_v61  ;;  %v1290_v41 = vmul.f32 %v1274_v12, %v1226_v17  ;;  %v1305_v33 = vadd.f32 %v1289_v18, %v1225_v19  ;;  %v1537_v19 = vld [vmem:[%s6401_s1 + $0x28] sm:$0xff]  ;;  %v1539_v18 = vld [vmem:[%s6401_s1 + $0x38] sm:$0xff] }
 0x2b3   :  { %v4234_v49 = vpop.eup %4233  ;;  %v3506_v55 = vadd.f32 -1.0, %v1537_v19  ;;  %v1568_v37 = vmul.f32 1e+30, %v3505_v39  ;;  %v1542_v19 = vld [vmem:[%s6401_s1 + $0x50] sm:$0xff] }
 0x2b4   :  { %v1365_v21 = vmul.f32 %v1349_v13, %v1237_v48  ;;  %v1350_v50 = vadd.f32 1.0, %v4234_v49  ;;  %v1306_v52 = vadd.f32 %v1290_v41, %v1226_v17  ;;  %v1321_v23 = vmul.f32 0.7978846, %v1305_v33 }
 0x2b5   :  { %v1566_v17 = vmul.f32 1e+30, %v3503_v38  ;;  %v1569_v32 = vmul.f32 1e+30, %v3506_v55  ;;  %v1543_v38 = vld [vmem:[%s6401_s1 + $0x58] sm:$0xff] }
 0x2b6   :  { %3884 = vmatprep.mubr.f32.mxu1 %v1365_v21  ;;  %v1366_v59 = vmul.f32 %v1350_v50, %v1238_v29  ;;  %v1322_v28 = vmul.f32 0.7978846, %v1306_v52  ;;  %4239 = vtanh.f32 %v1321_v23  ;;  %v1538_v29 = vld [vmem:[%s6401_s1 + $0x30] sm:$0xff]  ;;  %v3508_v52 = vadd.f32 -1.0, %v1539_v18 }
 0x2b8   :  { %v4236_v56 = vpop.eup %4235  ;;  %3885 = vmatmul.mubr.f32.gmra.mrb[74].mxu1 %v1366_v59  ;;  %4241 = vtanh.f32 %v1322_v28 }
 0x2b9   :  { %v1351_v44 = vadd.f32 1.0, %v4236_v56 }
 0x2ba   :  { %v4238_v60 = vpop.eup %4237 }
 0x2bb   :  { %v1367_v26 = vmul.f32 %v1351_v44, %v1239_v20  ;;  %v1352_v62 = vadd.f32 1.0, %v4238_v60  ;;  %v3507_v20 = vadd.f32 -1.0, %v1538_v29 }
 0x2bd   :  { %3887 = vmatprep.mubr.f32.mxu1 %v1367_v26  ;;  %v1368_v63 = vmul.f32 %v1352_v62, %v1240_v9  ;;  %v1571_v62 = vmul.f32 1e+30, %v3508_v52 }
 0x2bf   :  { %3888 = vmatmul.mubr.f32.gmra.mrb[76].mxu1 %v1368_v63 }
 0x2c0   :  { %v4240_v1 = vpop.eup %4239 }
 0x2c1   :  { %v1353_v14 = vadd.f32 1.0, %v4240_v1 }
 0x2c2   :  { %v4242_v53 = vpop.eup %4241 }
 0x2c3   :  { %v1354_v5 = vadd.f32 1.0, %v4242_v53  ;;  %v1369_v47 = vmul.f32 %v1353_v14, %v1241_v3  ;;  %v1570_v14 = vmul.f32 1e+30, %v3507_v20 }
 0x2c5   :  { %v1370_v45 = vmul.f32 %v1354_v5, %v1242_v42  ;;  %3890 = vmatprep.mubr.f32.mxu1 %v1369_v47  ;;  %v1541_v47 = vld [vmem:[%s6401_s1 + $0x48] sm:$0xff] }
 0x2c7   :  { %3891 = vmatmul.mubr.f32.gmra.mrb[78].mxu1 %v1370_v45  ;;  %v1540_v45 = vld [vmem:[%s6401_s1 + $0x40] sm:$0xff] }
 0x364   :  { %v3871_v22 = vpop.f32.mrb[64].mxu1 }
 0x365   :  { %v1581_v24 = vadd.f32 %v3871_v22, %v1565_v6  ;;  %v1453_v2 = vpop.f32.mrb[65].mxu1  ;;  %v3509_v22 = vadd.f32 -1.0, %v1540_v45 }
 0x366   :  { %v1580_v34 = vadd.f32 %v1564_v15, %v1453_v2  ;;  %v3510_v15 = vadd.f32 -1.0, %v1541_v47 }
 0x367   :  { %v1598_v4 = vsel %vm1596_vm0, %v1581_v24, -inf  ;;  %v1572_v57 = vmul.f32 1e+30, %v3509_v22 }
 0x368   :  { %v1597_v10 = vsel %vm1596_vm0, %v1580_v34, -inf }
 0x369   :  { %v1599_v7 = vmax.f32 %v1597_v10, %v1598_v4 }
 0x36b   :  { %v1600_v16 = vrot.slane %v1599_v7, 4 }
 0x36d   :  { %v1601_v25 = vmax.f32 %v1599_v7, %v1600_v16  ;;  %v1573_v7 = vmul.f32 1e+30, %v3510_v15 }
 0x36e   :  { %v3874_v54 = vpop.f32.mrb[66].mxu1 }
 0x36f   :  { %v1602_v0 = vrot.slane %v1601_v25, 2  ;;  %v1583_v36 = vadd.f32 %v3874_v54, %v1567_v30  ;;  %v1463_v11 = vpop.f32.mrb[67].mxu1  ;;  %v3511_v54 = vadd.f32 -1.0, %v1542_v19 }
 0x370   :  { %v1582_v40 = vadd.f32 %v1566_v17, %v1463_v11 }
 0x371   :  { %v1603_v12 = vmax.f32 %v1601_v25, %v1602_v0  ;;  %v1607_v61 = vsel %vm1596_vm0, %v1583_v36, -inf  ;;  %v3512_v25 = vadd.f32 -1.0, %v1543_v38 }
 0x372   :  { %v1606_v48 = vsel %vm1596_vm0, %v1582_v40, -inf  ;;  %v3877_v13 = vpop.f32.mrb[68].mxu1 }
 0x373   :  { %v1604_v41 = vrot.slane %v1603_v12, 1  ;;  %v1608_v49 = vmax.f32 %v1606_v48, %v1607_v61  ;;  %v5171_v33 = vadd.f32 %v3877_v13, %v1569_v32  ;;  %v1473_v21 = vpop.f32.mrb[69].mxu1  ;;  %v1545_v48 = vld [vmem:[%s6401_s1 + $0x68] sm:$0xff]  ;;  %v1575_v52 = vmul.f32 1e+30, %v3512_v25 }
 0x374   :  { %v5176_v50 = vadd.f32 %v1568_v37, %v1473_v21 }
 0x375   :  { %v1605_v23 = vmax.f32 %v1603_v12, %v1604_v41  ;;  %v1609_v59 = vrot.slane %v1608_v49, 4  ;;  %v1616_v28 = vsel %vm1596_vm0, %v5171_v33, -inf }
 0x376   :  { %v1615_v56 = vsel %vm1596_vm0, %v5176_v50, -inf }
 0x377   :  { %v1669_v44 = vsub.f32 %v1580_v34, %v1605_v23  ;;  %v1670_v60 = vsub.f32 %v1581_v24, %v1605_v23  ;;  %v1610_v26 = vmax.f32 %v1608_v49, %v1609_v59  ;;  %v1617_v9 = vmax.f32 %v1615_v56, %v1616_v28  ;;  %v1544_v56 = vld [vmem:[%s6401_s1 + $0x60] sm:$0xff] }
 0x378   :  { %v1574_v28 = vmul.f32 1e+30, %v3511_v54 }
 0x379   :  { %v1685_v63 = vmul.f32 1.442695, %v1669_v44  ;;  %v1687_v1 = vmul.f32 1.442695, %v1670_v60  ;;  %v1611_v53 = vrot.slane %v1610_v26, 2  ;;  %v1618_v3 = vrot.slane %v1617_v9, 4 }
 0x37a   :  { %v3514_v44 = vadd.f32 -1.0, %v1545_v48 }
 0x37b   :  { %4243 = vpow2.f32 %v1685_v63  ;;  %v1612_v42 = vmax.f32 %v1610_v26, %v1611_v53  ;;  %v1619_v5 = vmax.f32 %v1617_v9, %v1618_v3  ;;  %v3513_v3 = vadd.f32 -1.0, %v1544_v56 }
 0x37c   :  { %4245 = vpow2.f32 %v1687_v1  ;;  %v3880_v35 = vpop.f32.mrb[70].mxu1  ;;  %v1577_v45 = vmul.f32 1e+30, %v3514_v44 }
 0x37d   :  { %v1613_v43 = vrot.slane %v1612_v42, 1  ;;  %v1620_v58 = vrot.slane %v1619_v5, 2  ;;  %v5188_v46 = vadd.f32 %v3880_v35, %v1571_v62  ;;  %v1483_v51 = vpop.f32.mrb[71].mxu1  ;;  %v1547_v62 = vld [vmem:[%s6401_s1 + $0x78] sm:$0xff] }
 0x37e   :  { %v5190_v6 = vadd.f32 %v1570_v14, %v1483_v51  ;;  %v3516_v35 = vadd.f32 -1.0, %v1547_v62 }
 0x37f   :  { %v1614_v8 = vmax.f32 %v1612_v42, %v1613_v43  ;;  %v1621_v24 = vmax.f32 %v1619_v5, %v1620_v58  ;;  %v1625_v2 = vsel %vm1596_vm0, %v5188_v46, -inf }
 0x380   :  { %v1624_v31 = vsel %vm1596_vm0, %v5190_v6, -inf  ;;  %v1579_v54 = vmul.f32 1e+30, %v3516_v35 }
 0x381   :  { %v1671_v34 = vsub.f32 %v1582_v40, %v1614_v8  ;;  %v1672_v4 = vsub.f32 %v1583_v36, %v1614_v8  ;;  %v1622_v27 = vrot.slane %v1621_v24, 1  ;;  %v1626_v10 = vmax.f32 %v1624_v31, %v1625_v2 }
 0x383   :  { %v1689_v16 = vmul.f32 1.442695, %v1671_v34  ;;  %v1691_v30 = vmul.f32 1.442695, %v1672_v4  ;;  %v1623_v55 = vmax.f32 %v1621_v24, %v1622_v27  ;;  %v1627_v17 = vrot.slane %v1626_v10, 4  ;;  %v1546_v24 = vld [vmem:[%s6401_s1 + $0x70] sm:$0xff] }
 0x384   :  { %v3883_v39 = vpop.f32.mrb[72].mxu1  ;;  %v1576_v4 = vmul.f32 1e+30, %v3513_v3 }
 0x385   :  { %v5202_v0 = vpop.eup %4243  ;;  %4247 = vpow2.f32 %v1689_v16  ;;  %v1673_v36 = vsub.f32 %v5176_v50, %v1623_v55  ;;  %v1674_v11 = vsub.f32 %v5171_v33, %v1623_v55  ;;  %v1628_v32 = vmax.f32 %v1626_v10, %v1627_v17  ;;  %v1493_v40 = vpop.f32.mrb[73].mxu1 }
 0x386   :  { %v5206_v37 = vpop.eup %4245  ;;  %v1717_v12 = vsel %vm1596_vm0, %v5202_v0, 0.0  ;;  %4249 = vpow2.f32 %v1691_v30  ;;  %v5210_v61 = vadd.f32 %v3883_v39, %v1573_v7  ;;  %v5212_v18 = vadd.f32 %v1572_v57, %v1493_v40 }
 0x387   :  { %v1718_v13 = vsel %vm1596_vm0, %v5206_v37, 0.0  ;;  %v1693_v41 = vmul.f32 1.442695, %v1673_v36  ;;  %v1695_v49 = vmul.f32 1.442695, %v1674_v11  ;;  %v1629_v33 = vrot.slane %v1628_v32, 2 }
 0x388   :  { %v1719_v21 = vadd.f32 %v1718_v13, %v1717_v12  ;;  %v1634_v29 = vsel %vm1596_vm0, %v5210_v61, -inf  ;;  %v1633_v50 = vsel %vm1596_vm0, %v5212_v18, -inf  ;;  %v3515_v16 = vadd.f32 -1.0, %v1546_v24 }
 0x389   :  { %4251 = vpow2.f32 %v1693_v41  ;;  %v1630_v23 = vmax.f32 %v1628_v32, %v1629_v33  ;;  %v1635_v59 = vmax.f32 %v1633_v50, %v1634_v29 }
 0x38a   :  { %v1720_v20 = vrot.slane %v1719_v21, 4  ;;  %4253 = vpow2.f32 %v1695_v49 }
 0x38b   :  { %v1631_v60 = vrot.slane %v1630_v23, 1  ;;  %v1636_v26 = vrot.slane %v1635_v59, 4  ;;  %v3886_v9 = vpop.f32.mrb[74].mxu1 }
 0x38c   :  { %v1721_v63 = vadd.f32 %v1720_v20, %v1719_v21  ;;  %v5229_v1 = vadd.f32 %v3886_v9, %v1575_v52  ;;  %v1503_v53 = vpop.f32.mrb[75].mxu1 }
 0x38d   :  { %v1632_v14 = vmax.f32 %v1630_v23, %v1631_v60  ;;  %v1637_v42 = vmax.f32 %v1635_v59, %v1636_v26  ;;  %v5231_v5 = vadd.f32 %v1574_v28, %v1503_v53  ;;  %v1578_v59 = vmul.f32 1e+30, %v3515_v16 }
 0x38e   :  { %v1643_v47 = vsel %vm1596_vm0, %v5229_v1, -inf  ;;  %v1722_v43 = vrot.slane %v1721_v63, 2 }
 0x38f   :  { %v5235_v58 = vpop.eup %4247  ;;  %v1675_v51 = vsub.f32 %v5190_v6, %v1632_v14  ;;  %v1676_v15 = vsub.f32 %v5188_v46, %v1632_v14  ;;  %v1638_v22 = vrot.slane %v1637_v42, 2  ;;  %v1642_v8 = vsel %vm1596_vm0, %v5231_v5, -inf }
 0x390   :  { %v5244_v2 = vpop.eup %4249  ;;  %v1726_v31 = vsel %vm1596_vm0, %v5235_v58, 0.0  ;;  %v1644_v34 = vmax.f32 %v1642_v8, %v1643_v47  ;;  %v1723_v27 = vadd.f32 %v1722_v43, %v1721_v63 }
 0x391   :  { %v1727_v6 = vsel %vm1596_vm0, %v5244_v2, 0.0  ;;  %v1697_v46 = vmul.f32 1.442695, %v1675_v51  ;;  %v1699_v10 = vmul.f32 1.442695, %v1676_v15  ;;  %v1639_v38 = vmax.f32 %v1637_v42, %v1638_v22 }
 0x392   :  { %v1728_v19 = vadd.f32 %v1727_v6, %v1726_v31  ;;  %v1645_v7 = vrot.slane %v1644_v34, 4  ;;  %v3889_v57 = vpop.f32.mrb[76].mxu1  ;;  %v1724_v30 = vrot.slane %v1723_v27, 1 }
 0x393   :  { %v5250_v55 = vpop.eup %4251  ;;  %4255 = vpow2.f32 %v1697_v46  ;;  %v1640_v17 = vrot.slane %v1639_v38, 1  ;;  %v5252_v39 = vadd.f32 %v3889_v57, %v1577_v45  ;;  %v1513_v25 = vpop.f32.mrb[77].mxu1 }
 0x394   :  { %v5254_v36 = vpop.eup %4253  ;;  %v1729_v11 = vrot.slane %v1728_v19, 4  ;;  %v1735_v32 = vsel %vm1596_vm0, %v5250_v55, 0.0  ;;  %4257 = vpow2.f32 %v1699_v10  ;;  %v1646_v40 = vmax.f32 %v1644_v34, %v1645_v7 }
 0x395   :  { %v1736_v12 = vsel %vm1596_vm0, %v5254_v36, 0.0  ;;  %v1641_v48 = vmax.f32 %v1639_v38, %v1640_v17  ;;  %v1652_v13 = vsel %vm1596_vm0, %v5252_v39, -inf  ;;  %v5262_v41 = vadd.f32 %v1576_v4, %v1513_v25 }
 0x396   :  { %v1730_v49 = vadd.f32 %v1729_v11, %v1728_v19  ;;  %v1737_v33 = vadd.f32 %v1736_v12, %v1735_v32  ;;  %v1647_v21 = vrot.slane %v1646_v40, 2  ;;  %v1725_v29 = vadd.f32 %v1724_v30, %v1723_v27 }
 0x397   :  { %v1677_v50 = vsub.f32 %v5212_v18, %v1641_v48  ;;  %v1678_v52 = vsub.f32 %v5210_v61, %v1641_v48  ;;  %v1651_v23 = vsel %vm1596_vm0, %v5262_v41, -inf }
 0x398   :  { %v1738_v28 = vrot.slane %v1737_v33, 4  ;;  %v1648_v56 = vmax.f32 %v1646_v40, %v1647_v21  ;;  %v1653_v20 = vmax.f32 %v1651_v23, %v1652_v13  ;;  %4259 = vrcp.f32 %v1725_v29 }
 0x399   :  { %v1701_v44 = vmul.f32 1.442695, %v1677_v50  ;;  %v1703_v60 = vmul.f32 1.442695, %v1678_v52  ;;  %v1731_v26 = vrot.slane %v1730_v49, 2 }
 0x39a   :  { %v1739_v9 = vadd.f32 %v1738_v28, %v1737_v33  ;;  %v1649_v62 = vrot.slane %v1648_v56, 1  ;;  %v1654_v63 = vrot.slane %v1653_v20, 4  ;;  %v3892_v53 = vpop.f32.mrb[78].mxu1 }
 0x39b   :  { %4261 = vpow2.f32 %v1701_v44  ;;  %v5268_v3 = vadd.f32 %v3892_v53, %v1579_v54  ;;  %v1523_v18 = vpop.f32.mrb[79].mxu1  ;;  %v1732_v61 = vadd.f32 %v1731_v26, %v1730_v49 }
 0x39c   :  { %4263 = vpow2.f32 %v1703_v60  ;;  %v1650_v14 = vmax.f32 %v1648_v56, %v1649_v62  ;;  %v1655_v42 = vmax.f32 %v1653_v20, %v1654_v63  ;;  %v5270_v47 = vadd.f32 %v1578_v59, %v1523_v18 }
 0x39d   :  { %v5272_v45 = vpop.eup %4255  ;;  %v1661_v35 = vsel %vm1596_vm0, %v5268_v3, -inf  ;;  %v1733_v43 = vrot.slane %v1732_v61, 1  ;;  %v1740_v51 = vrot.slane %v1739_v9, 2 }
 0x39e   :  { %v5276_v15 = vpop.eup %4257  ;;  %v1744_v22 = vsel %vm1596_vm0, %v5272_v45, 0.0  ;;  %v1679_v8 = vsub.f32 %v5231_v5, %v1650_v14  ;;  %v1680_v24 = vsub.f32 %v5229_v1, %v1650_v14  ;;  %v1656_v31 = vrot.slane %v1655_v42, 2 }
 0x39f   :  { %v1745_v34 = vsel %vm1596_vm0, %v5276_v15, 0.0  ;;  %v1660_v4 = vsel %vm1596_vm0, %v5270_v47, -inf  ;;  %v1734_v27 = vadd.f32 %v1733_v43, %v1732_v61  ;;  %v1741_v6 = vadd.f32 %v1740_v51, %v1739_v9 }
 0x3a0   :  { %v1746_v46 = vadd.f32 %v1745_v34, %v1744_v22  ;;  %v1705_v10 = vmul.f32 1.442695, %v1679_v8  ;;  %v1707_v38 = vmul.f32 1.442695, %v1680_v24  ;;  %v1657_v19 = vmax.f32 %v1655_v42, %v1656_v31 }
 0x3a1   :  { %v1662_v7 = vmax.f32 %v1660_v4, %v1661_v35  ;;  %4265 = vrcp.f32 %v1734_v27  ;;  %v1742_v57 = vrot.slane %v1741_v6, 1 }
 0x3a2   :  { %v4260_v16 = vpop.eup %4259  ;;  %v1747_v5 = vrot.slane %v1746_v46, 4  ;;  %4267 = vpow2.f32 %v1705_v10  ;;  %v1658_v1 = vrot.slane %v1657_v19, 1 }
 0x3a3   :  { %4269 = vpow2.f32 %v1707_v38  ;;  %v1663_v30 = vrot.slane %v1662_v7, 4  ;;  %v1798_v17 = vmul.f32 %v4260_v16, %v5206_v37  ;;  %v1797_v25 = vmul.f32 %v4260_v16, %v5202_v0 }
 0x3a4   :  { %v1748_v54 = vadd.f32 %v1747_v5, %v1746_v46  ;;  %v1659_v11 = vmax.f32 %v1657_v19, %v1658_v1  ;;  %v1743_v32 = vadd.f32 %v1742_v57, %v1741_v6  ;;  %v4035_v57 = vld [vmem:[%s6407_s7] ss:$8 sps:$4 sm:$0xff]  }
 0x3a5   :  { %v5288_v40 = vpop.eup %4261  ;;  %v1664_v12 = vmax.f32 %v1662_v7, %v1663_v30  ;;  %1916 = vperm.xlu1 %3938, %v1798_v17   ;;  %1911 = vperm.xlu0 %3937, %v1797_v25  }
 0x3a6   :  { %v5290_v48 = vpop.eup %4263  ;;  %v1753_v13 = vsel %vm1596_vm0, %v5288_v40, 0.0  ;;  %v1681_v49 = vsub.f32 %v5262_v41, %v1659_v11  ;;  %v1682_v33 = vsub.f32 %v5252_v39, %v1659_v11  ;;  %4271 = vrcp.f32 %v1743_v32  ;;  %v4040_v32 = vld [vmem:[%s6407_s7 + $0x14] ss:$8 sps:$4 sm:$0xff]  }
 0x3a7   :  { %v1754_v0 = vsel %vm1596_vm0, %v5290_v48, 0.0  ;;  %v1665_v37 = vrot.slane %v1664_v12, 2  ;;  %v1749_v21 = vrot.slane %v1748_v54, 2 }
 0x3a8   :  { %v1755_v29 = vadd.f32 %v1754_v0, %v1753_v13  ;;  %v1709_v50 = vmul.f32 1.442695, %v1681_v49  ;;  %v1711_v52 = vmul.f32 1.442695, %v1682_v33 }
 0x3a9   :  { %v1666_v23 = vmax.f32 %v1664_v12, %v1665_v37  ;;  %v1750_v59 = vadd.f32 %v1749_v21, %v1748_v54 }
 0x3aa   :  { %v1756_v28 = vrot.slane %v1755_v29, 4  ;;  %4273 = vpow2.f32 %v1709_v50 }
 0x3ab   :  { %v4266_v56 = vpop.eup %4265  ;;  %4275 = vpow2.f32 %v1711_v52  ;;  %v1667_v20 = vrot.slane %v1666_v23, 1  ;;  %v1751_v44 = vrot.slane %v1750_v59, 1 }
 0x3ac   :  { %v5298_v41 = vpop.eup %4267  ;;  %v1757_v39 = vadd.f32 %v1756_v28, %v1755_v29  ;;  %v1799_v60 = vmul.f32 %v4266_v56, %v5235_v58  ;;  %v1800_v26 = vmul.f32 %v4266_v56, %v5244_v2 }
 0x3ad   :  { %v5302_v9 = vpop.eup %4269  ;;  %v1762_v62 = vsel %vm1596_vm0, %v5298_v41, 0.0  ;;  %v1668_v63 = vmax.f32 %v1666_v23, %v1667_v20  ;;  %v1752_v53 = vadd.f32 %v1751_v44, %v1750_v59  ;;  %v4041_v20 = vld [vmem:[%s6407_s7 + $0x20] ss:$8 sps:$4 sm:$0xff]  }
 0x3ae   :  { %v1763_v18 = vsel %vm1596_vm0, %v5302_v9, 0.0  ;;  %1921 = vperm.xlu1 %3938, %v1799_v60   ;;  %v1758_v61 = vrot.slane %v1757_v39, 2 }
 0x3af   :  { %v1764_v14 = vadd.f32 %v1763_v18, %v1762_v62  ;;  %v1683_v42 = vsub.f32 %v5270_v47, %v1668_v63  ;;  %v1684_v35 = vsub.f32 %v5268_v3, %v1668_v63  ;;  %4277 = vrcp.f32 %v1752_v53  ;;  %v4049_v18 = vld [vmem:[%s6407_s7 + $0x44] ss:$8 sps:$4 sm:$0xff]  }
 0x3b0   :  { %v4272_v58 = vpop.eup %4271  ;;  %v1759_v2 = vadd.f32 %v1758_v61, %v1757_v39  ;;  %v4047_v61 = vld [vmem:[%s6407_s7 + $0x40] ss:$8 sps:$4 sm:$0xff]  }
 0x3b1   :  { %v1765_v43 = vrot.slane %v1764_v14, 4  ;;  %v1713_v51 = vmul.f32 1.442695, %v1683_v42  ;;  %v1715_v22 = vmul.f32 1.442695, %v1684_v35  ;;  %v1801_v8 = vmul.f32 %v4272_v58, %v5250_v55 }
 0x3b2   :  { %1926 = vperm.xlu1 %3938, %v1800_v26   ;;  %v1802_v24 = vmul.f32 %v4272_v58, %v5254_v36  ;;  %v1760_v31 = vrot.slane %v1759_v2, 1  ;;  %v4037_v36 = vld [vmem:[%s6407_s7 + $0x4] ss:$8 sps:$4 sm:$0xff]   ;;  %v4046_v26 = vld [vmem:[%s6407_s7 + $0x34] ss:$8 sps:$4 sm:$0xff]  }
 0x3b3   :  { %v1766_v34 = vadd.f32 %v1765_v43, %v1764_v14  ;;  %4279 = vpow2.f32 %v1713_v51  ;;  %3262 = vmatprep.subr.bf16.mxu0 %v4037_v36  ;;  %v4052_v14 = vld [vmem:[%s6407_s7 + $0x54] ss:$8 sps:$4 sm:$0xff]   ;;  %v4050_v42 = vld [vmem:[%s6407_s7 + $0x50] ss:$8 sps:$4 sm:$0xff]   ;;  %v4055_v35 = vld [vmem:[%s6407_s7 + $0x64] ss:$8 sps:$4 sm:$0xff]  }
 0x3b4   :  { %v5312_v4 = vpop.eup %4273  ;;  %4281 = vpow2.f32 %v1715_v22  ;;  %v1761_v47 = vadd.f32 %v1760_v31, %v1759_v2  ;;  %3263 = vmatpush1.bf16.msra.mxu0 %v4035_v57  ;;  %v4053_v58 = vld [vmem:[%s6407_s7 + $0x60] ss:$8 sps:$4 sm:$0xff]   ;;  %v4058_v2 = vld [vmem:[%s6407_s7 + $0x74] ss:$8 sps:$4 sm:$0xff]   ;;  %v4056_v43 = vld [vmem:[%s6407_s7 + $0x70] ss:$8 sps:$4 sm:$0xff]  }
 0x3b5   :  { %v4276_v27 = vpop.eup %4275  ;;  %v1771_v3 = vsel %vm1596_vm0, %v5312_v4, 0.0  ;;  %v1767_v6 = vrot.slane %v1766_v34, 2  ;;  %3264 = vmatprep.subr.bf16.mxu0 %v4040_v32  ;;  %v4061_v51 = vld [vmem:[%s6407_s7 + $0x84] ss:$8 sps:$4 sm:$0xff]   ;;  %v4059_v22 = vld [vmem:[%s6407_s7 + $0x80] ss:$8 sps:$4 sm:$0xff]  }
 0x3b6   :  { %v1772_v46 = vsel %vm1596_vm0, %v4276_v27, 0.0  ;;  %1931 = vperm.xlu1 %3938, %v1801_v8   ;;  %4283 = vrcp.f32 %v1761_v47  ;;  %v4064_v8 = vld [vmem:[%s6407_s7 + $0x94] ss:$8 sps:$4 sm:$0xff]   ;;  %v4067_v31 = vld [vmem:[%s6407_s7 + $0xa4] ss:$8 sps:$4 sm:$0xff]  }
 0x3b7   :  { %v1773_v55 = vadd.f32 %v1772_v46, %v1771_v3  ;;  %v1768_v10 = vadd.f32 %v1767_v6, %v1766_v34  ;;  %v4065_v34 = vld [vmem:[%s6407_s7 + $0xa0] ss:$8 sps:$4 sm:$0xff]   ;;  %v4068_v47 = vld [vmem:[%s6407_s7 + $0xb0] ss:$8 sps:$4 sm:$0xff]  }
 0x3b8   :  { %v5404_v3 = vld [vmem:[%s6400_s0] sm:$0xff]  ;;  %v5649_v32 = vld [vmem:[%s6400_s0 + $0xd0] sm:$0xff] }
 0x3b9   :  { %v4278_v38 = vpop.eup %4277  ;;  %v1774_v19 = vrot.slane %v1773_v55, 4  ;;  %v1769_v7 = vrot.slane %v1768_v10, 1  ;;  %v1813_v6 = vunpack.c.l.bf16 %v5404_v3  ;;  %v4071_v46 = vld [vmem:[%s6407_s7 + $0xc0] ss:$8 sps:$4 sm:$0xff]  }
 0x3ba   :  { %1936 = vperm.xlu1 %3938, %v1802_v24   ;;  %v1803_v16 = vmul.f32 %v4278_v38, %v5272_v45  ;;  %v1804_v5 = vmul.f32 %v4278_v38, %v5276_v15  ;;  %v4038_v15 = vld [vmem:[%s6407_s7 + $0x10] ss:$8 sps:$4 sm:$0xff]   ;;  %v5736_v57 = vld [vmem:[%s6400_s0 + $0x160] sm:$0xff] }
 0x3bb   :  { %v1775_v1 = vadd.f32 %v1774_v19, %v1773_v55  ;;  %v1770_v30 = vadd.f32 %v1769_v7, %v1768_v10  ;;  %3265 = vmatpush1.bf16.msra.mxu0 %v4038_v15  ;;  %v4062_v24 = vld [vmem:[%s6407_s7 + $0x90] ss:$8 sps:$4 sm:$0xff]   ;;  %v1814_v55 = vunpack.c.h.bf16 %v5404_v3  ;;  %v4076_v15 = vld [vmem:[%s6407_s7 + $0xd4] ss:$8 sps:$4 sm:$0xff]   ;;  %6445 = vst [vmem:[#allocation14_spill] sm:$0xff] %v5736_v57  ;;  %v5767_v3 = vld [vmem:[%s6400_s0 + $0x168] sm:$0xff] }
 0x3bc   :  { %v5414_v10 = vld [vmem:[%s6400_s0 + $0x18] sm:$0xff]  ;;  %v5421_v19 = vld [vmem:[%s6400_s0 + $0x30] sm:$0xff]  ;;  %6448 = vst [vmem:[#allocation15_spill] sm:$0xff] %v5767_v3 }
 0x3bd   :  { %v4280_v17 = vpop.eup %4279  ;;  %4285 = vrcp.f32 %v1770_v30  ;;  %v1776_v25 = vrot.slane %v1775_v1, 2  ;;  %v1819_v36 = vunpack.c.l.bf16 %v5414_v10  ;;  %v1820_v38 = vunpack.c.h.bf16 %v5414_v10  ;;  %v5435_v30 = vld [vmem:[%s6400_s0 + $0x60] sm:$0xff] }
 0x3be   :  { %v4282_v54 = vpop.eup %4281  ;;  %v1780_v11 = vsel %vm1596_vm0, %v4280_v17, 0.0  ;;  %1941 = vperm.xlu1 %3938, %v1803_v16   ;;  %v5428_v16 = vld [vmem:[%s6400_s0 + $0x48] sm:$0xff]  ;;  %v6451_v3 = vunpack.c.l.bf16 %v5421_v19 }
 0x3bf   :  { %v1781_v12 = vsel %vm1596_vm0, %v4282_v54, 0.0  ;;  %v1777_v45 = vadd.f32 %v1776_v25, %v1775_v1  ;;  %v5659_v25 = vld [vmem:[%s6400_s0 + $0xe8] sm:$0xff] }
 0x3c0   :  { %v4284_v13 = vpop.eup %4283  ;;  %v1782_v49 = vadd.f32 %v1781_v12, %v1780_v11  ;;  %v5449_v12 = vld [vmem:[%s6400_s0 + $0x90] sm:$0xff]  ;;  %v5680_v11 = vld [vmem:[%s6400_s0 + $0x100] sm:$0xff] }
 0x3c1   :  { %v1806_v33 = vmul.f32 %v4284_v13, %v5290_v48  ;;  %v1805_v0 = vmul.f32 %v4284_v13, %v5288_v40  ;;  %v1778_v37 = vrot.slane %v1777_v45, 1  ;;  %v4043_v40 = vld [vmem:[%s6407_s7 + $0x24] ss:$8 sps:$4 sm:$0xff]  }
 0x3c2   :  { %v1783_v21 = vrot.slane %v1782_v49, 4  ;;  %1946 = vperm.xlu1 %3938, %v1804_v5   ;;  %3266 = vmatprep.subr.bf16.mxu0 %v4043_v40  ;;  %v5490_v40 = vld [vmem:[%s6400_s0 + $0x108] sm:$0xff]  ;;  %v5621_v13 = vld [vmem:[%s6400_s0 + $0xa0] sm:$0xff] }
 0x3c3   :  { %1956 = vperm.xlu0 %3937, %v1806_v33   ;;  %v1779_v29 = vadd.f32 %v1778_v37, %v1777_v45  ;;  %3267 = vmatpush1.bf16.msra.mxu0 %v4041_v20  ;;  %v5466_v37 = vld [vmem:[%s6400_s0 + $0xc0] sm:$0xff]  ;;  %v5579_v20 = vld [vmem:[%s6400_s0 + $0x68] sm:$0xff]  ;;  %v5607_v45 = vld [vmem:[%s6400_s0 + $0x98] sm:$0xff] }
 0x3c4   :  { %v1784_v50 = vadd.f32 %v1783_v21, %v1782_v49  ;;  %3268 = vmatprep.subr.bf16.mxu0 %v4046_v26  ;;  %v5459_v49 = vld [vmem:[%s6400_s0 + $0xa8] sm:$0xff]  ;;  %v5504_v26 = vld [vmem:[%s6400_s0 + $0x138] sm:$0xff] }
 0x3c5   :  { %4287 = vrcp.f32 %v1779_v29  ;;  %v4074_v29 = vld [vmem:[%s6407_s7 + $0xd0] ss:$8 sps:$4 sm:$0xff]   ;;  %6437 = vst [vmem:[#allocation6_spill] sm:$0xff] %v5504_v26  ;;  %v5635_v33 = vld [vmem:[%s6400_s0 + $0xc8] sm:$0xff] }
 0x3c6   :  { %1951 = vperm.xlu1 %3938, %v1805_v0   ;;  %v1785_v52 = vrot.slane %v1784_v50, 2  ;;  %v5600_v0 = vld [vmem:[%s6400_s0 + $0x88] sm:$0xff]  ;;  %v5628_v21 = vld [vmem:[%s6400_s0 + $0xb8] sm:$0xff] }
 0x3c7   :  { %v4286_v23 = vpop.eup %4285 }
 0x3c8   :  { %v1808_v59 = vmul.f32 %v4286_v23, %v5302_v9  ;;  %v1807_v28 = vmul.f32 %v4286_v23, %v5298_v41  ;;  %v1786_v56 = vadd.f32 %v1785_v52, %v1784_v50  ;;  %v4044_v9 = vld [vmem:[%s6407_s7 + $0x30] ss:$8 sps:$4 sm:$0xff]  }
 0x3c9   :  { %3269 = vmatpush1.bf16.msra.mxu0 %v4044_v9  ;;  %v5476_v52 = vld [vmem:[%s6400_s0 + $0xd8] sm:$0xff]  ;;  %v5614_v50 = vld [vmem:[%s6400_s0 + $0xb0] sm:$0xff] }
 0x3ca   :  { %1966 = vperm.xlu0 %3937, %v1808_v59   ;;  %1961 = vperm.xlu1 %3938, %v1807_v28   ;;  %v1787_v48 = vrot.slane %v1786_v56, 1  ;;  %v5483_v28 = vld [vmem:[%s6400_s0 + $0xf0] sm:$0xff] }
 0x3cb   :  { %3270 = vmatprep.subr.bf16.mxu0 %v4049_v18  ;;  %v4079_v18 = vld [vmem:[%s6407_s7 + $0xe4] ss:$8 sps:$4 sm:$0xff]   ;;  %v5593_v59 = vld [vmem:[%s6400_s0 + $0x70] sm:$0xff] }
 0x3cc   :  { %v1788_v44 = vadd.f32 %v1787_v48, %v1786_v56  ;;  %v5586_v56 = vld [vmem:[%s6400_s0 + $0x80] sm:$0xff]  ;;  %v5673_v23 = vld [vmem:[%s6400_s0 + $0x110] sm:$0xff] }
 0x3cd   :  { %3271 = vmatpush1.bf16.msra.mxu0 %v4047_v61  ;;  %v5642_v48 = vld [vmem:[%s6400_s0 + $0xe0] sm:$0xff] }
 0x3ce   :  { %4289 = vrcp.f32 %v1788_v44  ;;  %3272 = vmatprep.subr.bf16.mxu0 %v4052_v14  ;;  %v5521_v14 = vld [vmem:[%s6400_s0 + $0x20] sm:$0xff]  ;;  %v5687_v44 = vld [vmem:[%s6400_s0 + $0x118] sm:$0xff] }
 0x3cf   :  { %v4288_v39 = vpop.eup %4287  ;;  %6438 = vst [vmem:[#allocation7_spill] sm:$0xff] %v5687_v44 }
 0x3d0   :  { %v1810_v60 = vmul.f32 %v4288_v39, %v4276_v27  ;;  %v1809_v41 = vmul.f32 %v4288_v39, %v5312_v4  ;;  %v4070_v4 = vld [vmem:[%s6407_s7 + $0xb4] ss:$8 sps:$4 sm:$0xff]   ;;  %v4073_v27 = vld [vmem:[%s6407_s7 + $0xc4] ss:$8 sps:$4 sm:$0xff]  }
 0x3d1   :  { %3273 = vmatpush1.bf16.msra.mxu0 %v4050_v42  ;;  %v5497_v39 = vld [vmem:[%s6400_s0 + $0x120] sm:$0xff]  ;;  %v1821_v42 = vunpack.c.l.bf16 %v5521_v14 }
 0x3d2   :  { %1976 = vperm.xlu0 %3937, %v1810_v60   ;;  %1971 = vperm.xlu1 %3938, %v1809_v41   ;;  %6436 = vst [vmem:[#allocation5_spill] sm:$0xff] %v5497_v39  ;;  %v5572_v41 = vld [vmem:[%s6400_s0 + $0x58] sm:$0xff]  ;;  %v5708_v60 = vld [vmem:[%s6400_s0 + $0x130] sm:$0xff] }
 0x3d3   :  { %3274 = vmatprep.subr.bf16.mxu0 %v4055_v35  ;;  %v1822_v35 = vunpack.c.h.bf16 %v5521_v14  ;;  %6441 = vst [vmem:[#allocation10_spill] sm:$0xff] %v5708_v60 }
 0x3d5   :  { %3275 = vmatpush1.bf16.msra.mxu0 %v4053_v58  ;;  %v5528_v58 = vld [vmem:[%s6400_s0 + $0x10] sm:$0xff] }
 0x3d6   :  { %3276 = vmatprep.subr.bf16.mxu0 %v4058_v2  ;;  %v6446_v14 = vunpack.c.l.bf16 %v5528_v58 }
 0x3d8   :  { %v4290_v62 = vpop.eup %4289 }
 0x3d9   :  { %v1812_v63 = vmul.f32 %v4290_v62, %v4282_v54  ;;  %v1811_v53 = vmul.f32 %v4290_v62, %v4280_v17  ;;  %3277 = vmatpush1.bf16.msra.mxu0 %v4056_v43  ;;  %v5442_v54 = vld [vmem:[%s6400_s0 + $0x78] sm:$0xff]  ;;  %v4077_v43 = vld [vmem:[%s6407_s7 + $0xe0] ss:$8 sps:$4 sm:$0xff]  }
 0x3da   :  { %3278 = vmatprep.subr.bf16.mxu0 %v4061_v51  ;;  %v4082_v51 = vld [vmem:[%s6407_s7 + $0xf4] ss:$8 sps:$4 sm:$0xff]  }
 0x3db   :  { %1986 = vperm.xlu0 %3937, %v1812_v63   ;;  %1981 = vperm.xlu1 %3938, %v1811_v53   ;;  %v5511_v63 = vld [vmem:[%s6400_s0 + $0x8] sm:$0xff]  ;;  %v5666_v17 = vld [vmem:[%s6400_s0 + $0xf8] sm:$0xff] }
 0x3dc   :  { %v1815_v53 = vunpack.c.l.bf16 %v5511_v63  ;;  %v1816_v61 = vunpack.c.h.bf16 %v5511_v63 }
 0x3dd   :  { %3279 = vmatpush1.bf16.msra.mxu0 %v4059_v22 }
 0x3de   :  { %3280 = vmatprep.subr.bf16.mxu0 %v4064_v8  ;;  %v5541_v8 = vld [vmem:[%s6400_s0 + $0x28] sm:$0xff] }
 0x3e1   :  { %3281 = vmatpush1.bf16.msra.mxu0 %v4062_v24  ;;  %v1823_v24 = vunpack.c.l.bf16 %v5541_v8 }
 0x3e2   :  { %3282 = vmatprep.subr.bf16.mxu0 %v4067_v31  ;;  %v1824_v31 = vunpack.c.h.bf16 %v5541_v8 }
 0x3e5   :  { %3283 = vmatpush1.bf16.msra.mxu0 %v4065_v34  ;;  %v5548_v34 = vld [vmem:[%s6400_s0 + $0x38] sm:$0xff] }
 0x3e6   :  { %3284 = vmatprep.subr.bf16.mxu0 %v4070_v4  ;;  %v5729_v4 = vld [vmem:[%s6400_s0 + $0x158] sm:$0xff] }
 0x3e7   :  { %6444 = vst [vmem:[#allocation13_spill] sm:$0xff] %v5729_v4 }
 0x3e9   :  { %3285 = vmatpush1.bf16.msra.mxu0 %v4068_v47 }
 0x3ea   :  { %3286 = vmatprep.subr.bf16.mxu0 %v4073_v27  ;;  %v5555_v27 = vld [vmem:[%s6400_s0 + $0x50] sm:$0xff] }
 0x3eb   :  { %v6459_v60 = vunpack.c.h.bf16 %v5555_v27 }
 0x3ed   :  { %3287 = vmatpush1.bf16.msra.mxu0 %v4071_v46 }
 0x3ee   :  { %3288 = vmatprep.subr.bf16.mxu0 %v4076_v15  ;;  %v5722_v15 = vld [vmem:[%s6400_s0 + $0x150] sm:$0xff] }
 0x3ef   :  { %6443 = vst [vmem:[#allocation12_spill] sm:$0xff] %v5722_v15 }
 0x3f1   :  { %3289 = vmatpush1.bf16.msra.mxu0 %v4074_v29  ;;  %v5562_v29 = vld [vmem:[%s6400_s0 + $0x40] sm:$0xff] }
 0x3f2   :  { %3290 = vmatprep.subr.bf16.mxu0 %v4079_v18  ;;  %v4080_v18 = vld [vmem:[%s6407_s7 + $0xf0] ss:$8 sps:$4 sm:$0xff]  }
 0x3f5   :  { %3291 = vmatpush1.bf16.msra.mxu0 %v4077_v43  ;;  %v5701_v43 = vld [vmem:[%s6400_s0 + $0x140] sm:$0xff] }
 0x3f6   :  { %3292 = vmatprep.subr.bf16.mxu0 %v4082_v51  ;;  %v5694_v51 = vld [vmem:[%s6400_s0 + $0x128] sm:$0xff]  ;;  %6440 = vst [vmem:[#allocation9_spill] sm:$0xff] %v5701_v43  ;;  %v6455_v43 = vunpack.c.h.bf16 %v5562_v29 }
 0x3f7   :  { %6439 = vst [vmem:[#allocation8_spill] sm:$0xff] %v5694_v51 }
 0x3f9   :  { %3293 = vmatpush1.bf16.msra.mxu0 %v4080_v18  ;;  %v4085_v18 = vld [vmem:[%s6407_s7 + $0x104] ss:$8 sps:$4 sm:$0xff]  }
 0x3fa   :  { %3303 = vmatprep.subr.bf16.mxu0 %v4085_v18  ;;  %v5715_v18 = vld [vmem:[%s6400_s0 + $0x148] sm:$0xff] }
 0x3fb   :  { %6442 = vst [vmem:[#allocation11_spill] sm:$0xff] %v5715_v18 }
 0x424   :  { %v1917_v62 = vpop.permute.xlu1 %1916  ;;  %v1912_v1 = vpop.permute.xlu0 %1911 }
 0x425   :  { %v1995_v7 = vmul.f32 %v1917_v62, %v1819_v36  ;;  %v1996_v46 = vmul.f32 %v1917_v62, %v1820_v38  ;;  %v1997_v22 = vmul.f32 %v1917_v62, %v1821_v42  ;;  %v1998_v5 = vmul.f32 %v1917_v62, %v1822_v35 }
 0x426   :  { %v1999_v47 = vmul.f32 %v1917_v62, %v1823_v24  ;;  %v2000_v2 = vmul.f32 %v1917_v62, %v1824_v31  ;;  %v1989_v9 = vmul.f32 %v1912_v1, %v1813_v6  ;;  %v1990_v36 = vmul.f32 %v1912_v1, %v1814_v55 }
 0x427   :  { %v1991_v10 = vmul.f32 %v1912_v1, %v1815_v53  ;;  %v1992_v38 = vmul.f32 %v1912_v1, %v1816_v61  ;;  %v1993_v42 = vmul.f32 %v1912_v1, %v6446_v14  ;;  %v6447_v35 = vunpack.c.h.bf16 %v5528_v58 }
 0x428   :  { %v2085_v8 = vadd.f32 %v1995_v7, %v1989_v9  ;;  %v2092_v62 = vadd.f32 %v1996_v46, %v1990_v36  ;;  %v5774_v7 = vld [vmem:[%s6400_s0 + $0x170] sm:$0xff] }
 0x429   :  { %v1994_v24 = vmul.f32 %v1912_v1, %v6447_v35  ;;  %v2099_v55 = vadd.f32 %v1997_v22, %v1991_v10  ;;  %v2106_v63 = vadd.f32 %v1998_v5, %v1992_v38  ;;  %v2113_v53 = vadd.f32 %v1999_v47, %v1993_v42  ;;  %6449 = vst [vmem:[#allocation16_spill] sm:$0xff] %v5774_v7 }
 0x42a   :  { %v2086_v4 = vrot.slane %v2085_v8, 4  ;;  %v2093_v14 = vrot.slane %v2092_v62, 4  ;;  %v6452_v47 = vunpack.c.h.bf16 %v5421_v19 }
 0x42b   :  { %v2120_v61 = vadd.f32 %v2000_v2, %v1994_v24  ;;  %v2100_v9 = vrot.slane %v2099_v55, 4  ;;  %v2107_v46 = vrot.slane %v2106_v63, 4  ;;  %v2114_v36 = vrot.slane %v2113_v53, 4  ;;  %v5781_v2 = vld [vmem:[%s6400_s0 + $0x178] sm:$0xff] }
 0x42c   :  { %v2087_v6 = vadd.f32 %v2086_v4, %v2085_v8  ;;  %v2094_v22 = vadd.f32 %v2093_v14, %v2092_v62  ;;  %6450 = vst [vmem:[#allocation17_spill] sm:$0xff] %v5781_v2  ;;  %v6454_v8 = vunpack.c.l.bf16 %v5562_v29  ;;  %v6458_v29 = vunpack.c.l.bf16 %v5555_v27 }
 0x42d   :  { %v2121_v35 = vrot.slane %v2120_v61, 4  ;;  %v2101_v10 = vadd.f32 %v2100_v9, %v2099_v55  ;;  %v2108_v38 = vadd.f32 %v2107_v46, %v2106_v63  ;;  %v2115_v42 = vadd.f32 %v2114_v36, %v2113_v53  ;;  %v1922_v1 = vpop.permute.xlu1 %1921 }
 0x42e   :  { %v2088_v58 = vrot.slane %v2087_v6, 2  ;;  %v2095_v31 = vrot.slane %v2094_v22, 2  ;;  %v2001_v4 = vmul.f32 %v1922_v1, %v6451_v3  ;;  %v2002_v55 = vmul.f32 %v1922_v1, %v6452_v47 }
 0x42f   :  { %v2122_v24 = vadd.f32 %v2121_v35, %v2120_v61  ;;  %v2102_v62 = vrot.slane %v2101_v10, 2  ;;  %v2109_v14 = vrot.slane %v2108_v38, 2  ;;  %v2116_v5 = vrot.slane %v2115_v42, 2 }
 0x430   :  { %v2089_v57 = vadd.f32 %v2088_v58, %v2087_v6  ;;  %v2096_v15 = vadd.f32 %v2095_v31, %v2094_v22  ;;  %v6453_v63 = vunpack.c.l.bf16 %v5548_v34  ;;  %v2005_v2 = vmul.f32 %v1922_v1, %v6454_v8 }
 0x431   :  { %v2123_v7 = vrot.slane %v2122_v24, 2  ;;  %v2103_v61 = vadd.f32 %v2102_v62, %v2101_v10  ;;  %v2110_v9 = vadd.f32 %v2109_v14, %v2108_v38  ;;  %v2117_v46 = vadd.f32 %v2116_v5, %v2115_v42  ;;  %v1927_v35 = vpop.permute.xlu1 %1926 }
 0x432   :  { %v2003_v53 = vmul.f32 %v1922_v1, %v6453_v63  ;;  %v2090_v3 = vrot.slane %v2089_v57, 1  ;;  %v2097_v18 = vrot.slane %v2096_v15, 1  ;;  %v2006_v6 = vmul.f32 %v1922_v1, %v6455_v43 }
 0x433   :  { %v2124_v36 = vadd.f32 %v2123_v7, %v2122_v24  ;;  %v2104_v31 = vrot.slane %v2103_v61, 1  ;;  %v2111_v58 = vrot.slane %v2110_v9, 1  ;;  %v2118_v19 = vrot.slane %v2117_v46, 1 }
 0x434   :  { %v2091_v47 = vadd.f32 %v2090_v3, %v2089_v57  ;;  %v2098_v26 = vadd.f32 %v2097_v18, %v2096_v15  ;;  %v6456_v10 = vunpack.c.l.bf16 %v5428_v16  ;;  %v6457_v7 = vunpack.c.h.bf16 %v5428_v16 }
 0x435   :  { %v2125_v22 = vrot.slane %v2124_v36, 1  ;;  %v2105_v42 = vadd.f32 %v2104_v31, %v2103_v61  ;;  %v2112_v24 = vadd.f32 %v2111_v58, %v2110_v9  ;;  %v2119_v62 = vadd.f32 %v2118_v19, %v2117_v46  ;;  %v5811_v31 = vpop.permute.xlu1 %1931 }
 0x436   :  { %v2007_v38 = vmul.f32 %v1927_v35, %v6456_v10  ;;  %v2008_v5 = vmul.f32 %v1927_v35, %v6457_v7  ;;  %v2469_v8 = vpack.c.bf16 %v2091_v47, %v2091_v47  ;;  %v2470_v63 = vpack.c.bf16 %v2098_v26, %v2098_v26 }
 0x437   :  { %v2126_v14 = vadd.f32 %v2125_v22, %v2124_v36  ;;  %v2009_v43 = vmul.f32 %v1927_v35, %v6458_v29  ;;  %v2010_v51 = vmul.f32 %v1927_v35, %v6459_v60  ;;  %v2471_v57 = vpack.c.bf16 %v2105_v42, %v2105_v42 }
 0x438   :  { %v2472_v15 = vpack.c.bf16 %v2112_v24, %v2112_v24  ;;  %v2473_v18 = vpack.c.bf16 %v2119_v62, %v2119_v62  ;;  %v5803_v10 = vunpack.c.l.b16 %v2469_v8  ;;  %v6460_v16 = vunpack.c.h.bf16 %v5548_v34 }
 0x439   :  { %v2474_v3 = vpack.c.bf16 %v2126_v14, %v2126_v14  ;;  %v6461_v9 = vunpack.c.l.bf16 %v5572_v41  ;;  %v6462_v26 = vunpack.c.h.bf16 %v5572_v41  ;;  %v5813_v58 = vunpack.c.l.b16 %v2470_v63 }
 0x43a   :  { %v2004_v61 = vmul.f32 %v1922_v1, %v6460_v16  ;;  %v5815_v60 = vunpack.c.l.b16 %v2471_v57  ;;  %v5817_v27 = vunpack.c.l.b16 %v2472_v15  ;;  %v5819_v19 = vunpack.c.l.b16 %v2473_v18 }
 0x43b   :  { %v2011_v46 = vmul.f32 %v1927_v35, %v6461_v9  ;;  %v2012_v36 = vmul.f32 %v1927_v35, %v6462_v26  ;;  %6463 = vst [vmem:[#allocation18_spill] sm:$0xff] %v5813_v58  ;;  %v2127_v22 = vadd.f32 %v2007_v38, %v2001_v4  ;;  %v2134_v47 = vadd.f32 %v2008_v5, %v2002_v55  ;;  %v1937_v5 = vpop.permute.xlu1 %1936 }
 0x43c   :  { %6464 = vst [vmem:[#allocation19_spill] sm:$0xff] %v5815_v60  ;;  %6465 = vst [vmem:[#allocation20_spill] sm:$0xff] %v5817_v27  ;;  %v2141_v34 = vadd.f32 %v2009_v43, %v2003_v53  ;;  %v2148_v1 = vadd.f32 %v2010_v51, %v2004_v61  ;;  %v5821_v7 = vunpack.c.l.b16 %v2474_v3  ;;  %v6468_v41 = vunpack.c.l.bf16 %v5435_v30 }
 0x43d   :  { %6466 = vst [vmem:[#allocation21_spill] sm:$0xff] %v5819_v19  ;;  %v2155_v42 = vadd.f32 %v2011_v46, %v2005_v2  ;;  %v2162_v24 = vadd.f32 %v2012_v36, %v2006_v6  ;;  %v2128_v62 = vrot.slane %v2127_v22, 4  ;;  %v2135_v14 = vrot.slane %v2134_v47, 4 }
 0x43e   :  { %6467 = vst [vmem:[#allocation22_spill] sm:$0xff] %v5821_v7  ;;  %v2013_v35 = vmul.f32 %v5811_v31, %v6468_v41  ;;  %v2142_v8 = vrot.slane %v2141_v34, 4  ;;  %v2149_v63 = vrot.slane %v2148_v1, 4  ;;  %v6469_v15 = vunpack.c.h.bf16 %v5435_v30 }
 0x43f   :  { %v2156_v29 = vrot.slane %v2155_v42, 4  ;;  %v2163_v57 = vrot.slane %v2162_v24, 4  ;;  %v6470_v51 = vunpack.c.l.bf16 %v5579_v20  ;;  %v2129_v2 = vadd.f32 %v2128_v62, %v2127_v22 }
 0x440   :  { %v2014_v4 = vmul.f32 %v5811_v31, %v6469_v15  ;;  %v2136_v53 = vadd.f32 %v2135_v14, %v2134_v47  ;;  %v2143_v6 = vadd.f32 %v2142_v8, %v2141_v34  ;;  %v2150_v38 = vadd.f32 %v2149_v63, %v2148_v1 }
 0x441   :  { %v2015_v55 = vmul.f32 %v5811_v31, %v6470_v51  ;;  %v2157_v43 = vadd.f32 %v2156_v29, %v2155_v42  ;;  %v2164_v18 = vadd.f32 %v2163_v57, %v2162_v24  ;;  %v6471_v3 = vunpack.c.l.bf16 %v5593_v59 }
 0x442   :  { %v6472_v61 = vunpack.c.h.bf16 %v5593_v59  ;;  %v2130_v9 = vrot.slane %v2129_v2, 2  ;;  %v2137_v46 = vrot.slane %v2136_v53, 2  ;;  %v2144_v26 = vrot.slane %v2143_v6, 2 }
 0x443   :  { %v2017_v16 = vmul.f32 %v5811_v31, %v6471_v3  ;;  %v2151_v36 = vrot.slane %v2150_v38, 2  ;;  %v2158_v22 = vrot.slane %v2157_v43, 2  ;;  %v2165_v47 = vrot.slane %v2164_v18, 2 }
 0x444   :  { %v2018_v30 = vmul.f32 %v5811_v31, %v6472_v61  ;;  %v6473_v34 = vunpack.c.l.bf16 %v5442_v54  ;;  %v6474_v42 = vunpack.c.h.bf16 %v5442_v54  ;;  %v2131_v41 = vadd.f32 %v2130_v9, %v2129_v2 }
 0x445   :  { %v2138_v62 = vadd.f32 %v2137_v46, %v2136_v53  ;;  %v2145_v14 = vadd.f32 %v2144_v26, %v2143_v6  ;;  %v2152_v8 = vadd.f32 %v2151_v36, %v2150_v38  ;;  %v2159_v59 = vadd.f32 %v2158_v22, %v2157_v43 }
 0x446   :  { %v2019_v1 = vmul.f32 %v1937_v5, %v6473_v34  ;;  %v2020_v24 = vmul.f32 %v1937_v5, %v6474_v42  ;;  %v2166_v63 = vadd.f32 %v2165_v47, %v2164_v18  ;;  %v6475_v29 = vunpack.c.l.bf16 %v5586_v56 }
 0x447   :  { %v6476_v15 = vunpack.c.h.bf16 %v5586_v56  ;;  %v2132_v3 = vrot.slane %v2131_v41, 1  ;;  %v2139_v61 = vrot.slane %v2138_v62, 1  ;;  %v2146_v19 = vrot.slane %v2145_v14, 1 }
 0x448   :  { %v2021_v57 = vmul.f32 %v1937_v5, %v6475_v29  ;;  %v2153_v7 = vrot.slane %v2152_v8, 1  ;;  %v2160_v34 = vrot.slane %v2159_v59, 1  ;;  %v2167_v60 = vrot.slane %v2166_v63, 1 }
 0x449   :  { %v2022_v51 = vmul.f32 %v1937_v5, %v6476_v15  ;;  %v6477_v54 = vunpack.c.l.bf16 %v5600_v0  ;;  %v6478_v53 = vunpack.c.h.bf16 %v5600_v0  ;;  %v2133_v38 = vadd.f32 %v2132_v3, %v2131_v41 }
 0x44a   :  { %v2140_v43 = vadd.f32 %v2139_v61, %v2138_v62  ;;  %v2147_v18 = vadd.f32 %v2146_v19, %v2145_v14  ;;  %v2154_v9 = vadd.f32 %v2153_v7, %v2152_v8  ;;  %v2161_v46 = vadd.f32 %v2160_v34, %v2159_v59 }
 0x44b   :  { %v2023_v2 = vmul.f32 %v1937_v5, %v6477_v54  ;;  %v2024_v6 = vmul.f32 %v1937_v5, %v6478_v53  ;;  %v2168_v26 = vadd.f32 %v2167_v60, %v2166_v63  ;;  %v2169_v56 = vadd.f32 %v2019_v1, %v2013_v35  ;;  %v1942_v1 = vpop.permute.xlu1 %1941 }
 0x44c   :  { %v2176_v36 = vadd.f32 %v2020_v24, %v2014_v4  ;;  %v2475_v22 = vpack.c.bf16 %v2133_v38, %v2133_v38  ;;  %v2476_v47 = vpack.c.bf16 %v2140_v43, %v2140_v43  ;;  %v2477_v42 = vpack.c.bf16 %v2147_v18, %v2147_v18 }
 0x44d   :  { %v2478_v29 = vpack.c.bf16 %v2154_v9, %v2154_v9  ;;  %v2479_v15 = vpack.c.bf16 %v2161_v46, %v2161_v46  ;;  %v2480_v27 = vpack.c.bf16 %v2168_v26, %v2168_v26  ;;  %v2170_v58 = vrot.slane %v2169_v56, 4 }
 0x44e   :  { %v2177_v39 = vrot.slane %v2176_v36, 4  ;;  %v2679_v54 = vunpack.c.l.b16 %v2475_v22  ;;  %v5850_v44 = vunpack.c.l.b16 %v2476_v47  ;;  %v5852_v0 = vunpack.c.l.b16 %v2477_v42 }
 0x44f   :  { %v6479_v19 = vunpack.c.h.bf16 %v5579_v20  ;;  %v5857_v60 = vunpack.c.l.b16 %v2478_v29  ;;  %v5859_v35 = vunpack.c.l.b16 %v2479_v15  ;;  %v2171_v4 = vadd.f32 %v2170_v58, %v2169_v56  ;;  %v1947_v46 = vpop.permute.xlu1 %1946 }
 0x450   :  { %v2178_v5 = vadd.f32 %v2177_v39, %v2176_v36  ;;  %v5863_v24 = vsel %vm2721_vm1, %v2679_v54, %v5803_v10  ;;  %v2183_v41 = vadd.f32 %v2021_v57, %v2015_v55  ;;  %v2197_v14 = vadd.f32 %v2023_v2, %v2017_v16 }
 0x451   :  { %v2016_v7 = vmul.f32 %v5811_v31, %v6479_v19  ;;  %v5865_v8 = vunpack.c.l.b16 %v2480_v27  ;;  %v2172_v59 = vrot.slane %v2171_v4, 2  ;;  %v2204_v63 = vadd.f32 %v2024_v6, %v2018_v30 }
 0x452   :  { %v2179_v20 = vrot.slane %v2178_v5, 2  ;;  %v2184_v31 = vrot.slane %v2183_v41, 4  ;;  %v2198_v61 = vrot.slane %v2197_v14, 4  ;;  %v6480_v34 = vunpack.c.l.bf16 %v5449_v12 }
 0x453   :  { %v2190_v62 = vadd.f32 %v2022_v51, %v2016_v7  ;;  %v2173_v39 = vadd.f32 %v2172_v59, %v2171_v4  ;;  %v2205_v38 = vrot.slane %v2204_v63, 4  ;;  %v6481_v10 = vunpack.c.l.bf16 %v5607_v45 }
 0x454   :  { %v2025_v58 = vmul.f32 %v1942_v1, %v6480_v34  ;;  %v2180_v53 = vadd.f32 %v2179_v20, %v2178_v5  ;;  %v2185_v55 = vadd.f32 %v2184_v31, %v2183_v41  ;;  %v2199_v16 = vadd.f32 %v2198_v61, %v2197_v14 }
 0x455   :  { %v2191_v3 = vrot.slane %v2190_v62, 4  ;;  %v2027_v43 = vmul.f32 %v1942_v1, %v6481_v10  ;;  %v6482_v27 = vunpack.c.h.bf16 %v5449_v12  ;;  %v2174_v2 = vrot.slane %v2173_v39, 1 }
 0x456   :  { %v2181_v30 = vrot.slane %v2180_v53, 1  ;;  %v2206_v6 = vadd.f32 %v2205_v38, %v2204_v63  ;;  %v6483_v18 = vunpack.c.l.bf16 %v5621_v13  ;;  %v2186_v26 = vrot.slane %v2185_v55, 2 }
 0x457   :  { %v2192_v57 = vadd.f32 %v2191_v3, %v2190_v62  ;;  %v2026_v51 = vmul.f32 %v1942_v1, %v6482_v27  ;;  %v2200_v36 = vrot.slane %v2199_v16, 2  ;;  %v6484_v22 = vunpack.c.h.bf16 %v5621_v13 }
 0x458   :  { %v2029_v9 = vmul.f32 %v1942_v1, %v6483_v18  ;;  %v2175_v42 = vadd.f32 %v2174_v2, %v2173_v39  ;;  %v5877_v29 = vadd.f32 %v2181_v30, %v2180_v53  ;;  %v2207_v15 = vrot.slane %v2206_v6, 2 }
 0x459   :  { %v2193_v56 = vrot.slane %v2192_v57, 2  ;;  %v2030_v47 = vmul.f32 %v1942_v1, %v6484_v22  ;;  %v6485_v12 = vunpack.c.h.bf16 %v5607_v45  ;;  %v2187_v19 = vadd.f32 %v2186_v26, %v2185_v55 }
 0x45a   :  { %v2201_v4 = vadd.f32 %v2200_v36, %v2199_v16  ;;  %v6486_v5 = vunpack.c.l.bf16 %v5459_v49  ;;  %v2208_v62 = vadd.f32 %v2207_v15, %v2206_v6  ;;  %v2481_v14 = vpack.c.bf16 %v2175_v42, %v2175_v42  ;;  %v1957_v15 = vpop.permute.xlu0 %1956 }
 0x45b   :  { %v2028_v54 = vmul.f32 %v1942_v1, %v6485_v12  ;;  %v2194_v7 = vadd.f32 %v2193_v56, %v2192_v57  ;;  %v6487_v59 = vunpack.c.h.bf16 %v5459_v49  ;;  %v6488_v13 = vunpack.c.l.bf16 %v5614_v50 }
 0x45c   :  { %v2031_v41 = vmul.f32 %v1947_v46, %v6486_v5  ;;  %v2188_v31 = vrot.slane %v2187_v19, 1  ;;  %v2202_v61 = vrot.slane %v2201_v4, 1  ;;  %v6489_v45 = vunpack.c.h.bf16 %v5614_v50 }
 0x45d   :  { %v2032_v20 = vmul.f32 %v1947_v46, %v6487_v59  ;;  %v2033_v63 = vmul.f32 %v1947_v46, %v6488_v13  ;;  %v2195_v3 = vrot.slane %v2194_v7, 1  ;;  %v2209_v34 = vrot.slane %v2208_v62, 1 }
 0x45e   :  { %v2034_v1 = vmul.f32 %v1947_v46, %v6489_v45  ;;  %v6490_v53 = vunpack.c.l.bf16 %v5628_v21  ;;  %v6491_v10 = vunpack.c.h.bf16 %v5628_v21  ;;  %v2189_v55 = vadd.f32 %v2188_v31, %v2187_v19 }
 0x45f   :  { %v5895_v57 = vadd.f32 %v2195_v3, %v2194_v7  ;;  %v2203_v16 = vadd.f32 %v2202_v61, %v2201_v4  ;;  %v2211_v27 = vadd.f32 %v2031_v41, %v2025_v58  ;;  %v5897_v2 = vadd.f32 %v2209_v34, %v2208_v62 }
 0x460   :  { %v2035_v38 = vmul.f32 %v1947_v46, %v6490_v53  ;;  %v2036_v49 = vmul.f32 %v1947_v46, %v6491_v10  ;;  %v2218_v30 = vadd.f32 %v2032_v20, %v2026_v51  ;;  %v2225_v50 = vadd.f32 %v2033_v63, %v2027_v43 }
 0x461   :  { %v2232_v6 = vadd.f32 %v2034_v1, %v2028_v54  ;;  %v2483_v18 = vpack.c.bf16 %v2189_v55, %v2189_v55  ;;  %v2485_v26 = vpack.c.bf16 %v2203_v16, %v2203_v16  ;;  %v5899_v56 = vunpack.c.l.b16 %v2481_v14  ;;  %v1952_v55 = vpop.permute.xlu1 %1951 }
 0x462   :  { %v2212_v36 = vrot.slane %v2211_v27, 4  ;;  %v2219_v21 = vrot.slane %v2218_v30, 4  ;;  %v2226_v46 = vrot.slane %v2225_v50, 4  ;;  %v2239_v43 = vadd.f32 %v2035_v38, %v2029_v9 }
 0x463   :  { %v2233_v42 = vrot.slane %v2232_v6, 4  ;;  %v5905_v12 = vunpack.c.l.b16 %v2483_v18  ;;  %v2246_v4 = vadd.f32 %v2036_v49, %v2030_v47  ;;  %v5907_v5 = vunpack.c.l.b16 %v2485_v26 }
 0x464   :  { %v2213_v51 = vadd.f32 %v2212_v36, %v2211_v27  ;;  %v2220_v54 = vadd.f32 %v2219_v21, %v2218_v30  ;;  %v2227_v19 = vadd.f32 %v2226_v46, %v2225_v50  ;;  %v2240_v62 = vrot.slane %v2239_v43, 4 }
 0x465   :  { %v2234_v7 = vadd.f32 %v2233_v42, %v2232_v6  ;;  %v6492_v14 = vunpack.c.l.bf16 %v5476_v52  ;;  %v2247_v31 = vrot.slane %v2246_v4, 4  ;;  %v6493_v45 = vunpack.c.h.bf16 %v5476_v52 }
 0x466   :  { %v2214_v41 = vrot.slane %v2213_v51, 2  ;;  %v2221_v20 = vrot.slane %v2220_v54, 2  ;;  %v2228_v13 = vrot.slane %v2227_v19, 2  ;;  %v2241_v61 = vadd.f32 %v2240_v62, %v2239_v43 }
 0x467   :  { %v2043_v59 = vmul.f32 %v1957_v15, %v6492_v14  ;;  %v2235_v63 = vrot.slane %v2234_v7, 2  ;;  %v2044_v9 = vmul.f32 %v1957_v15, %v6493_v45  ;;  %v6494_v1 = vunpack.c.l.bf16 %v5642_v48 }
 0x468   :  { %v2215_v3 = vadd.f32 %v2214_v41, %v2213_v51  ;;  %v5915_v47 = vadd.f32 %v2221_v20, %v2220_v54  ;;  %v2229_v53 = vadd.f32 %v2228_v13, %v2227_v19  ;;  %v2248_v38 = vadd.f32 %v2247_v31, %v2246_v4 }
 0x469   :  { %v2045_v34 = vmul.f32 %v1957_v15, %v6494_v1  ;;  %v6495_v10 = vunpack.c.h.bf16 %v5642_v48  ;;  %v2242_v27 = vrot.slane %v2241_v61, 2  ;;  %v6496_v30 = vunpack.c.l.bf16 %v5659_v25 }
 0x46a   :  { %v2216_v16 = vrot.slane %v2215_v3, 1  ;;  %v6497_v6 = vunpack.c.h.bf16 %v5659_v25  ;;  %v2230_v26 = vrot.slane %v2229_v53, 1  ;;  %v5924_v36 = vadd.f32 %v2235_v63, %v2234_v7 }
 0x46b   :  { %v2046_v49 = vmul.f32 %v1957_v15, %v6495_v10  ;;  %v2047_v50 = vmul.f32 %v1957_v15, %v6496_v30  ;;  %v2249_v21 = vrot.slane %v2248_v38, 2  ;;  %v2243_v42 = vadd.f32 %v2242_v27, %v2241_v61 }
 0x46c   :  { %v2048_v52 = vmul.f32 %v1957_v15, %v6497_v6  ;;  %v2217_v46 = vadd.f32 %v2216_v16, %v2215_v3  ;;  %v6498_v48 = vunpack.c.l.bf16 %v5466_v37  ;;  %v6499_v43 = vunpack.c.h.bf16 %v5466_v37  ;;  %v1962_v6 = vpop.permute.xlu1 %1961 }
 0x46d   :  { %v2231_v19 = vadd.f32 %v2230_v26, %v2229_v53  ;;  %v5930_v4 = vadd.f32 %v2249_v21, %v2248_v38  ;;  %v6500_v25 = vunpack.c.l.bf16 %v5635_v33  ;;  %v6501_v41 = vunpack.c.h.bf16 %v5635_v33 }
 0x46e   :  { %v2037_v51 = vmul.f32 %v1952_v55, %v6498_v48  ;;  %v2038_v54 = vmul.f32 %v1952_v55, %v6499_v43  ;;  %v2244_v7 = vrot.slane %v2243_v42, 1  ;;  %v2487_v14 = vpack.c.bf16 %v2217_v46, %v2217_v46 }
 0x46f   :  { %v2039_v15 = vmul.f32 %v1952_v55, %v6500_v25  ;;  %v2040_v62 = vmul.f32 %v1952_v55, %v6501_v41  ;;  %v6502_v20 = vunpack.c.l.bf16 %v5649_v32  ;;  %v6503_v63 = vunpack.c.h.bf16 %v5649_v32 }
 0x470   :  { %v2489_v3 = vpack.c.bf16 %v2231_v19, %v2231_v19  ;;  %v2253_v61 = vadd.f32 %v2043_v59, %v2037_v51  ;;  %v2260_v45 = vadd.f32 %v2044_v9, %v2038_v54  ;;  %v5941_v1 = vadd.f32 %v2244_v7, %v2243_v42 }
 0x471   :  { %v2041_v13 = vmul.f32 %v1952_v55, %v6502_v20  ;;  %v2042_v31 = vmul.f32 %v1952_v55, %v6503_v63  ;;  %v2267_v38 = vadd.f32 %v2045_v34, %v2039_v15  ;;  %v2274_v33 = vadd.f32 %v2046_v49, %v2040_v62  ;;  %v1967_v20 = vpop.permute.xlu0 %1966 }
 0x472   :  { %v5944_v10 = vunpack.c.l.b16 %v2487_v14  ;;  %v2254_v16 = vrot.slane %v2253_v61, 4  ;;  %v2261_v27 = vrot.slane %v2260_v45, 4  ;;  %v5946_v26 = vunpack.c.l.b16 %v2489_v3 }
 0x473   :  { %v2281_v30 = vadd.f32 %v2047_v50, %v2041_v13  ;;  %v2268_v32 = vrot.slane %v2267_v38, 4  ;;  %v2275_v55 = vrot.slane %v2274_v33, 4  ;;  %v2288_v21 = vadd.f32 %v2048_v52, %v2042_v31 }
 0x474   :  { %v2255_v9 = vadd.f32 %v2254_v16, %v2253_v61  ;;  %v2262_v46 = vadd.f32 %v2261_v27, %v2260_v45  ;;  %v6504_v51 = vunpack.c.l.bf16 %v5483_v28  ;;  %v6505_v25 = vunpack.c.h.bf16 %v5483_v28 }
 0x475   :  { %v2282_v42 = vrot.slane %v2281_v30, 4  ;;  %v2269_v48 = vadd.f32 %v2268_v32, %v2267_v38  ;;  %v2276_v34 = vadd.f32 %v2275_v55, %v2274_v33  ;;  %v2289_v49 = vrot.slane %v2288_v21, 4 }
 0x476   :  { %v2049_v43 = vmul.f32 %v1962_v6, %v6504_v51  ;;  %v2256_v54 = vrot.slane %v2255_v9, 2  ;;  %v2263_v50 = vrot.slane %v2262_v46, 2  ;;  %v2050_v15 = vmul.f32 %v1962_v6, %v6505_v25  ;;  %v6514_v25 = vld [vmem:[#allocation7_spill] sm:$0xff] }
 0x477   :  { %v2283_v19 = vadd.f32 %v2282_v42, %v2281_v30  ;;  %v2270_v41 = vrot.slane %v2269_v48, 2  ;;  %v2277_v52 = vrot.slane %v2276_v34, 2  ;;  %v2290_v62 = vadd.f32 %v2289_v49, %v2288_v21 }
 0x478   :  { %v6506_v7 = vunpack.c.l.bf16 %v5666_v17  ;;  %v2257_v13 = vadd.f32 %v2256_v54, %v2255_v9  ;;  %v5956_v63 = vadd.f32 %v2263_v50, %v2262_v46  ;;  %v6507_v3 = vunpack.c.h.bf16 %v5666_v17 }
 0x479   :  { %v2284_v31 = vrot.slane %v2283_v19, 2  ;;  %v2271_v45 = vadd.f32 %v2270_v41, %v2269_v48  ;;  %v5960_v38 = vadd.f32 %v2277_v52, %v2276_v34  ;;  %v2291_v33 = vrot.slane %v2290_v62, 2 }
 0x47a   :  { %v2051_v14 = vmul.f32 %v1962_v6, %v6506_v7  ;;  %v2052_v61 = vmul.f32 %v1962_v6, %v6507_v3  ;;  %v6508_v28 = vunpack.c.l.bf16 %v5680_v11  ;;  %v2258_v27 = vrot.slane %v2257_v13, 1 }
 0x47b   :  { %v2285_v30 = vadd.f32 %v2284_v31, %v2283_v19  ;;  %v6509_v32 = vunpack.c.h.bf16 %v5680_v11  ;;  %v6510_v21 = vunpack.c.l.bf16 %v5490_v40  ;;  %v2272_v46 = vrot.slane %v2271_v45, 1 }
 0x47c   :  { %v2053_v16 = vmul.f32 %v1962_v6, %v6508_v28  ;;  %v5968_v42 = vadd.f32 %v2291_v33, %v2290_v62  ;;  %v6511_v17 = vunpack.c.h.bf16 %v5490_v40  ;;  %v6512_v34 = vunpack.c.l.bf16 %v5673_v23  ;;  %v1972_v40 = vpop.permute.xlu1 %1971 }
 0x47d   :  { %v2054_v55 = vmul.f32 %v1962_v6, %v6509_v32  ;;  %v2055_v9 = vmul.f32 %v1967_v20, %v6510_v21  ;;  %v2259_v51 = vadd.f32 %v2258_v27, %v2257_v13  ;;  %v2286_v54 = vrot.slane %v2285_v30, 1 }
 0x47e   :  { %v2056_v48 = vmul.f32 %v1967_v20, %v6511_v17  ;;  %v2057_v49 = vmul.f32 %v1967_v20, %v6512_v34  ;;  %v6513_v50 = vunpack.c.h.bf16 %v5673_v23  ;;  %v6515_v11 = vunpack.c.l.bf16 %v6514_v25 }
 0x47f   :  { %v5978_v41 = vadd.f32 %v2272_v46, %v2271_v45  ;;  %v6516_v52 = vunpack.c.h.bf16 %v6514_v25  ;;  %v2295_v7 = vadd.f32 %v2055_v9, %v2049_v43  ;;  %v5982_v3 = vadd.f32 %v2286_v54, %v2285_v30  ;;  %v6517_v46 = vld [vmem:[#allocation5_spill] sm:$0xff] }
 0x480   :  { %v2058_v19 = vmul.f32 %v1967_v20, %v6513_v50  ;;  %v2059_v6 = vmul.f32 %v1967_v20, %v6515_v11  ;;  %v2302_v31 = vadd.f32 %v2056_v48, %v2050_v15  ;;  %v2493_v33 = vpack.c.bf16 %v2259_v51, %v2259_v51  ;;  %v1982_v59 = vpop.permute.xlu1 %1981 }
 0x481   :  { %v2060_v62 = vmul.f32 %v1967_v20, %v6516_v52  ;;  %v2309_v28 = vadd.f32 %v2057_v49, %v2051_v14  ;;  %v2296_v27 = vrot.slane %v2295_v7, 4  ;;  %v6518_v50 = vunpack.c.l.bf16 %v6517_v46 }
 0x482   :  { %v2316_v13 = vadd.f32 %v2058_v19, %v2052_v61  ;;  %v2303_v32 = vrot.slane %v2302_v31, 4  ;;  %v2323_v23 = vadd.f32 %v2059_v6, %v2053_v16  ;;  %v5984_v17 = vunpack.c.l.b16 %v2493_v33  ;;  %v6520_v16 = vld [vmem:[#allocation8_spill] sm:$0xff]  ;;  %v1977_v6 = vpop.permute.xlu0 %1976  ;;  %v6523_v33 = vld [vmem:[#allocation10_spill] sm:$0xff] }
 0x483   :  { %v2330_v21 = vadd.f32 %v2060_v62, %v2054_v55  ;;  %v2310_v34 = vrot.slane %v2309_v28, 4  ;;  %v2061_v25 = vmul.f32 %v1972_v40, %v6518_v50  ;;  %v2297_v20 = vadd.f32 %v2296_v27, %v2295_v7 }
 0x484   :  { %v2317_v45 = vrot.slane %v2316_v13, 4  ;;  %v5988_v43 = vadd.f32 %v2303_v32, %v2302_v31  ;;  %v2324_v15 = vrot.slane %v2323_v23, 4  ;;  %v6519_v14 = vunpack.c.h.bf16 %v6517_v46 }
 0x485   :  { %v2331_v30 = vrot.slane %v2330_v21, 4  ;;  %v2311_v9 = vadd.f32 %v2310_v34, %v2309_v28  ;;  %v6521_v55 = vunpack.c.l.bf16 %v6520_v16  ;;  %v2298_v51 = vrot.slane %v2297_v20, 2 }
 0x486   :  { %v5990_v48 = vadd.f32 %v2317_v45, %v2316_v13  ;;  %v2062_v61 = vmul.f32 %v1972_v40, %v6519_v14  ;;  %v2325_v19 = vadd.f32 %v2324_v15, %v2323_v23  ;;  %v6522_v7 = vunpack.c.h.bf16 %v6520_v16  ;;  %v6529_v16 = vld [vmem:[#allocation9_spill] sm:$0xff] }
 0x487   :  { %v2063_v49 = vmul.f32 %v1972_v40, %v6521_v55  ;;  %v5997_v11 = vadd.f32 %v2331_v30, %v2330_v21  ;;  %v2312_v52 = vrot.slane %v2311_v9, 2  ;;  %v6524_v28 = vunpack.c.l.bf16 %v6523_v33  ;;  %v6526_v21 = vld [vmem:[#allocation6_spill] sm:$0xff] }
 0x488   :  { %v2064_v31 = vmul.f32 %v1972_v40, %v6522_v7  ;;  %v2299_v27 = vadd.f32 %v2298_v51, %v2297_v20  ;;  %v2326_v32 = vrot.slane %v2325_v19, 2  ;;  %v6525_v45 = vunpack.c.h.bf16 %v6523_v33  ;;  %v6532_v33 = vld [vmem:[#allocation11_spill] sm:$0xff] }
 0x489   :  { %v2065_v13 = vmul.f32 %v1972_v40, %v6524_v28  ;;  %v6007_v23 = vadd.f32 %v2312_v52, %v2311_v9  ;;  %v6527_v50 = vunpack.c.l.bf16 %v6526_v21  ;;  %v6528_v30 = vunpack.c.h.bf16 %v6526_v21 }
 0x48a   :  { %v2066_v46 = vmul.f32 %v1972_v40, %v6525_v45  ;;  %v6530_v55 = vunpack.c.l.bf16 %v6529_v16  ;;  %v2300_v28 = vrot.slane %v2299_v27, 1  ;;  %v6015_v20 = vadd.f32 %v2326_v32, %v2325_v19 }
 0x48b   :  { %v2067_v15 = vmul.f32 %v1977_v6, %v6527_v50  ;;  %v2068_v14 = vmul.f32 %v1977_v6, %v6528_v30  ;;  %v6531_v51 = vunpack.c.h.bf16 %v6529_v16  ;;  %v6533_v40 = vunpack.c.l.bf16 %v6532_v33 }
 0x48c   :  { %v2069_v7 = vmul.f32 %v1977_v6, %v6530_v55  ;;  %v6534_v52 = vunpack.c.h.bf16 %v6532_v33  ;;  %v2301_v30 = vadd.f32 %v2300_v28, %v2299_v27  ;;  %v6535_v55 = vld [vmem:[#allocation12_spill] sm:$0xff]  ;;  %v6538_v27 = vld [vmem:[#allocation13_spill] sm:$0xff] }
 0x48d   :  { %v2070_v58 = vmul.f32 %v1977_v6, %v6531_v51  ;;  %v2071_v9 = vmul.f32 %v1977_v6, %v6533_v40  ;;  %v2337_v50 = vadd.f32 %v2067_v15, %v2061_v25  ;;  %v2344_v34 = vadd.f32 %v2068_v14, %v2062_v61 }
 0x48e   :  { %v2072_v45 = vmul.f32 %v1977_v6, %v6534_v52  ;;  %v2351_v21 = vadd.f32 %v2069_v7, %v2063_v49  ;;  %v6536_v62 = vunpack.c.l.bf16 %v6535_v55  ;;  %v2499_v51 = vpack.c.bf16 %v2301_v30, %v2301_v30  ;;  %v6541_v52 = vld [vmem:[#allocation14_spill] sm:$0xff] }
 0x48f   :  { %v2358_v53 = vadd.f32 %v2070_v58, %v2064_v31  ;;  %v2365_v22 = vadd.f32 %v2071_v9, %v2065_v13  ;;  %v2338_v19 = vrot.slane %v2337_v50, 4  ;;  %v2345_v32 = vrot.slane %v2344_v34, 4  ;;  %v1987_v58 = vpop.permute.xlu0 %1986 }
 0x490   :  { %v2073_v37 = vmul.f32 %v1982_v59, %v6536_v62  ;;  %v2352_v39 = vrot.slane %v2351_v21, 4  ;;  %v2372_v16 = vadd.f32 %v2072_v45, %v2066_v46  ;;  %v6537_v40 = vunpack.c.h.bf16 %v6535_v55 }
 0x491   :  { %v2359_v54 = vrot.slane %v2358_v53, 4  ;;  %v2366_v18 = vrot.slane %v2365_v22, 4  ;;  %v2339_v6 = vadd.f32 %v2338_v19, %v2337_v50  ;;  %v2346_v25 = vadd.f32 %v2345_v32, %v2344_v34  ;;  %v6547_v32 = vld [vmem:[#allocation16_spill] sm:$0xff] }
 0x492   :  { %v2074_v33 = vmul.f32 %v1982_v59, %v6537_v40  ;;  %v6027_v61 = vadd.f32 %v2352_v39, %v2351_v21  ;;  %v2373_v49 = vrot.slane %v2372_v16, 4  ;;  %v6029_v31 = vunpack.c.l.b16 %v2499_v51 }
 0x493   :  { %v6031_v13 = vadd.f32 %v2359_v54, %v2358_v53  ;;  %v6033_v62 = vadd.f32 %v2366_v18, %v2365_v22  ;;  %v6539_v46 = vunpack.c.l.bf16 %v6538_v27  ;;  %v2340_v14 = vrot.slane %v2339_v6, 2  ;;  %v6544_v18 = vld [vmem:[#allocation15_spill] sm:$0xff] }
 0x494   :  { %v6038_v28 = vadd.f32 %v2373_v49, %v2372_v16  ;;  %v6540_v34 = vunpack.c.h.bf16 %v6538_v27  ;;  %v6542_v45 = vunpack.c.l.bf16 %v6541_v52  ;;  %v6543_v53 = vunpack.c.h.bf16 %v6541_v52  ;;  %v6550_v27 = vld [vmem:[#allocation17_spill] sm:$0xff] }
 0x495   :  { %v2075_v15 = vmul.f32 %v1982_v59, %v6539_v46  ;;  %v6545_v54 = vunpack.c.l.bf16 %v6544_v18  ;;  %v2341_v30 = vadd.f32 %v2340_v14, %v2339_v6  ;;  %v6546_v55 = vunpack.c.h.bf16 %v6544_v18 }
 0x496   :  { %v2076_v39 = vmul.f32 %v1982_v59, %v6540_v34  ;;  %v2077_v50 = vmul.f32 %v1982_v59, %v6542_v45  ;;  %v2078_v22 = vmul.f32 %v1982_v59, %v6543_v53  ;;  %v6548_v16 = vunpack.c.l.bf16 %v6547_v32 }
 0x497   :  { %v2079_v21 = vmul.f32 %v1987_v58, %v6545_v54  ;;  %v2080_v19 = vmul.f32 %v1987_v58, %v6546_v55  ;;  %v6549_v40 = vunpack.c.h.bf16 %v6547_v32  ;;  %v6551_v46 = vunpack.c.l.bf16 %v6550_v27 }
 0x498   :  { %v2081_v51 = vmul.f32 %v1987_v58, %v6548_v16  ;;  %v6552_v45 = vunpack.c.h.bf16 %v6550_v27  ;;  %v6553_v53 = vrot.slane %v5915_v47, 1  ;;  %v2342_v14 = vrot.slane %v2341_v30, 1 }
 0x499   :  { %v2082_v49 = vmul.f32 %v1987_v58, %v6549_v40  ;;  %v2083_v34 = vmul.f32 %v1987_v58, %v6551_v46  ;;  %v2379_v59 = vadd.f32 %v2079_v21, %v2073_v37  ;;  %v2386_v18 = vadd.f32 %v2080_v19, %v2074_v33 }
 0x49a   :  { %v2084_v52 = vmul.f32 %v1987_v58, %v6552_v45  ;;  %v2224_v6 = vadd.f32 %v6553_v53, %v5915_v47  ;;  %v2393_v54 = vadd.f32 %v2081_v51, %v2075_v15  ;;  %v2265_v40 = vrot.slane %v5956_v63, 1 }
 0x49b   :  { %v2400_v55 = vadd.f32 %v2082_v49, %v2076_v39  ;;  %v2380_v16 = vrot.slane %v2379_v59, 4  ;;  %v2407_v9 = vadd.f32 %v2083_v34, %v2077_v50  ;;  %v2343_v46 = vadd.f32 %v2342_v14, %v2341_v30 }
 0x49c   :  { %v2414_v32 = vadd.f32 %v2084_v52, %v2078_v22  ;;  %v2387_v7 = vrot.slane %v2386_v18, 4  ;;  %v2394_v27 = vrot.slane %v2393_v54, 4  ;;  %v2266_v47 = vadd.f32 %v2265_v40, %v5956_v63 }
 0x49d   :  { %v2401_v58 = vrot.slane %v2400_v55, 4  ;;  %v2381_v37 = vadd.f32 %v2380_v16, %v2379_v59  ;;  %v2408_v21 = vrot.slane %v2407_v9, 4  ;;  %v6554_v50 = vrot.slane %v5988_v43, 2 }
 0x49e   :  { %v2415_v45 = vrot.slane %v2414_v32, 4  ;;  %v2388_v33 = vadd.f32 %v2387_v7, %v2386_v18  ;;  %v2395_v15 = vadd.f32 %v2394_v27, %v2393_v54  ;;  %v2347_v49 = vrot.slane %v2346_v25, 2 }
 0x49f   :  { %v6064_v39 = vadd.f32 %v2401_v58, %v2400_v55  ;;  %v2306_v22 = vadd.f32 %v6554_v50, %v5988_v43  ;;  %v2382_v19 = vrot.slane %v2381_v37, 2  ;;  %v2409_v30 = vadd.f32 %v2408_v21, %v2407_v9 }
 0x4a0   :  { %v6069_v51 = vadd.f32 %v2415_v45, %v2414_v32  ;;  %v2396_v34 = vrot.slane %v2395_v15, 2  ;;  %v2389_v59 = vrot.slane %v2388_v33, 2  ;;  %v2488_v53 = vpack.c.bf16 %v2224_v6, %v2224_v6  ;;  %v6556_v45 = vld [vmem:[#allocation18_spill] sm:$0xff] }
 0x4a1   :  { %v2307_v52 = vrot.slane %v2306_v22, 1  ;;  %v2383_v63 = vadd.f32 %v2382_v19, %v2381_v37  ;;  %v2410_v14 = vrot.slane %v2409_v30, 2  ;;  %v2348_v7 = vadd.f32 %v2347_v49, %v2346_v25 }
 0x4a2   :  { %v2494_v18 = vpack.c.bf16 %v2266_v47, %v2266_v47  ;;  %v6071_v54 = vadd.f32 %v2396_v34, %v2395_v15  ;;  %v2390_v16 = vadd.f32 %v2389_v59, %v2388_v33  ;;  %v6555_v43 = vpack.c.bf16 %v5877_v29, %v5877_v29 }
 0x4a3   :  { %v2308_v55 = vadd.f32 %v2307_v52, %v2306_v22  ;;  %v2384_v32 = vrot.slane %v2383_v63, 1  ;;  %v6076_v40 = vadd.f32 %v2410_v14, %v2409_v30  ;;  %v2349_v27 = vrot.slane %v2348_v7, 1 }
 0x4a4   :  { %v2686_v9 = vunpack.c.l.b16 %v6555_v43  ;;  %v2692_v58 = vunpack.c.l.b16 %v2488_v53  ;;  %v2391_v6 = vrot.slane %v2390_v16, 1  ;;  %v2698_v37 = vunpack.c.l.b16 %v2494_v18 }
 0x4a5   :  { %v2500_v21 = vpack.c.bf16 %v2308_v55, %v2308_v55  ;;  %v2735_v25 = vsel %vm2721_vm1, %v5850_v44, %v6556_v45  ;;  %v2385_v47 = vadd.f32 %v2384_v32, %v2383_v63  ;;  %v2350_v15 = vadd.f32 %v2349_v27, %v2348_v7 }
 0x4a6   :  { %v2736_v33 = vsel %vm2723_vm2, %v2686_v9, %v2735_v25  ;;  %v2505_v50 = vpack.c.bf16 %v2343_v46, %v2343_v46  ;;  %v2392_v22 = vadd.f32 %v2391_v6, %v2390_v16  ;;  %v2724_v30 = vsel %vm2723_vm2, %v5899_v56, %v5863_v24 }
 0x4a7   :  { %v2704_v29 = vunpack.c.l.b16 %v2500_v21  ;;  %v2737_v19 = vsel %vm2725_vm3, %v2692_v58, %v2736_v33  ;;  %v2511_v49 = vpack.c.bf16 %v2385_v47, %v2385_v47  ;;  %v2506_v34 = vpack.c.bf16 %v2350_v15, %v2350_v15 }
 0x4a8   :  { %v2738_v52 = vsel %vm2727_vm4, %v2698_v37, %v2737_v19  ;;  %v2709_v59 = vunpack.c.l.b16 %v2505_v50  ;;  %v2512_v53 = vpack.c.bf16 %v2392_v22, %v2392_v22  ;;  %v2726_v63 = vsel %vm2725_vm3, %v5944_v10, %v2724_v30  ;;  %v6560_v30 = vld [vmem:[#allocation20_spill] sm:$0xff] }
 0x4a9   :  { %v2739_v44 = vsel %vm2729_vm5, %v2704_v29, %v2738_v52  ;;  %v6557_v46 = vrot.slane %v5924_v36, 1  ;;  %v2710_v7 = vunpack.c.l.b16 %v2506_v34  ;;  %v2715_v18 = vunpack.c.l.b16 %v2511_v49 }
 0x4aa   :  { %v2728_v24 = vsel %vm2727_vm4, %v5984_v17, %v2726_v63  ;;  %v2279_v56 = vrot.slane %v5960_v38, 1  ;;  %v2716_v55 = vunpack.c.l.b16 %v2512_v53  ;;  %v6558_v43 = vrot.slane %v5990_v48, 2  ;;  %v4086_v63 = vld [vmem:[%s6407_s7 + $0x110] ss:$8 sps:$4 sm:$0xff]  }
 0x4ab   :  { %v2238_v14 = vadd.f32 %v6557_v46, %v5924_v36  ;;  %v2730_v16 = vsel %vm2729_vm5, %v6029_v31, %v2728_v24  ;;  %v2361_v10 = vrot.slane %v6031_v13, 2  ;;  %v2740_v32 = vsel %vm2731_vm6, %v2710_v7, %v2739_v44 }
 0x4ac   :  { %v2320_v9 = vadd.f32 %v6558_v43, %v5990_v48  ;;  %v2732_v36 = vsel %vm2731_vm6, %v2709_v59, %v2730_v16  ;;  %v2280_v27 = vadd.f32 %v2279_v56, %v5960_v38  ;;  %v2403_v17 = vrot.slane %v6064_v39, 2  ;;  %v4083_v48 = vld [vmem:[%s6407_s7 + $0x100] ss:$8 sps:$4 sm:$0xff]   ;;  %v4091_v56 = vld [vmem:[%s6407_s7 + $0x124] ss:$8 sps:$4 sm:$0xff]  }
 0x4ad   :  { %v2741_v58 = vsel %vm2733_vm7, %v2716_v55, %v2740_v32  ;;  %v2734_v6 = vsel %vm2733_vm7, %v2715_v18, %v2732_v36  ;;  %v2362_v31 = vadd.f32 %v2361_v10, %v6031_v13  ;;  %v2490_v47 = vpack.c.bf16 %v2238_v14, %v2238_v14  ;;  %v4088_v13 = vld [vmem:[%s6407_s7 + $0x114] ss:$8 sps:$4 sm:$0xff]   ;;  %v6562_v36 = vld [vmem:[#allocation19_spill] sm:$0xff] }
 0x4ae   :  { %v2321_v21 = vrot.slane %v2320_v9, 1  ;;  %v2771_v37 = vpack.c.b16 %v2741_v58, %v2741_v58  ;;  %v2770_v45 = vpack.c.b16 %v2734_v6, %v2734_v6  ;;  %v2404_v25 = vadd.f32 %v2403_v17, %v6064_v39  ;;  %v4089_v58 = vld [vmem:[%s6407_s7 + $0x120] ss:$8 sps:$4 sm:$0xff]  }
 0x4af   :  { %v2363_v38 = vrot.slane %v2362_v31, 1  ;;  %v2496_v33 = vpack.c.bf16 %v2280_v27, %v2280_v27  ;;  %v6559_v50 = vpack.c.bf16 %v5895_v57, %v5895_v57  ;;  %v2694_v19 = vunpack.c.l.b16 %v2490_v47 }
 0x4b0   :  { %v2322_v15 = vadd.f32 %v2321_v21, %v2320_v9  ;;  %3294 = vmatprep.mubr.bf16.mxu0 %v2771_v37  ;;  %v2405_v29 = vrot.slane %v2404_v25, 1  ;;  %v2749_v49 = vsel %vm2721_vm1, %v5857_v60, %v6560_v30  ;;  %v2314_v39 = vrot.slane %v6007_v23, 1 }
 0x4b1   :  { %v2688_v22 = vunpack.c.l.b16 %v6559_v50  ;;  %3295 = vmatmul.mubr.bf16.vlgmr.msra.gmra.mrb[32].mxu0 %v2770_v45  ;;  %v2364_v34 = vadd.f32 %v2363_v38, %v2362_v31  ;;  %v2700_v59 = vunpack.c.l.b16 %v2496_v33  ;;  %v6561_v60 = vrot.slane %v6027_v61, 2 }
 0x4b2   :  { %v2502_v52 = vpack.c.bf16 %v2322_v15, %v2322_v15  ;;  %3304 = vmatpush1.bf16.msra.mxu0 %v4083_v48  ;;  %v2406_v53 = vadd.f32 %v2405_v29, %v2404_v25  ;;  %v2315_v46 = vadd.f32 %v2314_v39, %v6007_v23  ;;  %v2398_v55 = vrot.slane %v6071_v54, 1 }
 0x4b3   :  { %v2750_v57 = vsel %vm2723_vm2, %v2688_v22, %v2749_v49  ;;  %v2355_v14 = vadd.f32 %v6561_v60, %v6027_v61  ;;  %v2508_v7 = vpack.c.bf16 %v2364_v34, %v2364_v34  ;;  %3305 = vmatprep.subr.bf16.mxu0 %v4088_v13  ;;  %v2495_v23 = vpack.c.bf16 %v5978_v41, %v5978_v41  ;;  %v4097_v49 = vld [vmem:[%s6407_s7 + $0x144] ss:$8 sps:$4 sm:$0xff]  }
 0x4b4   :  { %v2751_v44 = vsel %vm2725_vm3, %v2694_v19, %v2750_v57  ;;  %v2706_v18 = vunpack.c.l.b16 %v2502_v52  ;;  %v2514_v16 = vpack.c.bf16 %v2406_v53, %v2406_v53  ;;  %v2501_v9 = vpack.c.bf16 %v2315_v46, %v2315_v46 }
 0x4b5   :  { %v2752_v24 = vsel %vm2727_vm4, %v2700_v59, %v2751_v44  ;;  %v2356_v43 = vrot.slane %v2355_v14, 1  ;;  %v2712_v10 = vunpack.c.l.b16 %v2508_v7  ;;  %v2399_v32 = vadd.f32 %v2398_v55, %v6071_v54  ;;  %v4094_v54 = vld [vmem:[%s6407_s7 + $0x134] ss:$8 sps:$4 sm:$0xff]  }
 0x4b6   :  { %v2753_v61 = vsel %vm2729_vm5, %v2706_v18, %v2752_v24  ;;  %v2742_v27 = vsel %vm2721_vm1, %v5852_v0, %v6562_v36  ;;  %v2718_v17 = vunpack.c.l.b16 %v2514_v16  ;;  %3306 = vmatpush1.bf16.msra.mxu0 %v4086_v63  ;;  %v2699_v21 = vunpack.c.l.b16 %v2495_v23  ;;  %v6566_v44 = vld [vmem:[#allocation22_spill] sm:$0xff] }
 0x4b7   :  { %v2357_v6 = vadd.f32 %v2356_v43, %v2355_v14  ;;  %v2705_v31 = vunpack.c.l.b16 %v2501_v9  ;;  %v2754_v41 = vsel %vm2731_vm6, %v2712_v10, %v2753_v61  ;;  %3307 = vmatprep.subr.bf16.mxu0 %v4091_v56  ;;  %v2513_v37 = vpack.c.bf16 %v2399_v32, %v2399_v32  ;;  %v4100_v55 = vld [vmem:[%s6407_s7 + $0x154] ss:$8 sps:$4 sm:$0xff]  }
 0x4b8   :  { %v2743_v0 = vsel %vm2723_vm2, %v5905_v12, %v2742_v27  ;;  %v6563_v48 = vrot.slane %v5930_v4, 1  ;;  %v2755_v25 = vsel %vm2733_vm7, %v2718_v17, %v2754_v41  ;;  %v2293_v38 = vrot.slane %v5968_v42, 1 }
 0x4b9   :  { %v2507_v47 = vpack.c.bf16 %v2357_v6, %v2357_v6  ;;  %v2744_v15 = vsel %vm2725_vm3, %v5946_v26, %v2743_v0  ;;  %v2773_v33 = vpack.c.b16 %v2755_v25, %v2755_v25  ;;  %v2717_v50 = vunpack.c.l.b16 %v2513_v37  ;;  %v4098_v6 = vld [vmem:[%s6407_s7 + $0x150] ss:$8 sps:$4 sm:$0xff]  }
 0x4ba   :  { %v2252_v45 = vadd.f32 %v6563_v48, %v5930_v4  ;;  %v2745_v22 = vsel %vm2727_vm4, %v2699_v21, %v2744_v15  ;;  %v6564_v13 = vrot.slane %v5997_v11, 2  ;;  %3308 = vmatpush1.bf16.msra.mxu0 %v4089_v58  ;;  %v4092_v4 = vld [vmem:[%s6407_s7 + $0x130] ss:$8 sps:$4 sm:$0xff]   ;;  %v2294_v26 = vadd.f32 %v2293_v38, %v5968_v42 }
 0x4bb   :  { %v2711_v29 = vunpack.c.l.b16 %v2507_v47  ;;  %v2746_v19 = vsel %vm2729_vm5, %v2705_v31, %v2745_v22  ;;  %v2375_v30 = vrot.slane %v6038_v28, 2  ;;  %3335 = vmatprep.mubr.bf16.mxu0 %v2773_v33  ;;  %3309 = vmatprep.subr.bf16.mxu0 %v4094_v54  ;;  %v6565_v52 = vpack.c.bf16 %v5897_v2, %v5897_v2  ;;  %v6569_v54 = vld [vmem:[#allocation21_spill] sm:$0xff]  ;;  %v4101_v33 = vld [vmem:[%s6407_s7 + $0x160] ss:$8 sps:$4 sm:$0xff]  }
 0x4bc   :  { %v2334_v12 = vadd.f32 %v6564_v13, %v5997_v11  ;;  %v2417_v11 = vrot.slane %v6069_v51, 2  ;;  %v2492_v34 = vpack.c.bf16 %v2252_v45, %v2252_v45  ;;  %v2498_v53 = vpack.c.bf16 %v2294_v26, %v2294_v26  ;;  %v4104_v26 = vld [vmem:[%s6407_s7 + $0x170] ss:$8 sps:$4 sm:$0xff]  }
 0x4bd   :  { %v2690_v59 = vunpack.c.l.b16 %v6565_v52  ;;  %v2747_v57 = vsel %vm2731_vm6, %v2711_v29, %v2746_v19  ;;  %v2376_v42 = vadd.f32 %v2375_v30, %v6038_v28  ;;  %v2763_v63 = vsel %vm2721_vm1, %v5865_v8, %v6566_v44  ;;  %v4095_v28 = vld [vmem:[%s6407_s7 + $0x140] ss:$8 sps:$4 sm:$0xff]   ;;  %v4110_v52 = vld [vmem:[%s6407_s7 + $0x190] ss:$8 sps:$4 sm:$0xff]   ;;  %v4121_v44 = vld [vmem:[%s6407_s7 + $0x1c4] ss:$8 sps:$4 sm:$0xff]  }
 0x4be   :  { %v2335_v39 = vrot.slane %v2334_v12, 1  ;;  %v6183_v46 = vsel %vm2733_vm7, %v2717_v50, %v2747_v57  ;;  %v2418_v14 = vadd.f32 %v2417_v11, %v6069_v51  ;;  %v2696_v7 = vunpack.c.l.b16 %v2492_v34  ;;  %3310 = vmatpush1.bf16.msra.mxu0 %v4092_v4  ;;  %v4107_v11 = vld [vmem:[%s6407_s7 + $0x180] ss:$8 sps:$4 sm:$0xff]   ;;  %v4112_v34 = vld [vmem:[%s6407_s7 + $0x194] ss:$8 sps:$4 sm:$0xff]  }
 0x4bf   :  { %v6567_v2 = vpack.c.bf16 %v5941_v1, %v5941_v1  ;;  %v2377_v24 = vrot.slane %v2376_v42, 1  ;;  %v2702_v56 = vunpack.c.l.b16 %v2498_v53  ;;  %v2764_v8 = vsel %vm2723_vm2, %v2690_v59, %v2763_v63  ;;  %3311 = vmatprep.subr.bf16.mxu0 %v4097_v49  ;;  %v4109_v49 = vld [vmem:[%s6407_s7 + $0x184] ss:$8 sps:$4 sm:$0xff]   ;;  %v4113_v57 = vld [vmem:[%s6407_s7 + $0x1a0] ss:$8 sps:$4 sm:$0xff]  }
 0x4c0   :  { %v2336_v60 = vadd.f32 %v2335_v39, %v2334_v12  ;;  %v2419_v51 = vrot.slane %v2418_v14, 1  ;;  %v2765_v43 = vsel %vm2725_vm3, %v2696_v7, %v2764_v8  ;;  %v2328_v1 = vrot.slane %v6015_v20, 1  ;;  %v4106_v12 = vld [vmem:[%s6407_s7 + $0x174] ss:$8 sps:$4 sm:$0xff]   ;;  %v4115_v59 = vld [vmem:[%s6407_s7 + $0x1a4] ss:$8 sps:$4 sm:$0xff]  }
 0x4c1   :  { %v2695_v18 = vunpack.c.l.b16 %v6567_v2  ;;  %v2378_v23 = vadd.f32 %v2377_v24, %v2376_v42  ;;  %v2766_v9 = vsel %vm2727_vm4, %v2702_v56, %v2765_v43  ;;  %v6568_v10 = vrot.slane %v6033_v62, 2  ;;  %v4118_v42 = vld [vmem:[%s6407_s7 + $0x1b4] ss:$8 sps:$4 sm:$0xff]   ;;  %v4116_v53 = vld [vmem:[%s6407_s7 + $0x1b0] ss:$8 sps:$4 sm:$0xff]  }
 0x4c2   :  { %v2504_v16 = vpack.c.bf16 %v2336_v60, %v2336_v60  ;;  %v2412_v32 = vrot.slane %v6076_v40, 1  ;;  %v2420_v36 = vadd.f32 %v2419_v51, %v2418_v14  ;;  %v2329_v17 = vadd.f32 %v2328_v1, %v6015_v20  ;;  %3312 = vmatpush1.bf16.msra.mxu0 %v4095_v28  ;;  %v4103_v20 = vld [vmem:[%s6407_s7 + $0x164] ss:$8 sps:$4 sm:$0xff]   ;;  %v4119_v63 = vld [vmem:[%s6407_s7 + $0x1c0] ss:$8 sps:$4 sm:$0xff]  }
 0x4c3   :  { %v2369_v61 = vadd.f32 %v6568_v10, %v6033_v62  ;;  %v2497_v58 = vpack.c.bf16 %v5982_v3, %v5982_v3  ;;  %v2510_v21 = vpack.c.bf16 %v2378_v23, %v2378_v23  ;;  %v2756_v62 = vsel %vm2721_vm1, %v5859_v35, %v6569_v54  ;;  %3313 = vmatprep.subr.bf16.mxu0 %v4100_v55  ;;  %v4124_v60 = vld [vmem:[%s6407_s7 + $0x1d4] ss:$8 sps:$4 sm:$0xff]   ;;  %v4122_v14 = vld [vmem:[%s6407_s7 + $0x1d0] ss:$8 sps:$4 sm:$0xff]   ;;  %v4127_v7 = vld [vmem:[%s6407_s7 + $0x1e4] ss:$8 sps:$4 sm:$0xff]  }
 0x4c4   :  { %v2708_v27 = vunpack.c.l.b16 %v2504_v16  ;;  %v2413_v41 = vadd.f32 %v2412_v32, %v6076_v40  ;;  %v2516_v37 = vpack.c.bf16 %v2420_v36, %v2420_v36  ;;  %v2503_v0 = vpack.c.bf16 %v2329_v17, %v2329_v17  ;;  %v4125_v2 = vld [vmem:[%s6407_s7 + $0x1e0] ss:$8 sps:$4 sm:$0xff]   ;;  %v4128_v28 = vld [vmem:[%s6407_s7 + $0x1f0] ss:$8 sps:$4 sm:$0xff]   ;;  %v4133_v24 = vld [vmem:[%s6407_s7 + $0x204] ss:$8 sps:$4 sm:$0xff]  }
 0x4c5   :  { %v2370_v31 = vrot.slane %v2369_v61, 1  ;;  %v2701_v48 = vunpack.c.l.b16 %v2497_v58  ;;  %v2714_v45 = vunpack.c.l.b16 %v2510_v21  ;;  %v2757_v40 = vsel %vm2723_vm2, %v5907_v5, %v2756_v62  ;;  %v4131_v56 = vld [vmem:[%s6407_s7 + $0x200] ss:$8 sps:$4 sm:$0xff]   ;;  %v4136_v55 = vld [vmem:[%s6407_s7 + $0x214] ss:$8 sps:$4 sm:$0xff]  }
 0x4c6   :  { %v2767_v3 = vsel %vm2729_vm5, %v2708_v27, %v2766_v9  ;;  %v2515_v47 = vpack.c.bf16 %v2413_v41, %v2413_v41  ;;  %v2720_v15 = vunpack.c.l.b16 %v2516_v37  ;;  %v2707_v38 = vunpack.c.l.b16 %v2503_v0  ;;  %3314 = vmatpush1.bf16.msra.mxu0 %v4098_v6  ;;  %v4134_v16 = vld [vmem:[%s6407_s7 + $0x210] ss:$8 sps:$4 sm:$0xff]   ;;  %v4139_v43 = vld [vmem:[%s6407_s7 + $0x224] ss:$8 sps:$4 sm:$0xff]   ;;  %v4142_v1 = vld [vmem:[%s6407_s7 + $0x234] ss:$8 sps:$4 sm:$0xff]  }
 0x4c7   :  { %v2371_v25 = vadd.f32 %v2370_v31, %v2369_v61  ;;  %v2758_v35 = vsel %vm2725_vm3, %v2695_v18, %v2757_v40  ;;  %v2768_v50 = vsel %vm2731_vm6, %v2714_v45, %v2767_v3  ;;  %3315 = vmatprep.subr.bf16.mxu0 %v4103_v20  ;;  %v4130_v18 = vld [vmem:[%s6407_s7 + $0x1f4] ss:$8 sps:$4 sm:$0xff]   ;;  %v2772_v8 = vpack.c.b16 %v6183_v46, %v6183_v46  ;;  %v4137_v46 = vld [vmem:[%s6407_s7 + $0x220] ss:$8 sps:$4 sm:$0xff]   ;;  %v4140_v23 = vld [vmem:[%s6407_s7 + $0x230] ss:$8 sps:$4 sm:$0xff]  }
 0x4c8   :  { %v2759_v13 = vsel %vm2727_vm4, %v2701_v48, %v2758_v35  ;;  %v2769_v5 = vsel %vm2733_vm7, %v2720_v15, %v2768_v50  ;;  %v2719_v4 = vunpack.c.l.b16 %v2515_v47  ;;  %v4145_v9 = vld [vmem:[%s6407_s7 + $0x244] ss:$8 sps:$4 sm:$0xff]   ;;  %v4143_v10 = vld [vmem:[%s6407_s7 + $0x240] ss:$8 sps:$4 sm:$0xff]   ;;  %v4148_v61 = vld [vmem:[%s6407_s7 + $0x254] ss:$8 sps:$4 sm:$0xff]   ;;  %v2615_v35 = vlaneseq }
 0x4c9   :  { %v2509_v22 = vpack.c.bf16 %v2371_v25, %v2371_v25  ;;  %v2760_v29 = vsel %vm2729_vm5, %v2707_v38, %v2759_v13  ;;  %v2775_v51 = vpack.c.b16 %v2769_v5, %v2769_v5  ;;  %v4146_v32 = vld [vmem:[%s6407_s7 + $0x250] ss:$8 sps:$4 sm:$0xff]   ;;  %v4151_v36 = vld [vmem:[%s6407_s7 + $0x264] ss:$8 sps:$4 sm:$0xff]   ;;  %v4149_v27 = vld [vmem:[%s6407_s7 + $0x260] ss:$8 sps:$4 sm:$0xff]  }
 0x4ca   :  { %3316 = vmatpush1.bf16.msra.mxu0 %v4101_v33  ;;  %v4154_v17 = vld [vmem:[%s6407_s7 + $0x274] ss:$8 sps:$4 sm:$0xff]   ;;  %v4152_v58 = vld [vmem:[%s6407_s7 + $0x270] ss:$8 sps:$4 sm:$0xff]   ;;  %v4157_v6 = vld [vmem:[%s6407_s7 + $0x284] ss:$8 sps:$4 sm:$0xff]  }
 0x4cb   :  { %v2713_v19 = vunpack.c.l.b16 %v2509_v22  ;;  %3317 = vmatprep.subr.bf16.mxu0 %v4106_v12  ;;  %v4155_v21 = vld [vmem:[%s6407_s7 + $0x280] ss:$8 sps:$4 sm:$0xff]   ;;  %v4160_v31 = vld [vmem:[%s6407_s7 + $0x294] ss:$8 sps:$4 sm:$0xff]   ;;  %v4158_v41 = vld [vmem:[%s6407_s7 + $0x290] ss:$8 sps:$4 sm:$0xff]  }
 0x4cc   :  { %v4163_v54 = vld [vmem:[%s6407_s7 + $0x2a4] ss:$8 sps:$4 sm:$0xff]   ;;  %v4161_v62 = vld [vmem:[%s6407_s7 + $0x2a0] ss:$8 sps:$4 sm:$0xff]   ;;  %v4166_v20 = vld [vmem:[%s6407_s7 + $0x2b4] ss:$8 sps:$4 sm:$0xff]  }
 0x4cd   :  { %v2761_v30 = vsel %vm2731_vm6, %v2713_v19, %v2760_v29  ;;  %v4164_v37 = vld [vmem:[%s6407_s7 + $0x2b0] ss:$8 sps:$4 sm:$0xff]   ;;  %v4169_v3 = vld [vmem:[%s6407_s7 + $0x2c4] ss:$8 sps:$4 sm:$0xff]   ;;  %v4167_v0 = vld [vmem:[%s6407_s7 + $0x2c0] ss:$8 sps:$4 sm:$0xff]  }
 0x4ce   :  { %v6238_v39 = vsel %vm2733_vm7, %v2719_v4, %v2761_v30  ;;  %3318 = vmatpush1.bf16.msra.mxu0 %v4104_v26  ;;  %v4172_v48 = vld [vmem:[%s6407_s7 + $0x2d4] ss:$8 sps:$4 sm:$0xff]   ;;  %v4170_v45 = vld [vmem:[%s6407_s7 + $0x2d0] ss:$8 sps:$4 sm:$0xff]   ;;  %v4175_v25 = vld [vmem:[%s6407_s7 + $0x2e4] ss:$8 sps:$4 sm:$0xff]  }
 0x4cf   :  { %3319 = vmatprep.subr.bf16.mxu0 %v4109_v49  ;;  %v4173_v47 = vld [vmem:[%s6407_s7 + $0x2e0] ss:$8 sps:$4 sm:$0xff]   ;;  %v4178_v40 = vld [vmem:[%s6407_s7 + $0x2f4] ss:$8 sps:$4 sm:$0xff]   ;;  %v4176_v15 = vld [vmem:[%s6407_s7 + $0x2f0] ss:$8 sps:$4 sm:$0xff]   ;;  %v2774_v38 = vpack.c.b16 %v6238_v39, %v6238_v39 }
 0x4d0   :  { %v2616_v33 = vshrl.u32 %v2615_v35, 7  ;;  %v2613_v22 = vld [vmem:[%s6408_s8] sm:$0x3]  ;;  %s4339_s7 = scalar_lea.vmem %s3395_s17, 256 }
 0x4d1   :  { %p4340_p0 = scmp.ne.s32.totalorder %s3395_s17, %s4339_s7  ;;  %p4345_p2 = scmp.lt.s32.totalorder %s4339_s7, %s4339_s7 }
 0x4d2   :  { %3320 = vmatpush1.bf16.msra.mxu0 %v4107_v11  ;;  %v2617_v50 = vsub.s32 0, %v2616_v33  ;;  %v2621_v13 = vsub.s32 1, %v2616_v33 }
 0x4d3   :  { %3321 = vmatprep.subr.bf16.mxu0 %v4112_v34  ;;  %p4346_p3 = por %p4345_p2, %p4344_p1 }
 0x4d4   :  { %v2618_v12 = vrot.slane %v2613_v22, %v2617_v50  ;;  %v2622_v5 = vrot.slane %v2613_v22, %v2621_v13 }
 0x4d5   :  { %p4347_p4 = pnand %p4346_p3, %p4340_p0 }
 0x4d6   :  { %3322 = vmatpush1.bf16.msra.mxu0 %v4110_v52 }
 0x4d7   :  { %3323 = vmatprep.subr.bf16.mxu0 %v4115_v59 }
 0x4da   :  { %3324 = vmatpush1.bf16.msra.mxu0 %v4113_v57 }
 0x4db   :  { %3325 = vmatprep.subr.bf16.mxu0 %v4118_v42 }
 0x4de   :  { %3326 = vmatpush1.bf16.msra.mxu0 %v4116_v53 }
 0x4df   :  { %3327 = vmatprep.subr.bf16.mxu0 %v4121_v44 }
 0x4e2   :  { %3328 = vmatpush1.bf16.msra.mxu0 %v4119_v63 }
 0x4e3   :  { %3329 = vmatprep.subr.bf16.mxu0 %v4124_v60 }
 0x4e6   :  { %3330 = vmatpush1.bf16.msra.mxu0 %v4122_v14 }
 0x4e7   :  { %3331 = vmatprep.subr.bf16.mxu0 %v4127_v7 }
 0x4ea   :  { %3332 = vmatpush1.bf16.msra.mxu0 %v4125_v2 }
 0x4eb   :  { %3333 = vmatprep.subr.bf16.mxu0 %v4130_v18 }
 0x4ee   :  { %3334 = vmatpush1.bf16.msra.mxu0 %v4128_v28 }
 0x4ef   :  { %3344 = vmatprep.subr.bf16.mxu0 %v4133_v24 }
 0x4f1   :  { %3336 = vmatmul.mubr.bf16.vlgmr.msra.gmra.mrb[32].mxu0 %v2772_v8 }
 0x4f2   :  { %3345 = vmatpush1.bf16.msra.mxu0 %v4131_v56  ;;  %3376 = vmatprep.mubr.bf16.mxu0 %v2775_v51 }
 0x4f3   :  { %3346 = vmatprep.subr.bf16.mxu0 %v4136_v55 }
 0x4f6   :  { %3347 = vmatpush1.bf16.msra.mxu0 %v4134_v16 }
 0x4f7   :  { %3348 = vmatprep.subr.bf16.mxu0 %v4139_v43 }
 0x4fa   :  { %3349 = vmatpush1.bf16.msra.mxu0 %v4137_v46 }
 0x4fb   :  { %3350 = vmatprep.subr.bf16.mxu0 %v4142_v1 }
 0x4fe   :  { %3351 = vmatpush1.bf16.msra.mxu0 %v4140_v23 }
 0x4ff   :  { %3352 = vmatprep.subr.bf16.mxu0 %v4145_v9 }
 0x502   :  { %3353 = vmatpush1.bf16.msra.mxu0 %v4143_v10 }
 0x503   :  { %3354 = vmatprep.subr.bf16.mxu0 %v4148_v61 }
 0x506   :  { %3355 = vmatpush1.bf16.msra.mxu0 %v4146_v32 }
 0x507   :  { %3356 = vmatprep.subr.bf16.mxu0 %v4151_v36 }
 0x50a   :  { %3357 = vmatpush1.bf16.msra.mxu0 %v4149_v27 }
 0x50b   :  { %3358 = vmatprep.subr.bf16.mxu0 %v4154_v17 }
 0x50e   :  { %3359 = vmatpush1.bf16.msra.mxu0 %v4152_v58 }
 0x50f   :  { %3360 = vmatprep.subr.bf16.mxu0 %v4157_v6 }
 0x512   :  { %3361 = vmatpush1.bf16.msra.mxu0 %v4155_v21 }
 0x513   :  { %3362 = vmatprep.subr.bf16.mxu0 %v4160_v31 }
 0x516   :  { %3363 = vmatpush1.bf16.msra.mxu0 %v4158_v41 }
 0x517   :  { %3364 = vmatprep.subr.bf16.mxu0 %v4163_v54 }
 0x51a   :  { %3365 = vmatpush1.bf16.msra.mxu0 %v4161_v62 }
 0x51b   :  { %3366 = vmatprep.subr.bf16.mxu0 %v4166_v20 }
 0x51e   :  { %3367 = vmatpush1.bf16.msra.mxu0 %v4164_v37 }
 0x51f   :  { %3368 = vmatprep.subr.bf16.mxu0 %v4169_v3 }
 0x522   :  { %3369 = vmatpush1.bf16.msra.mxu0 %v4167_v0 }
 0x523   :  { %3370 = vmatprep.subr.bf16.mxu0 %v4172_v48 }
 0x526   :  { %3371 = vmatpush1.bf16.msra.mxu0 %v4170_v45 }
 0x527   :  { %3372 = vmatprep.subr.bf16.mxu0 %v4175_v25 }
 0x52a   :  { %3373 = vmatpush1.bf16.msra.mxu0 %v4173_v47 }
 0x52b   :  { %3374 = vmatprep.subr.bf16.mxu0 %v4178_v40 }
 0x52e   :  { %3375 = vmatpush1.bf16.msra.mxu0 %v4176_v15 }
 0x531   :  { %3377 = vmatmul.mubr.bf16.vlgmr.msra.gmra.mrb[32].mxu0 %v2774_v38 }
 0x604   :  { %v3378_v4 = vpop.f32.mrb[32].mxu0 }
 0x605   :  { %v3925_v29 = vadd.f32 %v3378_v4, %v2618_v12  ;;  %v3380_v19 = vpop.f32.mrb[33].mxu0 }
 0x606   :  { %v3926_v26 = vadd.f32 %v3380_v19, %v2622_v5  ;;  %v3382_v30 = vpop.f32.mrb[34].mxu0 }
 0x607   :  { %3385 = vst [vmem:[#allocation2] sm:$0xff] %v3925_v29  ;;  %v3383_v49 = vpop.f32.mrb[35].mxu0 }
 0x608   :  { %3387 = vst.msk [vmem:[#allocation2 + $0x8] sm:$0xff] %vm3386_vm8, %v3926_v26 }
 0x609   :  { %4350 = shalt.err (!%p4347_p4)
}
 0x60a   :  { %s4351_s18 = scalar_lea.hbm %s6409_s9, 256 }
 0x60b   :  { %p4352_p5 = scmp.ne.s32.totalorder %s6409_s9, %s4351_s18  ;;  %p4355_p6 = scmp.lt.u32.totalorder %s4351_s18, %s6409_s9 }
 0x60d   :  { %p4357_p7 = pnand %p4355_p6, %p4352_p5 }
 0x60f   :  { %4360 = shalt.err (!%p4357_p7)
}
 0x610   :  { %3397 = dma.vmem_to_hbm [thread:$0]  %s3395_s17, 256, %s6409_s9, [#allocation3]  }
 0x611   :  { %4361 = dma.done.wait [#allocation3], 256  }
 0x612   :  { %4362 = vsyncadd [#allocation3], 4294967040 }
 0x613   :  { %3401 = vsyncpa [#allocation3], 1 }

</bundles_post_ra>
